<compile_context>
chip_gen: v6e
topology: v6e:2x2x1
jax: 0.10.0
libtpu: 0.0.40
codegen_flags: <defaults>
</compile_context>

<pallas_src>
import functools

import jax
import jax.numpy as jnp
from jax import lax
from jax.experimental import pallas as pl
from jax.experimental.pallas import tpu as pltpu

EPS = 1e-5   # nn.LayerNorm default eps
LANE = 128


def _layernorm(x, w, b):
    mu = jnp.mean(x, axis=-1, keepdims=True)
    var = jnp.mean((x - mu) ** 2, axis=-1, keepdims=True)
    return (x - mu) * lax.rsqrt(var + EPS) * w + b


def _gelu_exact(x):
    # F.gelu default (erf form)
    return 0.5 * x * (1.0 + lax.erf(x * 0.7071067811865475))


def _softmax_last(s):
    s = s - jnp.max(s, axis=-1, keepdims=True)
    p = jnp.exp(s)
    return p * pl.reciprocal(jnp.sum(p, axis=-1, keepdims=True), approx=True)


# ---------------------------------------------------------------------------
# Fused kernel: all encoder layers + final norm + sequence pooling + classifier
# for one (batch_tile, N, C) activation block per grid step.
# ---------------------------------------------------------------------------
def fused_classifier_kernel(
        x_ref,
        ln0w_ref, ln0b_ref, wq_ref, wk_ref, wv_ref, wproj_ref, bproj_ref,
        ln1w_ref, ln1b_ref, w1_ref, b1_ref, w2_ref, b2_ref,
        normw_ref, normb_ref, wpool_ref, bpool_ref, wfc_ref, bfc_ref,
        out_ref, *, num_layers, num_heads):
    Bt, N, C = x_ref.shape
    R = Bt * N
    dh = C // num_heads
    scale = dh ** -0.5

    # (Bt, N, C) -> (R, C): leading-dim merge, layout-free.
    x = x_ref[...].astype(jnp.float32).reshape(R, C)

    # Layer loop is unrolled statically (num_layers is small); the whole weight
    # stack stays resident in VMEM for the full forward pass.
    # TODO(synk): at production sizes (C=768, 12 layers) stream one layer's
    # weights at a time (layer grid axis / emit_pipeline) to fit v7x 64 MiB VMEM.
    for l in range(num_layers):
        # --- self attention (pre-norm) ---
        h = _layernorm(x, ln0w_ref[l], ln0b_ref[l])
        q = jnp.dot(h, wq_ref[l], preferred_element_type=jnp.float32)
        k = jnp.dot(h, wk_ref[l], preferred_element_type=jnp.float32)
        v = jnp.dot(h, wv_ref[l], preferred_element_type=jnp.float32)
        q3 = q.reshape(Bt, N, C)
        k3 = k.reshape(Bt, N, C)
        v3 = v.reshape(Bt, N, C)

        # Short static loop over heads; each head is batched over the whole
        # batch tile with a single 3-D contraction (flash-attention pattern).
        head_outs = []
        for hd in range(num_heads):
            sl = slice(hd * dh, (hd + 1) * dh)
            s = jnp.einsum('bnd,bmd->bnm', q3[:, :, sl], k3[:, :, sl],
                           preferred_element_type=jnp.float32) * scale
            p = _softmax_last(s)
            head_outs.append(
                jnp.einsum('bnm,bmd->bnd', p, v3[:, :, sl],
                           preferred_element_type=jnp.float32))
        attn = jnp.concatenate(head_outs, axis=-1).reshape(R, C)
        attn = jnp.dot(attn, wproj_ref[l],
                       preferred_element_type=jnp.float32) + bproj_ref[l]

        src = x + attn
        src = _layernorm(src, ln1w_ref[l], ln1b_ref[l])

        # --- MLP ---
        ff = jnp.dot(src, w1_ref[l], preferred_element_type=jnp.float32) + b1_ref[l]
        ff = _gelu_exact(ff)
        x = src + jnp.dot(ff, w2_ref[l],
                          preferred_element_type=jnp.float32) + b2_ref[l]

    # --- final norm + sequence (attention) pooling + classifier ---
    xn = _layernorm(x, normw_ref[...], normb_ref[...])
    # attention_pool is Linear(C, 1): do it as a broadcast-mul + lane reduce
    # (avoids a degenerate N=1 matmul).
    a = jnp.sum(xn * wpool_ref[...], axis=-1, keepdims=True) + bpool_ref[...]   # (R, 1)
    a3 = a.reshape(Bt, N, 1)
    a3 = a3 - jnp.max(a3, axis=1, keepdims=True)                                # softmax over N
    a3 = jnp.exp(a3)
    a3 = a3 * pl.reciprocal(jnp.sum(a3, axis=1, keepdims=True), approx=True)
    pooled = jnp.sum(a3 * xn.reshape(Bt, N, C), axis=1)                         # (Bt, C)
    logits = jnp.dot(pooled, wfc_ref[...],
                     preferred_element_type=jnp.float32) + bfc_ref[...]         # (Bt, nc_pad)
    out_ref[...] = logits.astype(out_ref.dtype)


# ---------------------------------------------------------------------------
# Host-side parameter preparation & wrapper
# ---------------------------------------------------------------------------
def _const_spec(arr):
    nd = arr.ndim
    return pl.BlockSpec(arr.shape, lambda b, _nd=nd: (0,) * _nd)


def _pick_batch_tile(batch, seq_len):
    """Aim for >= ~512 rows per grid step; the tile must divide the batch and
    (for the lane-dense logits block) be a multiple of 8 or equal the batch."""
    target = max(1, 512 // max(seq_len, 1))
    if batch <= target:
        return batch
    for t in range(target, 0, -1):
        if batch % t == 0 and (t % 8 == 0 or t == batch):
            return t
    return batch


def prepare_params(layer_params, head_params, num_classes):
    """Convert PyTorch-layout parameters to the fused kernel layout:
    stack along L, pre-transpose Linear weights to (in, out), split qkv into
    per-projection stacks, reshape 1-D vectors to (.., 1, C), and zero-pad the
    classifier to a lane-dense multiple of 128 outputs."""
    L = len(layer_params)
    C = layer_params[0]["ln0_w"].shape[0]
    FF = layer_params[0]["b1"].shape[0]

    def stack_vec(name, width):
        return jnp.stack([p[name] for p in layer_params]).reshape(L, 1, width)

    wq = jnp.stack([p["wqkv"][0 * C:1 * C].T for p in layer_params])    # (L, C, C)
    wk = jnp.stack([p["wqkv"][1 * C:2 * C].T for p in layer_params])    # (L, C, C)
    wv = jnp.stack([p["wqkv"][2 * C:3 * C].T for p in layer_params])    # (L, C, C)
    wproj = jnp.stack([p["wproj"].T for p in layer_params])             # (L, C, C)
    w1 = jnp.stack([p["w1"].T for p in layer_params])                   # (L, C, FF)
    w2 = jnp.stack([p["w2"].T for p in layer_params])                   # (L, FF, C)

    nc_pad = LANE * pl.cdiv(num_classes, LANE)
    wfc = head_params["wfc"].T                                          # (C, nc)
    wfc = jnp.pad(wfc, ((0, 0), (0, nc_pad - num_classes)))             # (C, nc_pad)
    bfc = jnp.pad(head_params["bfc"], (0, nc_pad - num_classes)).reshape(1, nc_pad)

    weights = [
        stack_vec("ln0_w", C), stack_vec("ln0_b", C),
        wq, wk, wv, wproj, stack_vec("bproj", C),
        stack_vec("ln1_w", C), stack_vec("ln1_b", C),
        w1, stack_vec("b1", FF), w2, stack_vec("b2", C),
        head_params["norm_w"].reshape(1, C), head_params["norm_b"].reshape(1, C),
        head_params["wpool"].reshape(1, C),    # nn.Linear(C, 1) weight is (1, C)
        head_params["bpool"].reshape(1, 1),
        wfc, bfc,
    ]
    return weights, nc_pad


def transformer_classifier_forward(x, layer_params, head_params, num_heads,
                                   num_classes, batch_tile=None):
    # Input dropout is identity in eval mode.
    B, N, C = x.shape
    weights, nc_pad = prepare_params(layer_params, head_params, num_classes)
    if batch_tile is None:
        batch_tile = _pick_batch_tile(B, N)
    assert B % batch_tile == 0

    kernel = functools.partial(fused_classifier_kernel,
                               num_layers=len(layer_params),
                               num_heads=num_heads)
    in_specs = [pl.BlockSpec((batch_tile, N, C), lambda b: (b, 0, 0))] + \
               [_const_spec(w) for w in weights]
    logits_pad = pl.pallas_call(
        kernel,
        out_shape=jax.ShapeDtypeStruct((B, nc_pad), jnp.float32),
        grid=(B // batch_tile,),
        in_specs=in_specs,
        out_specs=pl.BlockSpec((batch_tile, nc_pad), lambda b: (b, 0)),
        compiler_params=pltpu.CompilerParams(
            dimension_semantics=("parallel",)),   # batch tiles can feed both TCs (v7x)
    )(x, *weights)
    return logits_pad[:, :num_classes]


# ---------------------------------------------------------------------------
# Deterministic parameter initialization (mirrors TransformerClassifier.init_weight)
# ---------------------------------------------------------------------------
def _lin_w(key, out_f, in_f):
    # trunc_normal_(std=0.02) ~ plain normal * 0.02 for this purpose
    return 0.02 * jax.random.normal(key, (out_f, in_f), jnp.float32)


def make_params(key, C, num_heads, ff, num_layers, num_classes):
    layers = []
    for _ in range(num_layers):
        key, k1, k2, k3, k4 = jax.random.split(key, 5)
        layers.append(dict(
            ln0_w=jnp.ones((C,), jnp.float32), ln0_b=jnp.zeros((C,), jnp.float32),
            wqkv=_lin_w(k1, 3 * C, C),
            wproj=_lin_w(k2, C, C), bproj=jnp.zeros((C,), jnp.float32),
            ln1_w=jnp.ones((C,), jnp.float32), ln1_b=jnp.zeros((C,), jnp.float32),
            w1=_lin_w(k3, ff, C), b1=jnp.zeros((ff,), jnp.float32),
            w2=_lin_w(k4, C, ff), b2=jnp.zeros((C,), jnp.float32),
        ))
    key, kp, kf = jax.random.split(key, 3)
    head = dict(
        norm_w=jnp.ones((C,), jnp.float32), norm_b=jnp.zeros((C,), jnp.float32),
        wpool=_lin_w(kp, 1, C), bpool=jnp.zeros((1,), jnp.float32),
        wfc=_lin_w(kf, num_classes, C), bfc=jnp.zeros((num_classes,), jnp.float32),
    )
    return layers, head


if __name__ == "__main__":
    # Small, module-consistent shapes: seq_pool=True, embedding_dim=64,
    # num_layers=2, num_heads=4, mlp_ratio=4, num_classes=10, sequence_length=8.
    B, N, C = 2, 8, 64
    num_heads, num_layers, num_classes = 4, 2, 10
    ff = int(C * 4.0)

    key = jax.random.PRNGKey(0)
    key, kx, kp = jax.random.split(key, 3)
    x = jax.random.normal(kx, (B, N, C), jnp.float32)
    layer_params, head_params = make_params(kp, C, num_heads, ff, num_layers, num_classes)

    logits = transformer_classifier_forward(x, layer_params, head_params,
                                            num_heads, num_classes)
    jax.block_until_ready(logits)
    assert logits.shape == (B, num_classes)
    print("KERNEL_OK")
</pallas_src>

<mosaic_0001>
module attributes {stable_mosaic.version = 11 : i64} {
  func.func @fused_classifier_kernel(%arg0: i32, %arg1: memref<2x8x64xf32, #tpu.memory_space<vmem>>, %arg2: memref<2x1x64xf32, #tpu.memory_space<vmem>>, %arg3: memref<2x1x64xf32, #tpu.memory_space<vmem>>, %arg4: memref<2x64x64xf32, #tpu.memory_space<vmem>>, %arg5: memref<2x64x64xf32, #tpu.memory_space<vmem>>, %arg6: memref<2x64x64xf32, #tpu.memory_space<vmem>>, %arg7: memref<2x64x64xf32, #tpu.memory_space<vmem>>, %arg8: memref<2x1x64xf32, #tpu.memory_space<vmem>>, %arg9: memref<2x1x64xf32, #tpu.memory_space<vmem>>, %arg10: memref<2x1x64xf32, #tpu.memory_space<vmem>>, %arg11: memref<2x64x256xf32, #tpu.memory_space<vmem>>, %arg12: memref<2x1x256xf32, #tpu.memory_space<vmem>>, %arg13: memref<2x256x64xf32, #tpu.memory_space<vmem>>, %arg14: memref<2x1x64xf32, #tpu.memory_space<vmem>>, %arg15: memref<1x64xf32, #tpu.memory_space<vmem>>, %arg16: memref<1x64xf32, #tpu.memory_space<vmem>>, %arg17: memref<1x64xf32, #tpu.memory_space<vmem>>, %arg18: memref<1x1xf32, #tpu.memory_space<vmem>>, %arg19: memref<64x128xf32, #tpu.memory_space<vmem>>, %arg20: memref<1x128xf32, #tpu.memory_space<vmem>>, %arg21: memref<2x128xf32, #tpu.memory_space<vmem>>) attributes {dimension_semantics = [#tpu.dimension_semantics<parallel>], iteration_bounds = array<i64: 1>, scalar_prefetch = 0 : i64, scratch_operands = 0 : i64, tpu.core_type = #tpu.core_type<tc>, window_params = [{transform_indices = @transform_0, window_bounds = array<i64: 2, 8, 64>}, {pipeline_mode = #tpu.pipeline_mode<synchronous>, transform_indices = @transform_1, window_bounds = array<i64: 2, 1, 64>}, {pipeline_mode = #tpu.pipeline_mode<synchronous>, transform_indices = @transform_2, window_bounds = array<i64: 2, 1, 64>}, {pipeline_mode = #tpu.pipeline_mode<synchronous>, transform_indices = @transform_3, window_bounds = array<i64: 2, 64, 64>}, {pipeline_mode = #tpu.pipeline_mode<synchronous>, transform_indices = @transform_4, window_bounds = array<i64: 2, 64, 64>}, {pipeline_mode = #tpu.pipeline_mode<synchronous>, transform_indices = @transform_5, window_bounds = array<i64: 2, 64, 64>}, {pipeline_mode = #tpu.pipeline_mode<synchronous>, transform_indices = @transform_6, window_bounds = array<i64: 2, 64, 64>}, {pipeline_mode = #tpu.pipeline_mode<synchronous>, transform_indices = @transform_7, window_bounds = array<i64: 2, 1, 64>}, {pipeline_mode = #tpu.pipeline_mode<synchronous>, transform_indices = @transform_8, window_bounds = array<i64: 2, 1, 64>}, {pipeline_mode = #tpu.pipeline_mode<synchronous>, transform_indices = @transform_9, window_bounds = array<i64: 2, 1, 64>}, {pipeline_mode = #tpu.pipeline_mode<synchronous>, transform_indices = @transform_10, window_bounds = array<i64: 2, 64, 256>}, {pipeline_mode = #tpu.pipeline_mode<synchronous>, transform_indices = @transform_11, window_bounds = array<i64: 2, 1, 256>}, {pipeline_mode = #tpu.pipeline_mode<synchronous>, transform_indices = @transform_12, window_bounds = array<i64: 2, 256, 64>}, {pipeline_mode = #tpu.pipeline_mode<synchronous>, transform_indices = @transform_13, window_bounds = array<i64: 2, 1, 64>}, {pipeline_mode = #tpu.pipeline_mode<synchronous>, transform_indices = @transform_14, window_bounds = array<i64: 1, 64>}, {pipeline_mode = #tpu.pipeline_mode<synchronous>, transform_indices = @transform_15, window_bounds = array<i64: 1, 64>}, {pipeline_mode = #tpu.pipeline_mode<synchronous>, transform_indices = @transform_16, window_bounds = array<i64: 1, 64>}, {pipeline_mode = #tpu.pipeline_mode<synchronous>, transform_indices = @transform_17, window_bounds = array<i64: 1, 1>}, {pipeline_mode = #tpu.pipeline_mode<synchronous>, transform_indices = @transform_18, window_bounds = array<i64: 64, 128>}, {pipeline_mode = #tpu.pipeline_mode<synchronous>, transform_indices = @transform_19, window_bounds = array<i64: 1, 128>}, {transform_indices = @transform_20, window_bounds = array<i64: 2, 128>}]} {
    %c0 = arith.constant 0 : index
    %c0_0 = arith.constant 0 : index
    %c0_1 = arith.constant 0 : index
    %0 = vector.load %arg1[%c0, %c0_0, %c0_1] : memref<2x8x64xf32, #tpu.memory_space<vmem>>, vector<2x8x64xf32>
    %1 = vector.shape_cast %0 : vector<2x8x64xf32> to vector<16x64xf32>
    %c0_2 = arith.constant 0 : index
    %c0_3 = arith.constant 0 : index
    %c0_4 = arith.constant 0 : index
    %2 = vector.load %arg2[%c0_2, %c0_3, %c0_4] : memref<2x1x64xf32, #tpu.memory_space<vmem>>, vector<1x1x64xf32>
    %3 = vector.shape_cast %2 : vector<1x1x64xf32> to vector<1x64xf32>
    %c0_5 = arith.constant 0 : index
    %c0_6 = arith.constant 0 : index
    %c0_7 = arith.constant 0 : index
    %4 = vector.load %arg3[%c0_5, %c0_6, %c0_7] : memref<2x1x64xf32, #tpu.memory_space<vmem>>, vector<1x1x64xf32>
    %5 = vector.shape_cast %4 : vector<1x1x64xf32> to vector<1x64xf32>
    %cst = arith.constant dense<0.000000e+00> : vector<16xf32>
    %6 = vector.multi_reduction <add>, %1, %cst [1] : vector<16x64xf32> to vector<16xf32>
    %7 = vector.shape_cast %6 : vector<16xf32> to vector<16x1xf32>
    %cst_8 = arith.constant 6.400000e+01 : f32
    %8 = vector.broadcast %cst_8 : f32 to vector<16x1xf32>
    %9 = arith.divf %7, %8 : vector<16x1xf32>
    %10 = vector.broadcast %9 : vector<16x1xf32> to vector<16x64xf32>
    %11 = arith.subf %1, %10 : vector<16x64xf32>
    %12 = arith.mulf %11, %11 : vector<16x64xf32>
    %cst_9 = arith.constant dense<0.000000e+00> : vector<16xf32>
    %13 = vector.multi_reduction <add>, %12, %cst_9 [1] : vector<16x64xf32> to vector<16xf32>
    %14 = vector.shape_cast %13 : vector<16xf32> to vector<16x1xf32>
    %cst_10 = arith.constant 6.400000e+01 : f32
    %15 = vector.broadcast %cst_10 : f32 to vector<16x1xf32>
    %16 = arith.divf %14, %15 : vector<16x1xf32>
    %17 = vector.broadcast %9 : vector<16x1xf32> to vector<16x64xf32>
    %18 = arith.subf %1, %17 : vector<16x64xf32>
    %cst_11 = arith.constant 9.99999974E-6 : f32
    %19 = vector.broadcast %cst_11 : f32 to vector<16x1xf32>
    %20 = arith.addf %16, %19 : vector<16x1xf32>
    %21 = math.rsqrt %20 : vector<16x1xf32>
    %22 = vector.broadcast %21 : vector<16x1xf32> to vector<16x64xf32>
    %23 = arith.mulf %18, %22 : vector<16x64xf32>
    %24 = vector.broadcast %3 : vector<1x64xf32> to vector<16x64xf32>
    %25 = arith.mulf %23, %24 : vector<16x64xf32>
    %26 = vector.broadcast %5 : vector<1x64xf32> to vector<16x64xf32>
    %27 = arith.addf %25, %26 : vector<16x64xf32>
    %c0_12 = arith.constant 0 : index
    %c0_13 = arith.constant 0 : index
    %c0_14 = arith.constant 0 : index
    %28 = vector.load %arg4[%c0_12, %c0_13, %c0_14] : memref<2x64x64xf32, #tpu.memory_space<vmem>>, vector<1x64x64xf32>
    %29 = vector.shape_cast %28 : vector<1x64x64xf32> to vector<64x64xf32>
    %cst_15 = arith.constant dense<0.000000e+00> : vector<16x64xf32>
    %30 = tpu.matmul %27, %29, %cst_15 {dimension_numbers = #tpu.dot_dimension_numbers<[1], [0], [0], [1], [0, 0, 1, 1], [], []>} : vector<16x64xf32>, vector<64x64xf32>, vector<16x64xf32> -> vector<16x64xf32>
    %c0_16 = arith.constant 0 : index
    %c0_17 = arith.constant 0 : index
    %c0_18 = arith.constant 0 : index
    %31 = vector.load %arg5[%c0_16, %c0_17, %c0_18] : memref<2x64x64xf32, #tpu.memory_space<vmem>>, vector<1x64x64xf32>
    %32 = vector.shape_cast %31 : vector<1x64x64xf32> to vector<64x64xf32>
    %cst_19 = arith.constant dense<0.000000e+00> : vector<16x64xf32>
    %33 = tpu.matmul %27, %32, %cst_19 {dimension_numbers = #tpu.dot_dimension_numbers<[1], [0], [0], [1], [0, 0, 1, 1], [], []>} : vector<16x64xf32>, vector<64x64xf32>, vector<16x64xf32> -> vector<16x64xf32>
    %c0_20 = arith.constant 0 : index
    %c0_21 = arith.constant 0 : index
    %c0_22 = arith.constant 0 : index
    %34 = vector.load %arg6[%c0_20, %c0_21, %c0_22] : memref<2x64x64xf32, #tpu.memory_space<vmem>>, vector<1x64x64xf32>
    %35 = vector.shape_cast %34 : vector<1x64x64xf32> to vector<64x64xf32>
    %cst_23 = arith.constant dense<0.000000e+00> : vector<16x64xf32>
    %36 = tpu.matmul %27, %35, %cst_23 {dimension_numbers = #tpu.dot_dimension_numbers<[1], [0], [0], [1], [0, 0, 1, 1], [], []>} : vector<16x64xf32>, vector<64x64xf32>, vector<16x64xf32> -> vector<16x64xf32>
    %37 = vector.shape_cast %30 : vector<16x64xf32> to vector<2x8x64xf32>
    %38 = vector.shape_cast %33 : vector<16x64xf32> to vector<2x8x64xf32>
    %39 = vector.shape_cast %36 : vector<16x64xf32> to vector<2x8x64xf32>
    %40 = vector.extract_strided_slice %37 {offsets = [0, 0, 0], sizes = [2, 8, 16], strides = [1, 1, 1]} : vector<2x8x64xf32> to vector<2x8x16xf32>
    %41 = vector.extract_strided_slice %38 {offsets = [0, 0, 0], sizes = [2, 8, 16], strides = [1, 1, 1]} : vector<2x8x64xf32> to vector<2x8x16xf32>
    "tpu.trace_start"() <{level = 10 : i32, message = "bnd,bmd->bnm"}> : () -> ()
    %cst_24 = arith.constant dense<0.000000e+00> : vector<2x8x8xf32>
    %42 = tpu.matmul %40, %41, %cst_24 {dimension_numbers = #tpu.dot_dimension_numbers<[2], [2], [1], [1], [0, 0, 0, 1, 1, 1], [0], [0]>} : vector<2x8x16xf32>, vector<2x8x16xf32>, vector<2x8x8xf32> -> vector<2x8x8xf32>
    "tpu.trace_stop"() : () -> ()
    %cst_25 = arith.constant 2.500000e-01 : f32
    %43 = vector.broadcast %cst_25 : f32 to vector<2x8x8xf32>
    %44 = arith.mulf %42, %43 : vector<2x8x8xf32>
    %cst_26 = arith.constant dense<0xFF800000> : vector<2x8xf32>
    %45 = vector.multi_reduction <maximumf>, %44, %cst_26 [2] : vector<2x8x8xf32> to vector<2x8xf32>
    %46 = vector.shape_cast %45 : vector<2x8xf32> to vector<2x8x1xf32>
    %47 = vector.broadcast %46 : vector<2x8x1xf32> to vector<2x8x8xf32>
    %48 = arith.subf %44, %47 : vector<2x8x8xf32>
    %49 = math.exp %48 : vector<2x8x8xf32>
    %cst_27 = arith.constant dense<0.000000e+00> : vector<2x8xf32>
    %50 = vector.multi_reduction <add>, %49, %cst_27 [2] : vector<2x8x8xf32> to vector<2x8xf32>
    %51 = vector.shape_cast %50 : vector<2x8xf32> to vector<2x8x1xf32>
    %52 = tpu.reciprocal %51 {approx = true} : vector<2x8x1xf32> -> vector<2x8x1xf32>
    %53 = vector.broadcast %52 : vector<2x8x1xf32> to vector<2x8x8xf32>
    %54 = arith.mulf %49, %53 : vector<2x8x8xf32>
    %55 = vector.extract_strided_slice %39 {offsets = [0, 0, 0], sizes = [2, 8, 16], strides = [1, 1, 1]} : vector<2x8x64xf32> to vector<2x8x16xf32>
    "tpu.trace_start"() <{level = 10 : i32, message = "bnm,bmd->bnd"}> : () -> ()
    %cst_28 = arith.constant dense<0.000000e+00> : vector<2x8x16xf32>
    %56 = tpu.matmul %54, %55, %cst_28 {dimension_numbers = #tpu.dot_dimension_numbers<[2], [1], [1], [2], [0, 0, 0, 1, 1, 2], [0], [0]>} : vector<2x8x8xf32>, vector<2x8x16xf32>, vector<2x8x16xf32> -> vector<2x8x16xf32>
    "tpu.trace_stop"() : () -> ()
    %57 = vector.extract_strided_slice %37 {offsets = [0, 0, 16], sizes = [2, 8, 16], strides = [1, 1, 1]} : vector<2x8x64xf32> to vector<2x8x16xf32>
    %58 = vector.extract_strided_slice %38 {offsets = [0, 0, 16], sizes = [2, 8, 16], strides = [1, 1, 1]} : vector<2x8x64xf32> to vector<2x8x16xf32>
    "tpu.trace_start"() <{level = 10 : i32, message = "bnd,bmd->bnm"}> : () -> ()
    %cst_29 = arith.constant dense<0.000000e+00> : vector<2x8x8xf32>
    %59 = tpu.matmul %57, %58, %cst_29 {dimension_numbers = #tpu.dot_dimension_numbers<[2], [2], [1], [1], [0, 0, 0, 1, 1, 1], [0], [0]>} : vector<2x8x16xf32>, vector<2x8x16xf32>, vector<2x8x8xf32> -> vector<2x8x8xf32>
    "tpu.trace_stop"() : () -> ()
    %cst_30 = arith.constant 2.500000e-01 : f32
    %60 = vector.broadcast %cst_30 : f32 to vector<2x8x8xf32>
    %61 = arith.mulf %59, %60 : vector<2x8x8xf32>
    %cst_31 = arith.constant dense<0xFF800000> : vector<2x8xf32>
    %62 = vector.multi_reduction <maximumf>, %61, %cst_31 [2] : vector<2x8x8xf32> to vector<2x8xf32>
    %63 = vector.shape_cast %62 : vector<2x8xf32> to vector<2x8x1xf32>
    %64 = vector.broadcast %63 : vector<2x8x1xf32> to vector<2x8x8xf32>
    %65 = arith.subf %61, %64 : vector<2x8x8xf32>
    %66 = math.exp %65 : vector<2x8x8xf32>
    %cst_32 = arith.constant dense<0.000000e+00> : vector<2x8xf32>
    %67 = vector.multi_reduction <add>, %66, %cst_32 [2] : vector<2x8x8xf32> to vector<2x8xf32>
    %68 = vector.shape_cast %67 : vector<2x8xf32> to vector<2x8x1xf32>
    %69 = tpu.reciprocal %68 {approx = true} : vector<2x8x1xf32> -> vector<2x8x1xf32>
    %70 = vector.broadcast %69 : vector<2x8x1xf32> to vector<2x8x8xf32>
    %71 = arith.mulf %66, %70 : vector<2x8x8xf32>
    %72 = vector.extract_strided_slice %39 {offsets = [0, 0, 16], sizes = [2, 8, 16], strides = [1, 1, 1]} : vector<2x8x64xf32> to vector<2x8x16xf32>
    "tpu.trace_start"() <{level = 10 : i32, message = "bnm,bmd->bnd"}> : () -> ()
    %cst_33 = arith.constant dense<0.000000e+00> : vector<2x8x16xf32>
    %73 = tpu.matmul %71, %72, %cst_33 {dimension_numbers = #tpu.dot_dimension_numbers<[2], [1], [1], [2], [0, 0, 0, 1, 1, 2], [0], [0]>} : vector<2x8x8xf32>, vector<2x8x16xf32>, vector<2x8x16xf32> -> vector<2x8x16xf32>
    "tpu.trace_stop"() : () -> ()
    %74 = vector.extract_strided_slice %37 {offsets = [0, 0, 32], sizes = [2, 8, 16], strides = [1, 1, 1]} : vector<2x8x64xf32> to vector<2x8x16xf32>
    %75 = vector.extract_strided_slice %38 {offsets = [0, 0, 32], sizes = [2, 8, 16], strides = [1, 1, 1]} : vector<2x8x64xf32> to vector<2x8x16xf32>
    "tpu.trace_start"() <{level = 10 : i32, message = "bnd,bmd->bnm"}> : () -> ()
    %cst_34 = arith.constant dense<0.000000e+00> : vector<2x8x8xf32>
    %76 = tpu.matmul %74, %75, %cst_34 {dimension_numbers = #tpu.dot_dimension_numbers<[2], [2], [1], [1], [0, 0, 0, 1, 1, 1], [0], [0]>} : vector<2x8x16xf32>, vector<2x8x16xf32>, vector<2x8x8xf32> -> vector<2x8x8xf32>
    "tpu.trace_stop"() : () -> ()
    %cst_35 = arith.constant 2.500000e-01 : f32
    %77 = vector.broadcast %cst_35 : f32 to vector<2x8x8xf32>
    %78 = arith.mulf %76, %77 : vector<2x8x8xf32>
    %cst_36 = arith.constant dense<0xFF800000> : vector<2x8xf32>
    %79 = vector.multi_reduction <maximumf>, %78, %cst_36 [2] : vector<2x8x8xf32> to vector<2x8xf32>
    %80 = vector.shape_cast %79 : vector<2x8xf32> to vector<2x8x1xf32>
    %81 = vector.broadcast %80 : vector<2x8x1xf32> to vector<2x8x8xf32>
    %82 = arith.subf %78, %81 : vector<2x8x8xf32>
    %83 = math.exp %82 : vector<2x8x8xf32>
    %cst_37 = arith.constant dense<0.000000e+00> : vector<2x8xf32>
    %84 = vector.multi_reduction <add>, %83, %cst_37 [2] : vector<2x8x8xf32> to vector<2x8xf32>
    %85 = vector.shape_cast %84 : vector<2x8xf32> to vector<2x8x1xf32>
    %86 = tpu.reciprocal %85 {approx = true} : vector<2x8x1xf32> -> vector<2x8x1xf32>
    %87 = vector.broadcast %86 : vector<2x8x1xf32> to vector<2x8x8xf32>
    %88 = arith.mulf %83, %87 : vector<2x8x8xf32>
    %89 = vector.extract_strided_slice %39 {offsets = [0, 0, 32], sizes = [2, 8, 16], strides = [1, 1, 1]} : vector<2x8x64xf32> to vector<2x8x16xf32>
    "tpu.trace_start"() <{level = 10 : i32, message = "bnm,bmd->bnd"}> : () -> ()
    %cst_38 = arith.constant dense<0.000000e+00> : vector<2x8x16xf32>
    %90 = tpu.matmul %88, %89, %cst_38 {dimension_numbers = #tpu.dot_dimension_numbers<[2], [1], [1], [2], [0, 0, 0, 1, 1, 2], [0], [0]>} : vector<2x8x8xf32>, vector<2x8x16xf32>, vector<2x8x16xf32> -> vector<2x8x16xf32>
    "tpu.trace_stop"() : () -> ()
    %91 = vector.extract_strided_slice %37 {offsets = [0, 0, 48], sizes = [2, 8, 16], strides = [1, 1, 1]} : vector<2x8x64xf32> to vector<2x8x16xf32>
    %92 = vector.extract_strided_slice %38 {offsets = [0, 0, 48], sizes = [2, 8, 16], strides = [1, 1, 1]} : vector<2x8x64xf32> to vector<2x8x16xf32>
    "tpu.trace_start"() <{level = 10 : i32, message = "bnd,bmd->bnm"}> : () -> ()
    %cst_39 = arith.constant dense<0.000000e+00> : vector<2x8x8xf32>
    %93 = tpu.matmul %91, %92, %cst_39 {dimension_numbers = #tpu.dot_dimension_numbers<[2], [2], [1], [1], [0, 0, 0, 1, 1, 1], [0], [0]>} : vector<2x8x16xf32>, vector<2x8x16xf32>, vector<2x8x8xf32> -> vector<2x8x8xf32>
    "tpu.trace_stop"() : () -> ()
    %cst_40 = arith.constant 2.500000e-01 : f32
    %94 = vector.broadcast %cst_40 : f32 to vector<2x8x8xf32>
    %95 = arith.mulf %93, %94 : vector<2x8x8xf32>
    %cst_41 = arith.constant dense<0xFF800000> : vector<2x8xf32>
    %96 = vector.multi_reduction <maximumf>, %95, %cst_41 [2] : vector<2x8x8xf32> to vector<2x8xf32>
    %97 = vector.shape_cast %96 : vector<2x8xf32> to vector<2x8x1xf32>
    %98 = vector.broadcast %97 : vector<2x8x1xf32> to vector<2x8x8xf32>
    %99 = arith.subf %95, %98 : vector<2x8x8xf32>
    %100 = math.exp %99 : vector<2x8x8xf32>
    %cst_42 = arith.constant dense<0.000000e+00> : vector<2x8xf32>
    %101 = vector.multi_reduction <add>, %100, %cst_42 [2] : vector<2x8x8xf32> to vector<2x8xf32>
    %102 = vector.shape_cast %101 : vector<2x8xf32> to vector<2x8x1xf32>
    %103 = tpu.reciprocal %102 {approx = true} : vector<2x8x1xf32> -> vector<2x8x1xf32>
    %104 = vector.broadcast %103 : vector<2x8x1xf32> to vector<2x8x8xf32>
    %105 = arith.mulf %100, %104 : vector<2x8x8xf32>
    %106 = vector.extract_strided_slice %39 {offsets = [0, 0, 48], sizes = [2, 8, 16], strides = [1, 1, 1]} : vector<2x8x64xf32> to vector<2x8x16xf32>
    "tpu.trace_start"() <{level = 10 : i32, message = "bnm,bmd->bnd"}> : () -> ()
    %cst_43 = arith.constant dense<0.000000e+00> : vector<2x8x16xf32>
    %107 = tpu.matmul %105, %106, %cst_43 {dimension_numbers = #tpu.dot_dimension_numbers<[2], [1], [1], [2], [0, 0, 0, 1, 1, 2], [0], [0]>} : vector<2x8x8xf32>, vector<2x8x16xf32>, vector<2x8x16xf32> -> vector<2x8x16xf32>
    "tpu.trace_stop"() : () -> ()
    %108 = tpu.concatenate %56, %73, %90, %107 in 2 : vector<2x8x16xf32>, vector<2x8x16xf32>, vector<2x8x16xf32>, vector<2x8x16xf32> -> vector<2x8x64xf32>
    %109 = vector.shape_cast %108 : vector<2x8x64xf32> to vector<16x64xf32>
    %c0_44 = arith.constant 0 : index
    %c0_45 = arith.constant 0 : index
    %c0_46 = arith.constant 0 : index
    %110 = vector.load %arg7[%c0_44, %c0_45, %c0_46] : memref<2x64x64xf32, #tpu.memory_space<vmem>>, vector<1x64x64xf32>
    %111 = vector.shape_cast %110 : vector<1x64x64xf32> to vector<64x64xf32>
    %cst_47 = arith.constant dense<0.000000e+00> : vector<16x64xf32>
    %112 = tpu.matmul %109, %111, %cst_47 {dimension_numbers = #tpu.dot_dimension_numbers<[1], [0], [0], [1], [0, 0, 1, 1], [], []>} : vector<16x64xf32>, vector<64x64xf32>, vector<16x64xf32> -> vector<16x64xf32>
    %c0_48 = arith.constant 0 : index
    %c0_49 = arith.constant 0 : index
    %c0_50 = arith.constant 0 : index
    %113 = vector.load %arg8[%c0_48, %c0_49, %c0_50] : memref<2x1x64xf32, #tpu.memory_space<vmem>>, vector<1x1x64xf32>
    %114 = vector.shape_cast %113 : vector<1x1x64xf32> to vector<1x64xf32>
    %115 = vector.broadcast %114 : vector<1x64xf32> to vector<16x64xf32>
    %116 = arith.addf %112, %115 : vector<16x64xf32>
    %117 = arith.addf %1, %116 : vector<16x64xf32>
    %c0_51 = arith.constant 0 : index
    %c0_52 = arith.constant 0 : index
    %c0_53 = arith.constant 0 : index
    %118 = vector.load %arg9[%c0_51, %c0_52, %c0_53] : memref<2x1x64xf32, #tpu.memory_space<vmem>>, vector<1x1x64xf32>
    %119 = vector.shape_cast %118 : vector<1x1x64xf32> to vector<1x64xf32>
    %c0_54 = arith.constant 0 : index
    %c0_55 = arith.constant 0 : index
    %c0_56 = arith.constant 0 : index
    %120 = vector.load %arg10[%c0_54, %c0_55, %c0_56] : memref<2x1x64xf32, #tpu.memory_space<vmem>>, vector<1x1x64xf32>
    %121 = vector.shape_cast %120 : vector<1x1x64xf32> to vector<1x64xf32>
    %cst_57 = arith.constant dense<0.000000e+00> : vector<16xf32>
    %122 = vector.multi_reduction <add>, %117, %cst_57 [1] : vector<16x64xf32> to vector<16xf32>
    %123 = vector.shape_cast %122 : vector<16xf32> to vector<16x1xf32>
    %cst_58 = arith.constant 6.400000e+01 : f32
    %124 = vector.broadcast %cst_58 : f32 to vector<16x1xf32>
    %125 = arith.divf %123, %124 : vector<16x1xf32>
    %126 = vector.broadcast %125 : vector<16x1xf32> to vector<16x64xf32>
    %127 = arith.subf %117, %126 : vector<16x64xf32>
    %128 = arith.mulf %127, %127 : vector<16x64xf32>
    %cst_59 = arith.constant dense<0.000000e+00> : vector<16xf32>
    %129 = vector.multi_reduction <add>, %128, %cst_59 [1] : vector<16x64xf32> to vector<16xf32>
    %130 = vector.shape_cast %129 : vector<16xf32> to vector<16x1xf32>
    %cst_60 = arith.constant 6.400000e+01 : f32
    %131 = vector.broadcast %cst_60 : f32 to vector<16x1xf32>
    %132 = arith.divf %130, %131 : vector<16x1xf32>
    %133 = vector.broadcast %125 : vector<16x1xf32> to vector<16x64xf32>
    %134 = arith.subf %117, %133 : vector<16x64xf32>
    %cst_61 = arith.constant 9.99999974E-6 : f32
    %135 = vector.broadcast %cst_61 : f32 to vector<16x1xf32>
    %136 = arith.addf %132, %135 : vector<16x1xf32>
    %137 = math.rsqrt %136 : vector<16x1xf32>
    %138 = vector.broadcast %137 : vector<16x1xf32> to vector<16x64xf32>
    %139 = arith.mulf %134, %138 : vector<16x64xf32>
    %140 = vector.broadcast %119 : vector<1x64xf32> to vector<16x64xf32>
    %141 = arith.mulf %139, %140 : vector<16x64xf32>
    %142 = vector.broadcast %121 : vector<1x64xf32> to vector<16x64xf32>
    %143 = arith.addf %141, %142 : vector<16x64xf32>
    %c0_62 = arith.constant 0 : index
    %c0_63 = arith.constant 0 : index
    %c0_64 = arith.constant 0 : index
    %144 = vector.load %arg11[%c0_62, %c0_63, %c0_64] : memref<2x64x256xf32, #tpu.memory_space<vmem>>, vector<1x64x256xf32>
    %145 = vector.shape_cast %144 : vector<1x64x256xf32> to vector<64x256xf32>
    %cst_65 = arith.constant dense<0.000000e+00> : vector<16x256xf32>
    %146 = tpu.matmul %143, %145, %cst_65 {dimension_numbers = #tpu.dot_dimension_numbers<[1], [0], [0], [1], [0, 0, 1, 1], [], []>} : vector<16x64xf32>, vector<64x256xf32>, vector<16x256xf32> -> vector<16x256xf32>
    %c0_66 = arith.constant 0 : index
    %c0_67 = arith.constant 0 : index
    %c0_68 = arith.constant 0 : index
    %147 = vector.load %arg12[%c0_66, %c0_67, %c0_68] : memref<2x1x256xf32, #tpu.memory_space<vmem>>, vector<1x1x256xf32>
    %148 = vector.shape_cast %147 : vector<1x1x256xf32> to vector<1x256xf32>
    %149 = vector.broadcast %148 : vector<1x256xf32> to vector<16x256xf32>
    %150 = arith.addf %146, %149 : vector<16x256xf32>
    %cst_69 = arith.constant 5.000000e-01 : f32
    %151 = vector.broadcast %cst_69 : f32 to vector<16x256xf32>
    %152 = arith.mulf %151, %150 : vector<16x256xf32>
    %cst_70 = arith.constant 0.707106769 : f32
    %153 = vector.broadcast %cst_70 : f32 to vector<16x256xf32>
    %154 = arith.mulf %150, %153 : vector<16x256xf32>
    %155 = math.erf %154 : vector<16x256xf32>
    %cst_71 = arith.constant 1.000000e+00 : f32
    %156 = vector.broadcast %cst_71 : f32 to vector<16x256xf32>
    %157 = arith.addf %156, %155 : vector<16x256xf32>
    %158 = arith.mulf %152, %157 : vector<16x256xf32>
    %c0_72 = arith.constant 0 : index
    %c0_73 = arith.constant 0 : index
    %c0_74 = arith.constant 0 : index
    %159 = vector.load %arg13[%c0_72, %c0_73, %c0_74] : memref<2x256x64xf32, #tpu.memory_space<vmem>>, vector<1x256x64xf32>
    %160 = vector.shape_cast %159 : vector<1x256x64xf32> to vector<256x64xf32>
    %cst_75 = arith.constant dense<0.000000e+00> : vector<16x64xf32>
    %161 = tpu.matmul %158, %160, %cst_75 {dimension_numbers = #tpu.dot_dimension_numbers<[1], [0], [0], [1], [0, 0, 1, 1], [], []>} : vector<16x256xf32>, vector<256x64xf32>, vector<16x64xf32> -> vector<16x64xf32>
    %162 = arith.addf %143, %161 : vector<16x64xf32>
    %c0_76 = arith.constant 0 : index
    %c0_77 = arith.constant 0 : index
    %c0_78 = arith.constant 0 : index
    %163 = vector.load %arg14[%c0_76, %c0_77, %c0_78] : memref<2x1x64xf32, #tpu.memory_space<vmem>>, vector<1x1x64xf32>
    %164 = vector.shape_cast %163 : vector<1x1x64xf32> to vector<1x64xf32>
    %165 = vector.broadcast %164 : vector<1x64xf32> to vector<16x64xf32>
    %166 = arith.addf %162, %165 : vector<16x64xf32>
    %c1 = arith.constant 1 : index
    %c0_79 = arith.constant 0 : index
    %c0_80 = arith.constant 0 : index
    %167 = vector.load %arg2[%c1, %c0_79, %c0_80] : memref<2x1x64xf32, #tpu.memory_space<vmem>>, vector<1x1x64xf32>
    %168 = vector.shape_cast %167 : vector<1x1x64xf32> to vector<1x64xf32>
    %c1_81 = arith.constant 1 : index
    %c0_82 = arith.constant 0 : index
    %c0_83 = arith.constant 0 : index
    %169 = vector.load %arg3[%c1_81, %c0_82, %c0_83] : memref<2x1x64xf32, #tpu.memory_space<vmem>>, vector<1x1x64xf32>
    %170 = vector.shape_cast %169 : vector<1x1x64xf32> to vector<1x64xf32>
    %cst_84 = arith.constant dense<0.000000e+00> : vector<16xf32>
    %171 = vector.multi_reduction <add>, %166, %cst_84 [1] : vector<16x64xf32> to vector<16xf32>
    %172 = vector.shape_cast %171 : vector<16xf32> to vector<16x1xf32>
    %cst_85 = arith.constant 6.400000e+01 : f32
    %173 = vector.broadcast %cst_85 : f32 to vector<16x1xf32>
    %174 = arith.divf %172, %173 : vector<16x1xf32>
    %175 = vector.broadcast %174 : vector<16x1xf32> to vector<16x64xf32>
    %176 = arith.subf %166, %175 : vector<16x64xf32>
    %177 = arith.mulf %176, %176 : vector<16x64xf32>
    %cst_86 = arith.constant dense<0.000000e+00> : vector<16xf32>
    %178 = vector.multi_reduction <add>, %177, %cst_86 [1] : vector<16x64xf32> to vector<16xf32>
    %179 = vector.shape_cast %178 : vector<16xf32> to vector<16x1xf32>
    %cst_87 = arith.constant 6.400000e+01 : f32
    %180 = vector.broadcast %cst_87 : f32 to vector<16x1xf32>
    %181 = arith.divf %179, %180 : vector<16x1xf32>
    %182 = vector.broadcast %174 : vector<16x1xf32> to vector<16x64xf32>
    %183 = arith.subf %166, %182 : vector<16x64xf32>
    %cst_88 = arith.constant 9.99999974E-6 : f32
    %184 = vector.broadcast %cst_88 : f32 to vector<16x1xf32>
    %185 = arith.addf %181, %184 : vector<16x1xf32>
    %186 = math.rsqrt %185 : vector<16x1xf32>
    %187 = vector.broadcast %186 : vector<16x1xf32> to vector<16x64xf32>
    %188 = arith.mulf %183, %187 : vector<16x64xf32>
    %189 = vector.broadcast %168 : vector<1x64xf32> to vector<16x64xf32>
    %190 = arith.mulf %188, %189 : vector<16x64xf32>
    %191 = vector.broadcast %170 : vector<1x64xf32> to vector<16x64xf32>
    %192 = arith.addf %190, %191 : vector<16x64xf32>
    %c1_89 = arith.constant 1 : index
    %c0_90 = arith.constant 0 : index
    %c0_91 = arith.constant 0 : index
    %193 = vector.load %arg4[%c1_89, %c0_90, %c0_91] : memref<2x64x64xf32, #tpu.memory_space<vmem>>, vector<1x64x64xf32>
    %194 = vector.shape_cast %193 : vector<1x64x64xf32> to vector<64x64xf32>
    %cst_92 = arith.constant dense<0.000000e+00> : vector<16x64xf32>
    %195 = tpu.matmul %192, %194, %cst_92 {dimension_numbers = #tpu.dot_dimension_numbers<[1], [0], [0], [1], [0, 0, 1, 1], [], []>} : vector<16x64xf32>, vector<64x64xf32>, vector<16x64xf32> -> vector<16x64xf32>
    %c1_93 = arith.constant 1 : index
    %c0_94 = arith.constant 0 : index
    %c0_95 = arith.constant 0 : index
    %196 = vector.load %arg5[%c1_93, %c0_94, %c0_95] : memref<2x64x64xf32, #tpu.memory_space<vmem>>, vector<1x64x64xf32>
    %197 = vector.shape_cast %196 : vector<1x64x64xf32> to vector<64x64xf32>
    %cst_96 = arith.constant dense<0.000000e+00> : vector<16x64xf32>
    %198 = tpu.matmul %192, %197, %cst_96 {dimension_numbers = #tpu.dot_dimension_numbers<[1], [0], [0], [1], [0, 0, 1, 1], [], []>} : vector<16x64xf32>, vector<64x64xf32>, vector<16x64xf32> -> vector<16x64xf32>
    %c1_97 = arith.constant 1 : index
    %c0_98 = arith.constant 0 : index
    %c0_99 = arith.constant 0 : index
    %199 = vector.load %arg6[%c1_97, %c0_98, %c0_99] : memref<2x64x64xf32, #tpu.memory_space<vmem>>, vector<1x64x64xf32>
    %200 = vector.shape_cast %199 : vector<1x64x64xf32> to vector<64x64xf32>
    %cst_100 = arith.constant dense<0.000000e+00> : vector<16x64xf32>
    %201 = tpu.matmul %192, %200, %cst_100 {dimension_numbers = #tpu.dot_dimension_numbers<[1], [0], [0], [1], [0, 0, 1, 1], [], []>} : vector<16x64xf32>, vector<64x64xf32>, vector<16x64xf32> -> vector<16x64xf32>
    %202 = vector.shape_cast %195 : vector<16x64xf32> to vector<2x8x64xf32>
    %203 = vector.shape_cast %198 : vector<16x64xf32> to vector<2x8x64xf32>
    %204 = vector.shape_cast %201 : vector<16x64xf32> to vector<2x8x64xf32>
    %205 = vector.extract_strided_slice %202 {offsets = [0, 0, 0], sizes = [2, 8, 16], strides = [1, 1, 1]} : vector<2x8x64xf32> to vector<2x8x16xf32>
    %206 = vector.extract_strided_slice %203 {offsets = [0, 0, 0], sizes = [2, 8, 16], strides = [1, 1, 1]} : vector<2x8x64xf32> to vector<2x8x16xf32>
    "tpu.trace_start"() <{level = 10 : i32, message = "bnd,bmd->bnm"}> : () -> ()
    %cst_101 = arith.constant dense<0.000000e+00> : vector<2x8x8xf32>
    %207 = tpu.matmul %205, %206, %cst_101 {dimension_numbers = #tpu.dot_dimension_numbers<[2], [2], [1], [1], [0, 0, 0, 1, 1, 1], [0], [0]>} : vector<2x8x16xf32>, vector<2x8x16xf32>, vector<2x8x8xf32> -> vector<2x8x8xf32>
    "tpu.trace_stop"() : () -> ()
    %cst_102 = arith.constant 2.500000e-01 : f32
    %208 = vector.broadcast %cst_102 : f32 to vector<2x8x8xf32>
    %209 = arith.mulf %207, %208 : vector<2x8x8xf32>
    %cst_103 = arith.constant dense<0xFF800000> : vector<2x8xf32>
    %210 = vector.multi_reduction <maximumf>, %209, %cst_103 [2] : vector<2x8x8xf32> to vector<2x8xf32>
    %211 = vector.shape_cast %210 : vector<2x8xf32> to vector<2x8x1xf32>
    %212 = vector.broadcast %211 : vector<2x8x1xf32> to vector<2x8x8xf32>
    %213 = arith.subf %209, %212 : vector<2x8x8xf32>
    %214 = math.exp %213 : vector<2x8x8xf32>
    %cst_104 = arith.constant dense<0.000000e+00> : vector<2x8xf32>
    %215 = vector.multi_reduction <add>, %214, %cst_104 [2] : vector<2x8x8xf32> to vector<2x8xf32>
    %216 = vector.shape_cast %215 : vector<2x8xf32> to vector<2x8x1xf32>
    %217 = tpu.reciprocal %216 {approx = true} : vector<2x8x1xf32> -> vector<2x8x1xf32>
    %218 = vector.broadcast %217 : vector<2x8x1xf32> to vector<2x8x8xf32>
    %219 = arith.mulf %214, %218 : vector<2x8x8xf32>
    %220 = vector.extract_strided_slice %204 {offsets = [0, 0, 0], sizes = [2, 8, 16], strides = [1, 1, 1]} : vector<2x8x64xf32> to vector<2x8x16xf32>
    "tpu.trace_start"() <{level = 10 : i32, message = "bnm,bmd->bnd"}> : () -> ()
    %cst_105 = arith.constant dense<0.000000e+00> : vector<2x8x16xf32>
    %221 = tpu.matmul %219, %220, %cst_105 {dimension_numbers = #tpu.dot_dimension_numbers<[2], [1], [1], [2], [0, 0, 0, 1, 1, 2], [0], [0]>} : vector<2x8x8xf32>, vector<2x8x16xf32>, vector<2x8x16xf32> -> vector<2x8x16xf32>
    "tpu.trace_stop"() : () -> ()
    %222 = vector.extract_strided_slice %202 {offsets = [0, 0, 16], sizes = [2, 8, 16], strides = [1, 1, 1]} : vector<2x8x64xf32> to vector<2x8x16xf32>
    %223 = vector.extract_strided_slice %203 {offsets = [0, 0, 16], sizes = [2, 8, 16], strides = [1, 1, 1]} : vector<2x8x64xf32> to vector<2x8x16xf32>
    "tpu.trace_start"() <{level = 10 : i32, message = "bnd,bmd->bnm"}> : () -> ()
    %cst_106 = arith.constant dense<0.000000e+00> : vector<2x8x8xf32>
    %224 = tpu.matmul %222, %223, %cst_106 {dimension_numbers = #tpu.dot_dimension_numbers<[2], [2], [1], [1], [0, 0, 0, 1, 1, 1], [0], [0]>} : vector<2x8x16xf32>, vector<2x8x16xf32>, vector<2x8x8xf32> -> vector<2x8x8xf32>
    "tpu.trace_stop"() : () -> ()
    %cst_107 = arith.constant 2.500000e-01 : f32
    %225 = vector.broadcast %cst_107 : f32 to vector<2x8x8xf32>
    %226 = arith.mulf %224, %225 : vector<2x8x8xf32>
    %cst_108 = arith.constant dense<0xFF800000> : vector<2x8xf32>
    %227 = vector.multi_reduction <maximumf>, %226, %cst_108 [2] : vector<2x8x8xf32> to vector<2x8xf32>
    %228 = vector.shape_cast %227 : vector<2x8xf32> to vector<2x8x1xf32>
    %229 = vector.broadcast %228 : vector<2x8x1xf32> to vector<2x8x8xf32>
    %230 = arith.subf %226, %229 : vector<2x8x8xf32>
    %231 = math.exp %230 : vector<2x8x8xf32>
    %cst_109 = arith.constant dense<0.000000e+00> : vector<2x8xf32>
    %232 = vector.multi_reduction <add>, %231, %cst_109 [2] : vector<2x8x8xf32> to vector<2x8xf32>
    %233 = vector.shape_cast %232 : vector<2x8xf32> to vector<2x8x1xf32>
    %234 = tpu.reciprocal %233 {approx = true} : vector<2x8x1xf32> -> vector<2x8x1xf32>
    %235 = vector.broadcast %234 : vector<2x8x1xf32> to vector<2x8x8xf32>
    %236 = arith.mulf %231, %235 : vector<2x8x8xf32>
    %237 = vector.extract_strided_slice %204 {offsets = [0, 0, 16], sizes = [2, 8, 16], strides = [1, 1, 1]} : vector<2x8x64xf32> to vector<2x8x16xf32>
    "tpu.trace_start"() <{level = 10 : i32, message = "bnm,bmd->bnd"}> : () -> ()
    %cst_110 = arith.constant dense<0.000000e+00> : vector<2x8x16xf32>
    %238 = tpu.matmul %236, %237, %cst_110 {dimension_numbers = #tpu.dot_dimension_numbers<[2], [1], [1], [2], [0, 0, 0, 1, 1, 2], [0], [0]>} : vector<2x8x8xf32>, vector<2x8x16xf32>, vector<2x8x16xf32> -> vector<2x8x16xf32>
    "tpu.trace_stop"() : () -> ()
    %239 = vector.extract_strided_slice %202 {offsets = [0, 0, 32], sizes = [2, 8, 16], strides = [1, 1, 1]} : vector<2x8x64xf32> to vector<2x8x16xf32>
    %240 = vector.extract_strided_slice %203 {offsets = [0, 0, 32], sizes = [2, 8, 16], strides = [1, 1, 1]} : vector<2x8x64xf32> to vector<2x8x16xf32>
    "tpu.trace_start"() <{level = 10 : i32, message = "bnd,bmd->bnm"}> : () -> ()
    %cst_111 = arith.constant dense<0.000000e+00> : vector<2x8x8xf32>
    %241 = tpu.matmul %239, %240, %cst_111 {dimension_numbers = #tpu.dot_dimension_numbers<[2], [2], [1], [1], [0, 0, 0, 1, 1, 1], [0], [0]>} : vector<2x8x16xf32>, vector<2x8x16xf32>, vector<2x8x8xf32> -> vector<2x8x8xf32>
    "tpu.trace_stop"() : () -> ()
    %cst_112 = arith.constant 2.500000e-01 : f32
    %242 = vector.broadcast %cst_112 : f32 to vector<2x8x8xf32>
    %243 = arith.mulf %241, %242 : vector<2x8x8xf32>
    %cst_113 = arith.constant dense<0xFF800000> : vector<2x8xf32>
    %244 = vector.multi_reduction <maximumf>, %243, %cst_113 [2] : vector<2x8x8xf32> to vector<2x8xf32>
    %245 = vector.shape_cast %244 : vector<2x8xf32> to vector<2x8x1xf32>
    %246 = vector.broadcast %245 : vector<2x8x1xf32> to vector<2x8x8xf32>
    %247 = arith.subf %243, %246 : vector<2x8x8xf32>
    %248 = math.exp %247 : vector<2x8x8xf32>
    %cst_114 = arith.constant dense<0.000000e+00> : vector<2x8xf32>
    %249 = vector.multi_reduction <add>, %248, %cst_114 [2] : vector<2x8x8xf32> to vector<2x8xf32>
    %250 = vector.shape_cast %249 : vector<2x8xf32> to vector<2x8x1xf32>
    %251 = tpu.reciprocal %250 {approx = true} : vector<2x8x1xf32> -> vector<2x8x1xf32>
    %252 = vector.broadcast %251 : vector<2x8x1xf32> to vector<2x8x8xf32>
    %253 = arith.mulf %248, %252 : vector<2x8x8xf32>
    %254 = vector.extract_strided_slice %204 {offsets = [0, 0, 32], sizes = [2, 8, 16], strides = [1, 1, 1]} : vector<2x8x64xf32> to vector<2x8x16xf32>
    "tpu.trace_start"() <{level = 10 : i32, message = "bnm,bmd->bnd"}> : () -> ()
    %cst_115 = arith.constant dense<0.000000e+00> : vector<2x8x16xf32>
    %255 = tpu.matmul %253, %254, %cst_115 {dimension_numbers = #tpu.dot_dimension_numbers<[2], [1], [1], [2], [0, 0, 0, 1, 1, 2], [0], [0]>} : vector<2x8x8xf32>, vector<2x8x16xf32>, vector<2x8x16xf32> -> vector<2x8x16xf32>
    "tpu.trace_stop"() : () -> ()
    %256 = vector.extract_strided_slice %202 {offsets = [0, 0, 48], sizes = [2, 8, 16], strides = [1, 1, 1]} : vector<2x8x64xf32> to vector<2x8x16xf32>
    %257 = vector.extract_strided_slice %203 {offsets = [0, 0, 48], sizes = [2, 8, 16], strides = [1, 1, 1]} : vector<2x8x64xf32> to vector<2x8x16xf32>
    "tpu.trace_start"() <{level = 10 : i32, message = "bnd,bmd->bnm"}> : () -> ()
    %cst_116 = arith.constant dense<0.000000e+00> : vector<2x8x8xf32>
    %258 = tpu.matmul %256, %257, %cst_116 {dimension_numbers = #tpu.dot_dimension_numbers<[2], [2], [1], [1], [0, 0, 0, 1, 1, 1], [0], [0]>} : vector<2x8x16xf32>, vector<2x8x16xf32>, vector<2x8x8xf32> -> vector<2x8x8xf32>
    "tpu.trace_stop"() : () -> ()
    %cst_117 = arith.constant 2.500000e-01 : f32
    %259 = vector.broadcast %cst_117 : f32 to vector<2x8x8xf32>
    %260 = arith.mulf %258, %259 : vector<2x8x8xf32>
    %cst_118 = arith.constant dense<0xFF800000> : vector<2x8xf32>
    %261 = vector.multi_reduction <maximumf>, %260, %cst_118 [2] : vector<2x8x8xf32> to vector<2x8xf32>
    %262 = vector.shape_cast %261 : vector<2x8xf32> to vector<2x8x1xf32>
    %263 = vector.broadcast %262 : vector<2x8x1xf32> to vector<2x8x8xf32>
    %264 = arith.subf %260, %263 : vector<2x8x8xf32>
    %265 = math.exp %264 : vector<2x8x8xf32>
    %cst_119 = arith.constant dense<0.000000e+00> : vector<2x8xf32>
    %266 = vector.multi_reduction <add>, %265, %cst_119 [2] : vector<2x8x8xf32> to vector<2x8xf32>
    %267 = vector.shape_cast %266 : vector<2x8xf32> to vector<2x8x1xf32>
    %268 = tpu.reciprocal %267 {approx = true} : vector<2x8x1xf32> -> vector<2x8x1xf32>
    %269 = vector.broadcast %268 : vector<2x8x1xf32> to vector<2x8x8xf32>
    %270 = arith.mulf %265, %269 : vector<2x8x8xf32>
    %271 = vector.extract_strided_slice %204 {offsets = [0, 0, 48], sizes = [2, 8, 16], strides = [1, 1, 1]} : vector<2x8x64xf32> to vector<2x8x16xf32>
    "tpu.trace_start"() <{level = 10 : i32, message = "bnm,bmd->bnd"}> : () -> ()
    %cst_120 = arith.constant dense<0.000000e+00> : vector<2x8x16xf32>
    %272 = tpu.matmul %270, %271, %cst_120 {dimension_numbers = #tpu.dot_dimension_numbers<[2], [1], [1], [2], [0, 0, 0, 1, 1, 2], [0], [0]>} : vector<2x8x8xf32>, vector<2x8x16xf32>, vector<2x8x16xf32> -> vector<2x8x16xf32>
    "tpu.trace_stop"() : () -> ()
    %273 = tpu.concatenate %221, %238, %255, %272 in 2 : vector<2x8x16xf32>, vector<2x8x16xf32>, vector<2x8x16xf32>, vector<2x8x16xf32> -> vector<2x8x64xf32>
    %274 = vector.shape_cast %273 : vector<2x8x64xf32> to vector<16x64xf32>
    %c1_121 = arith.constant 1 : index
    %c0_122 = arith.constant 0 : index
    %c0_123 = arith.constant 0 : index
    %275 = vector.load %arg7[%c1_121, %c0_122, %c0_123] : memref<2x64x64xf32, #tpu.memory_space<vmem>>, vector<1x64x64xf32>
    %276 = vector.shape_cast %275 : vector<1x64x64xf32> to vector<64x64xf32>
    %cst_124 = arith.constant dense<0.000000e+00> : vector<16x64xf32>
    %277 = tpu.matmul %274, %276, %cst_124 {dimension_numbers = #tpu.dot_dimension_numbers<[1], [0], [0], [1], [0, 0, 1, 1], [], []>} : vector<16x64xf32>, vector<64x64xf32>, vector<16x64xf32> -> vector<16x64xf32>
    %c1_125 = arith.constant 1 : index
    %c0_126 = arith.constant 0 : index
    %c0_127 = arith.constant 0 : index
    %278 = vector.load %arg8[%c1_125, %c0_126, %c0_127] : memref<2x1x64xf32, #tpu.memory_space<vmem>>, vector<1x1x64xf32>
    %279 = vector.shape_cast %278 : vector<1x1x64xf32> to vector<1x64xf32>
    %280 = vector.broadcast %279 : vector<1x64xf32> to vector<16x64xf32>
    %281 = arith.addf %277, %280 : vector<16x64xf32>
    %282 = arith.addf %166, %281 : vector<16x64xf32>
    %c1_128 = arith.constant 1 : index
    %c0_129 = arith.constant 0 : index
    %c0_130 = arith.constant 0 : index
    %283 = vector.load %arg9[%c1_128, %c0_129, %c0_130] : memref<2x1x64xf32, #tpu.memory_space<vmem>>, vector<1x1x64xf32>
    %284 = vector.shape_cast %283 : vector<1x1x64xf32> to vector<1x64xf32>
    %c1_131 = arith.constant 1 : index
    %c0_132 = arith.constant 0 : index
    %c0_133 = arith.constant 0 : index
    %285 = vector.load %arg10[%c1_131, %c0_132, %c0_133] : memref<2x1x64xf32, #tpu.memory_space<vmem>>, vector<1x1x64xf32>
    %286 = vector.shape_cast %285 : vector<1x1x64xf32> to vector<1x64xf32>
    %cst_134 = arith.constant dense<0.000000e+00> : vector<16xf32>
    %287 = vector.multi_reduction <add>, %282, %cst_134 [1] : vector<16x64xf32> to vector<16xf32>
    %288 = vector.shape_cast %287 : vector<16xf32> to vector<16x1xf32>
    %cst_135 = arith.constant 6.400000e+01 : f32
    %289 = vector.broadcast %cst_135 : f32 to vector<16x1xf32>
    %290 = arith.divf %288, %289 : vector<16x1xf32>
    %291 = vector.broadcast %290 : vector<16x1xf32> to vector<16x64xf32>
    %292 = arith.subf %282, %291 : vector<16x64xf32>
    %293 = arith.mulf %292, %292 : vector<16x64xf32>
    %cst_136 = arith.constant dense<0.000000e+00> : vector<16xf32>
    %294 = vector.multi_reduction <add>, %293, %cst_136 [1] : vector<16x64xf32> to vector<16xf32>
    %295 = vector.shape_cast %294 : vector<16xf32> to vector<16x1xf32>
    %cst_137 = arith.constant 6.400000e+01 : f32
    %296 = vector.broadcast %cst_137 : f32 to vector<16x1xf32>
    %297 = arith.divf %295, %296 : vector<16x1xf32>
    %298 = vector.broadcast %290 : vector<16x1xf32> to vector<16x64xf32>
    %299 = arith.subf %282, %298 : vector<16x64xf32>
    %cst_138 = arith.constant 9.99999974E-6 : f32
    %300 = vector.broadcast %cst_138 : f32 to vector<16x1xf32>
    %301 = arith.addf %297, %300 : vector<16x1xf32>
    %302 = math.rsqrt %301 : vector<16x1xf32>
    %303 = vector.broadcast %302 : vector<16x1xf32> to vector<16x64xf32>
    %304 = arith.mulf %299, %303 : vector<16x64xf32>
    %305 = vector.broadcast %284 : vector<1x64xf32> to vector<16x64xf32>
    %306 = arith.mulf %304, %305 : vector<16x64xf32>
    %307 = vector.broadcast %286 : vector<1x64xf32> to vector<16x64xf32>
    %308 = arith.addf %306, %307 : vector<16x64xf32>
    %c1_139 = arith.constant 1 : index
    %c0_140 = arith.constant 0 : index
    %c0_141 = arith.constant 0 : index
    %309 = vector.load %arg11[%c1_139, %c0_140, %c0_141] : memref<2x64x256xf32, #tpu.memory_space<vmem>>, vector<1x64x256xf32>
    %310 = vector.shape_cast %309 : vector<1x64x256xf32> to vector<64x256xf32>
    %cst_142 = arith.constant dense<0.000000e+00> : vector<16x256xf32>
    %311 = tpu.matmul %308, %310, %cst_142 {dimension_numbers = #tpu.dot_dimension_numbers<[1], [0], [0], [1], [0, 0, 1, 1], [], []>} : vector<16x64xf32>, vector<64x256xf32>, vector<16x256xf32> -> vector<16x256xf32>
    %c1_143 = arith.constant 1 : index
    %c0_144 = arith.constant 0 : index
    %c0_145 = arith.constant 0 : index
    %312 = vector.load %arg12[%c1_143, %c0_144, %c0_145] : memref<2x1x256xf32, #tpu.memory_space<vmem>>, vector<1x1x256xf32>
    %313 = vector.shape_cast %312 : vector<1x1x256xf32> to vector<1x256xf32>
    %314 = vector.broadcast %313 : vector<1x256xf32> to vector<16x256xf32>
    %315 = arith.addf %311, %314 : vector<16x256xf32>
    %cst_146 = arith.constant 5.000000e-01 : f32
    %316 = vector.broadcast %cst_146 : f32 to vector<16x256xf32>
    %317 = arith.mulf %316, %315 : vector<16x256xf32>
    %cst_147 = arith.constant 0.707106769 : f32
    %318 = vector.broadcast %cst_147 : f32 to vector<16x256xf32>
    %319 = arith.mulf %315, %318 : vector<16x256xf32>
    %320 = math.erf %319 : vector<16x256xf32>
    %cst_148 = arith.constant 1.000000e+00 : f32
    %321 = vector.broadcast %cst_148 : f32 to vector<16x256xf32>
    %322 = arith.addf %321, %320 : vector<16x256xf32>
    %323 = arith.mulf %317, %322 : vector<16x256xf32>
    %c1_149 = arith.constant 1 : index
    %c0_150 = arith.constant 0 : index
    %c0_151 = arith.constant 0 : index
    %324 = vector.load %arg13[%c1_149, %c0_150, %c0_151] : memref<2x256x64xf32, #tpu.memory_space<vmem>>, vector<1x256x64xf32>
    %325 = vector.shape_cast %324 : vector<1x256x64xf32> to vector<256x64xf32>
    %cst_152 = arith.constant dense<0.000000e+00> : vector<16x64xf32>
    %326 = tpu.matmul %323, %325, %cst_152 {dimension_numbers = #tpu.dot_dimension_numbers<[1], [0], [0], [1], [0, 0, 1, 1], [], []>} : vector<16x256xf32>, vector<256x64xf32>, vector<16x64xf32> -> vector<16x64xf32>
    %327 = arith.addf %308, %326 : vector<16x64xf32>
    %c1_153 = arith.constant 1 : index
    %c0_154 = arith.constant 0 : index
    %c0_155 = arith.constant 0 : index
    %328 = vector.load %arg14[%c1_153, %c0_154, %c0_155] : memref<2x1x64xf32, #tpu.memory_space<vmem>>, vector<1x1x64xf32>
    %329 = vector.shape_cast %328 : vector<1x1x64xf32> to vector<1x64xf32>
    %330 = vector.broadcast %329 : vector<1x64xf32> to vector<16x64xf32>
    %331 = arith.addf %327, %330 : vector<16x64xf32>
    %c0_156 = arith.constant 0 : index
    %c0_157 = arith.constant 0 : index
    %332 = vector.load %arg15[%c0_156, %c0_157] : memref<1x64xf32, #tpu.memory_space<vmem>>, vector<1x64xf32>
    %c0_158 = arith.constant 0 : index
    %c0_159 = arith.constant 0 : index
    %333 = vector.load %arg16[%c0_158, %c0_159] : memref<1x64xf32, #tpu.memory_space<vmem>>, vector<1x64xf32>
    %cst_160 = arith.constant dense<0.000000e+00> : vector<16xf32>
    %334 = vector.multi_reduction <add>, %331, %cst_160 [1] : vector<16x64xf32> to vector<16xf32>
    %335 = vector.shape_cast %334 : vector<16xf32> to vector<16x1xf32>
    %cst_161 = arith.constant 6.400000e+01 : f32
    %336 = vector.broadcast %cst_161 : f32 to vector<16x1xf32>
    %337 = arith.divf %335, %336 : vector<16x1xf32>
    %338 = vector.broadcast %337 : vector<16x1xf32> to vector<16x64xf32>
    %339 = arith.subf %331, %338 : vector<16x64xf32>
    %340 = arith.mulf %339, %339 : vector<16x64xf32>
    %cst_162 = arith.constant dense<0.000000e+00> : vector<16xf32>
    %341 = vector.multi_reduction <add>, %340, %cst_162 [1] : vector<16x64xf32> to vector<16xf32>
    %342 = vector.shape_cast %341 : vector<16xf32> to vector<16x1xf32>
    %cst_163 = arith.constant 6.400000e+01 : f32
    %343 = vector.broadcast %cst_163 : f32 to vector<16x1xf32>
    %344 = arith.divf %342, %343 : vector<16x1xf32>
    %345 = vector.broadcast %337 : vector<16x1xf32> to vector<16x64xf32>
    %346 = arith.subf %331, %345 : vector<16x64xf32>
    %cst_164 = arith.constant 9.99999974E-6 : f32
    %347 = vector.broadcast %cst_164 : f32 to vector<16x1xf32>
    %348 = arith.addf %344, %347 : vector<16x1xf32>
    %349 = math.rsqrt %348 : vector<16x1xf32>
    %350 = vector.broadcast %349 : vector<16x1xf32> to vector<16x64xf32>
    %351 = arith.mulf %346, %350 : vector<16x64xf32>
    %352 = vector.broadcast %332 : vector<1x64xf32> to vector<16x64xf32>
    %353 = arith.mulf %351, %352 : vector<16x64xf32>
    %354 = vector.broadcast %333 : vector<1x64xf32> to vector<16x64xf32>
    %355 = arith.addf %353, %354 : vector<16x64xf32>
    %c0_165 = arith.constant 0 : index
    %c0_166 = arith.constant 0 : index
    %356 = vector.load %arg17[%c0_165, %c0_166] : memref<1x64xf32, #tpu.memory_space<vmem>>, vector<1x64xf32>
    %357 = vector.broadcast %356 : vector<1x64xf32> to vector<16x64xf32>
    %358 = arith.mulf %355, %357 : vector<16x64xf32>
    %cst_167 = arith.constant dense<0.000000e+00> : vector<16xf32>
    %359 = vector.multi_reduction <add>, %358, %cst_167 [1] : vector<16x64xf32> to vector<16xf32>
    %360 = vector.shape_cast %359 : vector<16xf32> to vector<16x1xf32>
    %c0_168 = arith.constant 0 : index
    %c0_169 = arith.constant 0 : index
    %361 = vector.load %arg18[%c0_168, %c0_169] : memref<1x1xf32, #tpu.memory_space<vmem>>, vector<1x1xf32>
    %362 = vector.broadcast %361 : vector<1x1xf32> to vector<16x1xf32>
    %363 = arith.addf %360, %362 : vector<16x1xf32>
    %364 = vector.shape_cast %363 : vector<16x1xf32> to vector<2x8x1xf32>
    %cst_170 = arith.constant dense<0xFF800000> : vector<2x1xf32>
    %365 = vector.multi_reduction <maximumf>, %364, %cst_170 [1] : vector<2x8x1xf32> to vector<2x1xf32>
    %366 = vector.shape_cast %365 : vector<2x1xf32> to vector<2x1x1xf32>
    %367 = vector.broadcast %366 : vector<2x1x1xf32> to vector<2x8x1xf32>
    %368 = arith.subf %364, %367 : vector<2x8x1xf32>
    %369 = math.exp %368 : vector<2x8x1xf32>
    %cst_171 = arith.constant dense<0.000000e+00> : vector<2x1xf32>
    %370 = vector.multi_reduction <add>, %369, %cst_171 [1] : vector<2x8x1xf32> to vector<2x1xf32>
    %371 = vector.shape_cast %370 : vector<2x1xf32> to vector<2x1x1xf32>
    %372 = tpu.reciprocal %371 {approx = true} : vector<2x1x1xf32> -> vector<2x1x1xf32>
    %373 = vector.broadcast %372 : vector<2x1x1xf32> to vector<2x8x1xf32>
    %374 = arith.mulf %369, %373 : vector<2x8x1xf32>
    %375 = vector.shape_cast %355 : vector<16x64xf32> to vector<2x8x64xf32>
    %376 = vector.broadcast %374 : vector<2x8x1xf32> to vector<2x8x64xf32>
    %377 = arith.mulf %376, %375 : vector<2x8x64xf32>
    %cst_172 = arith.constant dense<0.000000e+00> : vector<2x64xf32>
    %378 = vector.multi_reduction <add>, %377, %cst_172 [1] : vector<2x8x64xf32> to vector<2x64xf32>
    %c0_173 = arith.constant 0 : index
    %c0_174 = arith.constant 0 : index
    %379 = vector.load %arg19[%c0_173, %c0_174] : memref<64x128xf32, #tpu.memory_space<vmem>>, vector<64x128xf32>
    %cst_175 = arith.constant dense<0.000000e+00> : vector<2x128xf32>
    %380 = tpu.matmul %378, %379, %cst_175 {dimension_numbers = #tpu.dot_dimension_numbers<[1], [0], [0], [1], [0, 0, 1, 1], [], []>} : vector<2x64xf32>, vector<64x128xf32>, vector<2x128xf32> -> vector<2x128xf32>
    %c0_176 = arith.constant 0 : index
    %c0_177 = arith.constant 0 : index
    %381 = vector.load %arg20[%c0_176, %c0_177] : memref<1x128xf32, #tpu.memory_space<vmem>>, vector<1x128xf32>
    %382 = vector.broadcast %381 : vector<1x128xf32> to vector<2x128xf32>
    %383 = arith.addf %380, %382 : vector<2x128xf32>
    %c0_178 = arith.constant 0 : index
    %c0_179 = arith.constant 0 : index
    %384 = vector.load %arg21[%c0_178, %c0_179] : memref<2x128xf32, #tpu.memory_space<vmem>>, vector<2x128xf32>
    tpu.vector_store %arg21[%c0_178, %c0_179], %383 {strides = array<i32>} : memref<2x128xf32, #tpu.memory_space<vmem>>, vector<2x128xf32>,
    return
  }
  func.func @transform_0(%arg0: i32) -> (i32, i32, i32) {
    %c0_i32 = arith.constant 0 : i32
    %c0_i32_0 = arith.constant 0 : i32
    %c0_i32_1 = arith.constant 0 : i32
    return %arg0, %c0_i32, %c0_i32_0 : i32, i32, i32
  }
  func.func @transform_1(%arg0: i32) -> (i32, i32, i32) {
    %c0_i32 = arith.constant 0 : i32
    %c0_i32_0 = arith.constant 0 : i32
    %c0_i32_1 = arith.constant 0 : i32
    %c0_i32_2 = arith.constant 0 : i32
    return %c0_i32, %c0_i32_0, %c0_i32_1 : i32, i32, i32
  }
  func.func @transform_2(%arg0: i32) -> (i32, i32, i32) {
    %c0_i32 = arith.constant 0 : i32
    %c0_i32_0 = arith.constant 0 : i32
    %c0_i32_1 = arith.constant 0 : i32
    %c0_i32_2 = arith.constant 0 : i32
    return %c0_i32, %c0_i32_0, %c0_i32_1 : i32, i32, i32
  }
  func.func @transform_3(%arg0: i32) -> (i32, i32, i32) {
    %c0_i32 = arith.constant 0 : i32
    %c0_i32_0 = arith.constant 0 : i32
    %c0_i32_1 = arith.constant 0 : i32
    %c0_i32_2 = arith.constant 0 : i32
    return %c0_i32, %c0_i32_0, %c0_i32_1 : i32, i32, i32
  }
  func.func @transform_4(%arg0: i32) -> (i32, i32, i32) {
    %c0_i32 = arith.constant 0 : i32
    %c0_i32_0 = arith.constant 0 : i32
    %c0_i32_1 = arith.constant 0 : i32
    %c0_i32_2 = arith.constant 0 : i32
    return %c0_i32, %c0_i32_0, %c0_i32_1 : i32, i32, i32
  }
  func.func @transform_5(%arg0: i32) -> (i32, i32, i32) {
    %c0_i32 = arith.constant 0 : i32
    %c0_i32_0 = arith.constant 0 : i32
    %c0_i32_1 = arith.constant 0 : i32
    %c0_i32_2 = arith.constant 0 : i32
    return %c0_i32, %c0_i32_0, %c0_i32_1 : i32, i32, i32
  }
  func.func @transform_6(%arg0: i32) -> (i32, i32, i32) {
    %c0_i32 = arith.constant 0 : i32
    %c0_i32_0 = arith.constant 0 : i32
    %c0_i32_1 = arith.constant 0 : i32
    %c0_i32_2 = arith.constant 0 : i32
    return %c0_i32, %c0_i32_0, %c0_i32_1 : i32, i32, i32
  }
  func.func @transform_7(%arg0: i32) -> (i32, i32, i32) {
    %c0_i32 = arith.constant 0 : i32
    %c0_i32_0 = arith.constant 0 : i32
    %c0_i32_1 = arith.constant 0 : i32
    %c0_i32_2 = arith.constant 0 : i32
    return %c0_i32, %c0_i32_0, %c0_i32_1 : i32, i32, i32
  }
  func.func @transform_8(%arg0: i32) -> (i32, i32, i32) {
    %c0_i32 = arith.constant 0 : i32
    %c0_i32_0 = arith.constant 0 : i32
    %c0_i32_1 = arith.constant 0 : i32
    %c0_i32_2 = arith.constant 0 : i32
    return %c0_i32, %c0_i32_0, %c0_i32_1 : i32, i32, i32
  }
  func.func @transform_9(%arg0: i32) -> (i32, i32, i32) {
    %c0_i32 = arith.constant 0 : i32
    %c0_i32_0 = arith.constant 0 : i32
    %c0_i32_1 = arith.constant 0 : i32
    %c0_i32_2 = arith.constant 0 : i32
    return %c0_i32, %c0_i32_0, %c0_i32_1 : i32, i32, i32
  }
  func.func @transform_10(%arg0: i32) -> (i32, i32, i32) {
    %c0_i32 = arith.constant 0 : i32
    %c0_i32_0 = arith.constant 0 : i32
    %c0_i32_1 = arith.constant 0 : i32
    %c0_i32_2 = arith.constant 0 : i32
    return %c0_i32, %c0_i32_0, %c0_i32_1 : i32, i32, i32
  }
  func.func @transform_11(%arg0: i32) -> (i32, i32, i32) {
    %c0_i32 = arith.constant 0 : i32
    %c0_i32_0 = arith.constant 0 : i32
    %c0_i32_1 = arith.constant 0 : i32
    %c0_i32_2 = arith.constant 0 : i32
    return %c0_i32, %c0_i32_0, %c0_i32_1 : i32, i32, i32
  }
  func.func @transform_12(%arg0: i32) -> (i32, i32, i32) {
    %c0_i32 = arith.constant 0 : i32
    %c0_i32_0 = arith.constant 0 : i32
    %c0_i32_1 = arith.constant 0 : i32
    %c0_i32_2 = arith.constant 0 : i32
    return %c0_i32, %c0_i32_0, %c0_i32_1 : i32, i32, i32
  }
  func.func @transform_13(%arg0: i32) -> (i32, i32, i32) {
    %c0_i32 = arith.constant 0 : i32
    %c0_i32_0 = arith.constant 0 : i32
    %c0_i32_1 = arith.constant 0 : i32
    %c0_i32_2 = arith.constant 0 : i32
    return %c0_i32, %c0_i32_0, %c0_i32_1 : i32, i32, i32
  }
  func.func @transform_14(%arg0: i32) -> (i32, i32) {
    %c0_i32 = arith.constant 0 : i32
    %c0_i32_0 = arith.constant 0 : i32
    %c0_i32_1 = arith.constant 0 : i32
    return %c0_i32, %c0_i32_0 : i32, i32
  }
  func.func @transform_15(%arg0: i32) -> (i32, i32) {
    %c0_i32 = arith.constant 0 : i32
    %c0_i32_0 = arith.constant 0 : i32
    %c0_i32_1 = arith.constant 0 : i32
    return %c0_i32, %c0_i32_0 : i32, i32
  }
  func.func @transform_16(%arg0: i32) -> (i32, i32) {
    %c0_i32 = arith.constant 0 : i32
    %c0_i32_0 = arith.constant 0 : i32
    %c0_i32_1 = arith.constant 0 : i32
    return %c0_i32, %c0_i32_0 : i32, i32
  }
  func.func @transform_17(%arg0: i32) -> (i32, i32) {
    %c0_i32 = arith.constant 0 : i32
    %c0_i32_0 = arith.constant 0 : i32
    %c0_i32_1 = arith.constant 0 : i32
    return %c0_i32, %c0_i32_0 : i32, i32
  }
  func.func @transform_18(%arg0: i32) -> (i32, i32) {
    %c0_i32 = arith.constant 0 : i32
    %c0_i32_0 = arith.constant 0 : i32
    %c0_i32_1 = arith.constant 0 : i32
    return %c0_i32, %c0_i32_0 : i32, i32
  }
  func.func @transform_19(%arg0: i32) -> (i32, i32) {
    %c0_i32 = arith.constant 0 : i32
    %c0_i32_0 = arith.constant 0 : i32
    %c0_i32_1 = arith.constant 0 : i32
    return %c0_i32, %c0_i32_0 : i32, i32
  }
  func.func @transform_20(%arg0: i32) -> (i32, i32) {
    %c0_i32 = arith.constant 0 : i32
    %c0_i32_0 = arith.constant 0 : i32
    return %arg0, %c0_i32 : i32, i32
  }
}

</mosaic_0001>

<bundles_post_ra>
// kernel: tpu_custom_call.1
= control target key start
LH: loop header
LB: loop body
LE: loop exit
PB: predicated region body
PF: predicated region fallthrough
CT: control target
= control target key end

     0   :  { %s6581_s0 = inlined_call_operand.hbm [shape: f32[2,8,64], index: 0, kind: input, shape index: {}]   ;;  %s6582_s1 = inlined_call_operand.hbm [shape: f32[2,1,64], index: 1, kind: input, shape index: {}]   ;;  %s6583_s2 = inlined_call_operand.hbm [shape: f32[2,1,64], index: 2, kind: input, shape index: {}]   ;;  %s6584_s3 = inlined_call_operand.vmem [shape: f32[2,64,64], index: 3, kind: input, shape index: {}]   ;;  %s6585_s4 = inlined_call_operand.vmem [shape: f32[2,64,64], index: 4, kind: input, shape index: {}]   ;;  %s6586_s5 = inlined_call_operand.vmem [shape: f32[2,64,64], index: 5, kind: input, shape index: {}]   ;;  %s6587_s6 = inlined_call_operand.vmem [shape: f32[2,64,64], index: 6, kind: input, shape index: {}]   ;;  %s6588_s7 = inlined_call_operand.vmem [shape: f32[2,1,64], index: 7, kind: input, shape index: {}]   ;;  %s6589_s8 = inlined_call_operand.vmem [shape: f32[2,1,64], index: 8, kind: input, shape index: {}]   ;;  %s6590_s9 = inlined_call_operand.vmem [shape: f32[2,1,64], index: 9, kind: input, shape index: {}]   ;;  %s6591_s10 = inlined_call_operand.vmem [shape: f32[2,64,256], index: 10, kind: input, shape index: {}]   ;;  %s6592_s11 = inlined_call_operand.vmem [shape: f32[2,1,256], index: 11, kind: input, shape index: {}]   ;;  %s6593_s12 = inlined_call_operand.vmem [shape: f32[2,256,64], index: 12, kind: input, shape index: {}]   ;;  %s6594_s13 = inlined_call_operand.vmem [shape: f32[2,1,64], index: 13, kind: input, shape index: {}]   ;;  %s6595_s14 = inlined_call_operand.vmem [shape: f32[1,64], index: 14, kind: input, shape index: {}]   ;;  %s6596_s15 = inlined_call_operand.vmem [shape: f32[1,64], index: 15, kind: input, shape index: {}]   ;;  %s6597_s16 = inlined_call_operand.vmem [shape: f32[1,64], index: 16, kind: input, shape index: {}]   ;;  %s6598_s17 = inlined_call_operand.<no memory space> [shape: f32[1,1], index: 17, kind: input, shape index: {}]   ;;  %s6599_s18 = inlined_call_operand.hbm [shape: f32[64,128], index: 18, kind: input, shape index: {}]   ;;  %s6600_s19 = inlined_call_operand.vmem [shape: f32[1,128], index: 19, kind: input, shape index: {}]   ;;  %s6601_s20 = inlined_call_operand.hbm [shape: f32[2,128], index: 20, kind: output, shape index: {}]  }
   0x1   :  { %6606 = sst [smem:[#allocation16_spill]] %s6581_s0  ;;  %v25_v0 = vstv %s6598_s17 }
   0x2   :  { %6607 = sst [smem:[#allocation17_spill]] %s6582_s1  ;;  %26 = vst [vmem:[#allocation2] sm:$0x1] %v25_v0 }
   0x3   :  { %6608 = sst [smem:[#allocation18_spill]] %s6583_s2 }
   0x4   :  { %6609 = sst [smem:[#allocation19_spill]] %s6584_s3 }
   0x5   :  { %6610 = sst [smem:[#allocation20_spill]] %s6585_s4 }
   0x6   :  { %27 = vsyncpa [#allocation4], 0 }
   0x7   :  { %28 = vsyncpa [#allocation7], 0 }
   0x8   :  { %29 = vsyncpa [#allocation10], 0 }
   0x9   :  { %30 = vsyncpa [#allocation5], 0  ;;  %s5432_s23 = smov [#allocation6]  }
   0xa   :  { %s48_s24 = sshll.u32 %s5432_s23, 4  ;;  %s49_s24 = int_to_ptr.vmem [resolvable:$true] %s48_s24 }
   0xb   :  { %s5332_s2 = scalar_lea.vmem %s49_s24, 32  ;;  %p5337_p1 = scmp.lt.s32.totalorder %s49_s24, %s49_s24 }
   0xc   :  { %p5333_p0 = scmp.ne.s32.totalorder %s49_s24, %s5332_s2  ;;  %p5338_p2 = scmp.lt.s32.totalorder %s5332_s2, %s5332_s2 }
   0xe   :  { %p5339_p3 = por %p5338_p2, %p5337_p1 }
  0x10   :  { %p5340_p4 = pnand %p5339_p3, %p5333_p0 }
  0x12   :  { %5343 = shalt.err (!%p5340_p4)
}
  0x13   :  { %s5433_s25 = smov 16   ;;  %s5434_s3 = smov 1  }
  0x14   :  { %s6611_s27 = sld [smem:[#allocation17_spill]]  ;;  %s5435_s28 = smov [#allocation3]  }
  0x15   :  { %s36_s4 = sshll.u32 %s5435_s28, 4  ;;  %s37_s4 = int_to_ptr.vmem [resolvable:$true] %s36_s4 }
  0x16   :  { %s5352_s29 = scalar_lea.vmem %s37_s4, 256  ;;  %p5357_p6 = scmp.lt.s32.totalorder %s37_s4, %s37_s4 }
  0x17   :  { %p5353_p5 = scmp.ne.s32.totalorder %s37_s4, %s5352_s29  ;;  %p5358_p7 = scmp.lt.s32.totalorder %s5352_s29, %s5352_s29 }
  0x19   :  { %p5359_p8 = por %p5358_p7, %p5357_p6 }
  0x1a   :  { %54 = dma.hbm_to_vmem [thread:$0]  %s6611_s27, 32, %s49_s24, [#allocation7], %s5433_s25, %s5433_s25, %s5434_s3  }
  0x1b   :  { %p5360_p9 = pnand %p5359_p8, %p5353_p5 }
  0x1d   :  { %5363 = shalt.err (!%p5360_p9)
}
  0x1e   :  { %s5436_s30 = smov 128   ;;  %s5437_s0 = smov 8  }
  0x1f   :  { %s6612_s22 = sld [smem:[#allocation16_spill]]  ;;  %s5438_s23 = smov [#allocation8]  }
  0x20   :  { %s60_s2 = sshll.u32 %s5438_s23, 4  ;;  %s5439_s17 = smov [#allocation9]   ;;  %s61_s2 = int_to_ptr.vmem [resolvable:$true] %s60_s2 }
  0x21   :  { %s102_s24 = sshll.u32 %s5439_s17, 4  ;;  %s5372_s26 = scalar_lea.vmem %s61_s2, 32  ;;  %s103_s24 = int_to_ptr.vmem [resolvable:$true] %s102_s24 }
  0x22   :  { %p5373_p10 = scmp.ne.s32.totalorder %s61_s2, %s5372_s26  ;;  %p5377_p11 = scmp.lt.s32.totalorder %s61_s2, %s61_s2 }
  0x23   :  { %p5378_p12 = scmp.lt.s32.totalorder %s5372_s26, %s5372_s26 }
  0x25   :  { %42 = dma.hbm_to_vmem [thread:$0]  %s6612_s22, 256, %s37_s4, [#allocation4], %s5436_s30, %s5436_s30, %s5437_s0  }
  0x26   :  { %p5379_p13 = por %p5378_p12, %p5377_p11 }
  0x28   :  { %p5380_p0 = pnand %p5379_p13, %p5373_p10 }
  0x2a   :  { %5383 = shalt.err (!%p5380_p0)
}
  0x2b   :  { %s6613_s29 = sld [smem:[#allocation18_spill]]  ;;  %s5392_s4 = scalar_lea.vmem %s103_s24, 1024 }
  0x2c   :  { %p5393_p1 = scmp.ne.s32.totalorder %s103_s24, %s5392_s4  ;;  %p5397_p2 = scmp.lt.s32.totalorder %s103_s24, %s103_s24 }
  0x2d   :  { %p5398_p3 = scmp.lt.s32.totalorder %s5392_s4, %s5392_s4 }
  0x2f   :  { %p5399_p4 = por %p5398_p3, %p5397_p2 }
  0x31   :  { %66 = dma.hbm_to_vmem [thread:$0]  %s6613_s29, 32, %s61_s2, [#allocation7], %s5433_s25, %s5433_s25, %s5434_s3  }
  0x32   :  { %p5400_p5 = pnand %p5399_p4, %p5393_p1 }
  0x34   :  { %5403 = shalt.err (!%p5400_p5)
}
  0x35   :  { %108 = dma.hbm_to_vmem [thread:$0]  %s6599_s18, 1024, %s103_s24, [#allocation10], %s5436_s30, %s5436_s30, %s5437_s0  }
  0x36   :  { %5424 = dma.done.wait [#allocation4], 256  }
  0x37   :  { %5425 = vsyncadd [#allocation4], 4294967040 }
  0x38   :  { %5426 = dma.done.wait [#allocation7], 64  }
  0x39   :  { %5427 = vsyncadd [#allocation7], 4294967232 }
  0x3a   :  { %5428 = dma.done.wait [#allocation10], 1024  }
  0x3b   :  { %5429 = vsyncadd [#allocation10], 4294966272  ;;  %vm127_vm0 = vcmask 523264   ;;  %v5575_v1 = vld [vmem:[#allocation3] sm:$0xff]  ;;  %v5577_v2 = vld [vmem:[#allocation3 + $0x8] sm:$0xff]  ;;  %s6614_s30 = sld [smem:[#allocation19_spill]] }
  0x3c   :  { %v128_v3 = vsel %vm127_vm0, %v5575_v1, 0.0  ;;  %v131_v4 = vsel %vm127_vm0, %v5577_v2, 0.0  ;;  %v350_v16 = vld [vmem:[%s6586_s5 + $0x38] sm:$0xff]  ;;  %v349_v18 = vld [vmem:[%s6586_s5 + $0x30] sm:$0xff]  ;;  %v348_v20 = vld [vmem:[%s6586_s5 + $0x28] sm:$0xff]  ;;  %s6615_s23 = sld [smem:[#allocation20_spill]] }
  0x3d   :  { %129 = vadd.xlane.f32.xlu0 %v128_v3  ;;  %4904 = vmatprep.subr.mxu0 %v350_v16  ;;  %v347_v22 = vld [vmem:[%s6586_s5 + $0x20] sm:$0xff]  ;;  %v346_v24 = vld [vmem:[%s6586_s5 + $0x18] sm:$0xff]  ;;  %v345_v26 = vld [vmem:[%s6586_s5 + $0x10] sm:$0xff]  ;;  %v5440_v55 = vmov 0.0   ;;  %vm5441_vm1 = vmmov 0   ;;  %vm426_vm2 = vcmask 130048  }
  0x3e   :  { %4905 = vmatpush3.msra.mxu0 %v350_v16  ;;  %v344_v28 = vld [vmem:[%s6586_s5 + $0x8] sm:$0xff]  ;;  %v343_v30 = vld [vmem:[%s6586_s5] sm:$0xff]  ;;  %v4466_v39 = vld [vmem:[#allocation6] ss:$0 sm:$0xff]  ;;  %vm581_vm3 = vcmask 64512   ;;  %s5442_s2 = smov 112  }
  0x3f   :  { %4906 = vmatprep.subr.mxu0 %v349_v18  ;;  %v4467_v41 = vld [vmem:[#allocation8] ss:$0 sm:$0xff]  ;;  %s5443_s17 = smov 96   ;;  %s5444_s24 = smov 80   ;;  %vm1777_vm4 = vcmask 392192   ;;  %vm1774_vm5 = vcmask 261120  }
  0x40   :  { %4907 = vmatpush3.msra.mxu0 %v349_v18  ;;  %s5445_s26 = smov 32   ;;  %s6604_s18 = smov 48   ;;  %vm4292_vm6 = vcmask 7168   ;;  %vm4374_vm7 = vcmask 1041409  }
  0x41   :  { %132 = vadd.xlane.f32.xlu0 %v131_v4  ;;  %v178_v15 = vld [vmem:[%s6614_s30 + $0x38] sm:$0xff]  ;;  %v177_v17 = vld [vmem:[%s6614_s30 + $0x30] sm:$0xff]  ;;  %v176_v19 = vld [vmem:[%s6614_s30 + $0x28] sm:$0xff]  ;;  %4908 = vmatprep.subr.mxu0 %v348_v20 }
  0x42   :  { %4866 = vmatprep.subr.mxu1 %v178_v15  ;;  %v175_v21 = vld [vmem:[%s6614_s30 + $0x20] sm:$0xff]  ;;  %4909 = vmatpush3.msra.mxu0 %v348_v20  ;;  %v174_v23 = vld [vmem:[%s6614_s30 + $0x18] sm:$0xff]  ;;  %v173_v25 = vld [vmem:[%s6614_s30 + $0x10] sm:$0xff] }
  0x43   :  { %4867 = vmatpush3.msra.mxu1 %v178_v15  ;;  %4910 = vmatprep.subr.mxu0 %v347_v22  ;;  %v172_v27 = vld [vmem:[%s6614_s30 + $0x8] sm:$0xff]  ;;  %v171_v29 = vld [vmem:[%s6614_s30] sm:$0xff]  ;;  %v267_v31 = vld [vmem:[%s6615_s23 + $0x38] sm:$0xff] }
  0x44   :  { %4868 = vmatprep.subr.mxu1 %v177_v17  ;;  %4911 = vmatpush3.msra.mxu0 %v347_v22  ;;  %v266_v48 = vld [vmem:[%s6615_s23 + $0x30] sm:$0xff]  ;;  %v265_v49 = vld [vmem:[%s6615_s23 + $0x28] sm:$0xff]  ;;  %v264_v50 = vld [vmem:[%s6615_s23 + $0x20] sm:$0xff] }
  0x45   :  { %4869 = vmatpush3.msra.mxu1 %v177_v17  ;;  %4912 = vmatprep.subr.mxu0 %v346_v24  ;;  %v263_v51 = vld [vmem:[%s6615_s23 + $0x18] sm:$0xff]  ;;  %v262_v52 = vld [vmem:[%s6615_s23 + $0x10] sm:$0xff]  ;;  %v261_v53 = vld [vmem:[%s6615_s23 + $0x8] sm:$0xff] }
  0x46   :  { %4870 = vmatprep.subr.mxu1 %v176_v19  ;;  %4913 = vmatpush3.msra.mxu0 %v346_v24  ;;  %v260_v54 = vld [vmem:[%s6615_s23] sm:$0xff] }
  0x47   :  { %4871 = vmatpush3.msra.mxu1 %v176_v19  ;;  %4914 = vmatprep.subr.mxu0 %v345_v26 }
  0x48   :  { %4872 = vmatprep.subr.mxu1 %v175_v21  ;;  %4915 = vmatpush3.msra.mxu0 %v345_v26 }
  0x49   :  { %4873 = vmatpush3.msra.mxu1 %v175_v21  ;;  %4916 = vmatprep.subr.mxu0 %v344_v28 }
  0x4a   :  { %4874 = vmatprep.subr.mxu1 %v174_v23  ;;  %4917 = vmatpush3.msra.mxu0 %v344_v28 }
  0x4b   :  { %4875 = vmatpush3.msra.mxu1 %v174_v23  ;;  %4918 = vmatprep.subr.mxu0 %v343_v30 }
  0x4c   :  { %4876 = vmatprep.subr.mxu1 %v173_v25  ;;  %4919 = vmatpush3.msra.mxu0 %v343_v30 }
  0x4d   :  { %4877 = vmatpush3.msra.mxu1 %v173_v25  ;;  %4923 = vmatprep.subr.mxu0 %v5440_v55 }
  0x4e   :  { %4878 = vmatprep.subr.mxu1 %v172_v27 }
  0x4f   :  { %4879 = vmatpush3.msra.mxu1 %v172_v27 }
  0x50   :  { %4880 = vmatprep.subr.mxu1 %v171_v29 }
  0x51   :  { %4881 = vmatpush3.msra.mxu1 %v171_v29 }
  0x52   :  { %4885 = vmatprep.subr.mxu1 %v267_v31 }
  0xc6   :  { %v130_v5 = vpop.xlane.xlu0 %129 }
  0xc7   :  { %v135_v6 = vmul.f32 0.015625, %v130_v5 }
  0xc9   :  { %v5584_v7 = vsub.f32 %v5575_v1, %v135_v6 }
  0xca   :  { %v133_v8 = vpop.xlane.xlu0 %132 }
  0xcb   :  { %v136_v9 = vmul.f32 0.015625, %v133_v8  ;;  %v139_v10 = vmul.f32 %v5584_v7, %v5584_v7 }
  0xcd   :  { %v5589_v11 = vsub.f32 %v5577_v2, %v136_v9  ;;  %v141_v12 = vsel %vm127_vm0, %v139_v10, 0.0 }
  0xce   :  { %142 = vadd.xlane.f32.xlu1 %v141_v12 }
  0xcf   :  { %v140_v13 = vmul.f32 %v5589_v11, %v5589_v11 }
  0xd1   :  { %v144_v14 = vsel %vm127_vm0, %v140_v13, 0.0 }
  0xd2   :  { %145 = vadd.xlane.f32.xlu1 %v144_v14 }
 0x157   :  { %v143_v32 = vpop.xlane.xlu1 %142 }
 0x158   :  { %v147_v33 = vmul.f32 0.015625, %v143_v32 }
 0x15a   :  { %v149_v34 = vadd.f32 1e-05, %v147_v33 }
 0x15b   :  { %v146_v35 = vpop.xlane.xlu1 %145 }
 0x15c   :  { %5216 = vrsqrt.f32 %v149_v34  ;;  %v148_v36 = vmul.f32 0.015625, %v146_v35 }
 0x15e   :  { %v150_v37 = vadd.f32 1e-05, %v148_v36 }
 0x160   :  { %5218 = vrsqrt.f32 %v150_v37 }
 0x169   :  { %v5217_v38 = vpop.eup %5216 }
 0x16a   :  { %v153_v40 = vmul.f32 %v5217_v38, %v5584_v7 }
 0x16c   :  { %v161_v42 = vmul.f32 %v4466_v39, %v153_v40 }
 0x16d   :  { %v5219_v43 = vpop.eup %5218 }
 0x16e   :  { %v154_v44 = vmul.f32 %v5219_v43, %v5589_v11  ;;  %v169_v45 = vadd.f32 %v4467_v41, %v161_v42 }
 0x170   :  { %v162_v46 = vmul.f32 %v4466_v39, %v154_v44  ;;  %4882 = vmatprep.mubr.msk.f32.mxu1 %vm127_vm0, %v169_v45  ;;  %4920 = vmatprep.mubr.msk.f32.mxu0 %vm127_vm0, %v169_v45 }
 0x172   :  { %v170_v47 = vadd.f32 %v4467_v41, %v162_v46 }
 0x174   :  { %4883 = vmatmul.mubr.msk.f32.vlgmr.msra.gmra.mxu1 %vm127_vm0, %v170_v47  ;;  %4921 = vmatmul.mubr.msk.f32.vlgmr.msra.gmra.mxu0 %vm127_vm0, %v170_v47 }
 0x175   :  { %4886 = vmatpush3.msra.mxu1 %v267_v31  ;;  %4901 = vmatprep.mubr.msk.f32.mxu1 %vm127_vm0, %v169_v45 }
 0x176   :  { %4887 = vmatprep.subr.mxu1 %v266_v48  ;;  %4925 = vmatprep.mubr.msk.f32.mxu0 %vm5441_vm1, %v5440_v55 }
 0x177   :  { %4888 = vmatpush3.msra.mxu1 %v266_v48 }
 0x178   :  { %4889 = vmatprep.subr.mxu1 %v265_v49 }
 0x179   :  { %4890 = vmatpush3.msra.mxu1 %v265_v49 }
 0x17a   :  { %4891 = vmatprep.subr.mxu1 %v264_v50 }
 0x17b   :  { %4892 = vmatpush3.msra.mxu1 %v264_v50 }
 0x17c   :  { %4893 = vmatprep.subr.mxu1 %v263_v51 }
 0x17d   :  { %4894 = vmatpush3.msra.mxu1 %v263_v51 }
 0x17e   :  { %4895 = vmatprep.subr.mxu1 %v262_v52 }
 0x17f   :  { %4896 = vmatpush3.msra.mxu1 %v262_v52 }
 0x180   :  { %4897 = vmatprep.subr.mxu1 %v261_v53 }
 0x181   :  { %4898 = vmatpush3.msra.mxu1 %v261_v53 }
 0x182   :  { %4899 = vmatprep.subr.mxu1 %v260_v54 }
 0x183   :  { %4900 = vmatpush3.msra.mxu1 %v260_v54 }
 0x184   :  { %4902 = vmatmul.mubr.msk.f32.vlgmr.msra.gmra.mxu1 %vm127_vm0, %v170_v47  ;;  %4928 = vmatprep.subr.mxu1 %v5440_v55 }
 0x185   :  { %4930 = vmatprep.mubr.msk.f32.mxu1 %vm5441_vm1, %v5440_v55 }
 0x234   :  { %v5681_v56 = vpop.f32.mrf.mxu1  ;;  %v5685_v58 = vpop.f32.mrf.mxu0 }
 0x236   :  { %v5683_v57 = vpop.f32.mrf.mxu1  ;;  %v5696_v61 = vpop.f32.mrf.mxu0 }
 0x244   :  { %v5687_v59 = vpop.f32.mrf.mxu1 }
 0x245   :  { %4929 = vmatpush3.xpose.msk.msra.mxu1 %vm426_vm2, %v5687_v59 }
 0x246   :  { %v5691_v60 = vpop.f32.mrf.mxu1  ;;  %4933 = vmatprep.subr.mxu1 %v5440_v55 }
 0x247   :  { %4924 = vmatpush3.xpose.msk.msra.mxu0 %vm426_vm2, %v5691_v60 }
 0x248   :  { %4931 = vmatmul.mubr.msk.f32.vlgmr.msra.gmra.mxu1 %vm426_vm2, %v5681_v56  ;;  %4943 = vmatprep.subr.mxu0 %v5440_v55 }
 0x249   :  { %4934 = vmatpush3.msra.mxu1 %v5696_v61  ;;  %4935 = vmatprep.mubr.msk.f32.mxu1 %vm5441_vm1, %v5440_v55 }
 0x24a   :  { %4926 = vmatmul.mubr.msk.f32.vlgmr.msra.gmra.mxu0 %vm426_vm2, %v5683_v57  ;;  %4938 = vmatprep.subr.mxu1 %v5440_v55 }
 0x24b   :  { %4945 = vmatprep.mubr.msk.f32.mxu0 %vm5441_vm1, %v5440_v55 }
 0x308   :  { %v575_v62 = vpop.f32.mrf.mxu1 }
 0x309   :  { %v580_v63 = vmul.f32 0.25, %v575_v62 }
 0x30a   :  { %v499_v0 = vpop.f32.mrf.mxu0  ;;  %v4932_v3 = vpop.f32.mrf.mxu1 }
 0x30b   :  { %v579_v4 = vmul.f32 0.25, %v499_v0  ;;  %v585_v5 = vsel %vm581_vm3, %v580_v63, -inf }
 0x30c   :  { %586 = vmax.xlane.f32.xlu1 %v585_v5  ;;  %v4927_v6 = vpop.f32.mrf.mxu0 }
 0x30d   :  { %v582_v7 = vsel %vm581_vm3, %v579_v4, -inf }
 0x30e   :  { %583 = vmax.xlane.f32.xlu0 %v582_v7 }
 0x395   :  { %v587_v8 = vpop.xlane.xlu1 %586 }
 0x396   :  { %v589_v9 = vsub.f32 %v580_v63, %v587_v8 }
 0x397   :  { %v584_v10 = vpop.xlane.xlu0 %583 }
 0x398   :  { %v592_v11 = vmul.f32 1.442695, %v589_v9  ;;  %v588_v12 = vsub.f32 %v579_v4, %v584_v10 }
 0x39a   :  { %5220 = vpow2.f32 %v592_v11  ;;  %v590_v13 = vmul.f32 1.442695, %v588_v12 }
 0x39c   :  { %5222 = vpow2.f32 %v590_v13 }
 0x3a7   :  { %v5221_v14 = vpop.eup %5220 }
 0x3a8   :  { %v597_v15 = vsel %vm581_vm3, %v5221_v14, 0.0 }
 0x3a9   :  { %v5223_v16 = vpop.eup %5222  ;;  %598 = vadd.xlane.f32.xlu1 %v597_v15 }
 0x3aa   :  { %v594_v17 = vsel %vm581_vm3, %v5223_v16, 0.0 }
 0x3ab   :  { %595 = vadd.xlane.f32.xlu0 %v594_v17 }
 0x3ba   :  { %830 = vrot.lane.b32.xlu1 %v5687_v59, %s5442_s2 }
 0x3be   :  { %750 = vrot.lane.b32.xlu1 %v5683_v57, %s5442_s2 }
 0x3c1   :  { %752 = vrot.lane.b32.xlu0 %v5691_v60, %s5442_s2 }
 0x3c2   :  { %828 = vrot.lane.b32.xlu1 %v5681_v56, %s5442_s2 }
 0x432   :  { %v599_v18 = vpop.xlane.xlu1 %598 }
 0x434   :  { %v596_v19 = vpop.xlane.xlu0 %595 }
 0x435   :  { %5224 = vrcp.f32 %v596_v19 }
 0x436   :  { %v831_v20 = vpop.permute.xlu1 %830  ;;  %5226 = vrcp.f32 %v599_v18 }
 0x438   :  { %v753_v21 = vpop.permute.xlu0 %752 }
 0x439   :  { %4944 = vmatpush3.xpose.msk.msra.mxu0 %vm426_vm2, %v753_v21 }
 0x43a   :  { %v751_v22 = vpop.permute.xlu1 %750  ;;  %4953 = vmatprep.subr.mxu0 %v5440_v55 }
 0x43c   :  { %4946 = vmatmul.mubr.msk.f32.vlgmr.msra.gmra.mxu0 %vm426_vm2, %v751_v22 }
 0x43d   :  { %4955 = vmatprep.mubr.msk.f32.mxu0 %vm5441_vm1, %v5440_v55 }
 0x43e   :  { %v829_v27 = vpop.permute.xlu1 %828 }
 0x442   :  { %v5225_v23 = vpop.eup %5224 }
 0x443   :  { %v602_v24 = vmul.f32 %v5225_v23, %v5223_v16  ;;  %v5227_v25 = vpop.eup %5226 }
 0x444   :  { %v603_v26 = vmul.f32 %v5227_v25, %v5221_v14 }
 0x445   :  { %4936 = vmatmul.mubr.msk.f32.vlgmr.msra.gmra.mxu1 %vm581_vm3, %v602_v24 }
 0x446   :  { %4939 = vmatpush3.msra.mxu1 %v5685_v58  ;;  %4940 = vmatprep.mubr.msk.f32.mxu1 %vm5441_vm1, %v5440_v55 }
 0x447   :  { %4948 = vmatprep.subr.mxu1 %v5440_v55 }
 0x449   :  { %4941 = vmatmul.mubr.msk.f32.vlgmr.msra.gmra.mxu1 %vm581_vm3, %v603_v26 }
 0x44a   :  { %4949 = vmatpush3.xpose.msk.msra.mxu1 %vm426_vm2, %v831_v20  ;;  %4950 = vmatprep.mubr.msk.f32.mxu1 %vm5441_vm1, %v5440_v55 }
 0x44b   :  { %4958 = vmatprep.subr.mxu1 %v5440_v55 }
 0x44d   :  { %4951 = vmatmul.mubr.msk.f32.vlgmr.msra.gmra.mxu1 %vm426_vm2, %v829_v27 }
 0x44e   :  { %4960 = vmatprep.mubr.msk.f32.mxu1 %vm5441_vm1, %v5440_v55 }
 0x4fc   :  { %v824_v28 = vpop.f32.mrf.mxu0 }
 0x4fd   :  { %v906_v29 = vmul.f32 0.25, %v824_v28 }
 0x4fe   :  { %v4947_v30 = vpop.f32.mrf.mxu0 }
 0x4ff   :  { %v908_v31 = vsel %vm581_vm3, %v906_v29, -inf }
 0x500   :  { %909 = vmax.xlane.f32.xlu0 %v908_v31 }
 0x505   :  { %v5740_v32 = vpop.f32.mrf.mxu1 }
 0x507   :  { %v4937_v33 = vpop.f32.mrf.mxu1 }
 0x509   :  { %v5742_v34 = vpop.f32.mrf.mxu1 }
 0x50b   :  { %v4942_v35 = vpop.f32.mrf.mxu1 }
 0x50d   :  { %v902_v36 = vpop.f32.mrf.mxu1 }
 0x50e   :  { %v907_v37 = vmul.f32 0.25, %v902_v36 }
 0x50f   :  { %v4952_v38 = vpop.f32.mrf.mxu1 }
 0x510   :  { %v911_v39 = vsel %vm581_vm3, %v907_v37, -inf }
 0x511   :  { %912 = vmax.xlane.f32.xlu1 %v911_v39 }
 0x522   :  { %1008 = vrot.lane.b32.xlu1 %v5685_v58, %s5442_s2 }
 0x526   :  { %1086 = vrot.lane.b32.xlu1 %v5691_v60, %s5443_s17 }
 0x52a   :  { %1164 = vrot.lane.b32.xlu1 %v5687_v59, %s5443_s17 }
 0x52e   :  { %1162 = vrot.lane.b32.xlu1 %v5681_v56, %s5443_s17 }
 0x589   :  { %v910_v40 = vpop.xlane.xlu0 %909 }
 0x58a   :  { %v914_v41 = vsub.f32 %v906_v29, %v910_v40 }
 0x58c   :  { %v916_v42 = vmul.f32 1.442695, %v914_v41 }
 0x58e   :  { %5228 = vpow2.f32 %v916_v42 }
 0x59a   :  { %v913_v43 = vpop.xlane.xlu1 %912 }
 0x59b   :  { %v5229_v44 = vpop.eup %5228  ;;  %v915_v47 = vsub.f32 %v907_v37, %v913_v43 }
 0x59c   :  { %v920_v45 = vsel %vm581_vm3, %v5229_v44, 0.0 }
 0x59d   :  { %921 = vadd.xlane.f32.xlu0 %v920_v45  ;;  %v918_v48 = vmul.f32 1.442695, %v915_v47 }
 0x59e   :  { %v1009_v46 = vpop.permute.xlu1 %1008 }
 0x59f   :  { %4959 = vmatpush3.msra.mxu1 %v1009_v46  ;;  %5230 = vpow2.f32 %v918_v48 }
 0x5a0   :  { %4968 = vmatprep.subr.mxu1 %v5440_v55 }
 0x5a2   :  { %v1087_v62 = vpop.permute.xlu1 %1086 }
 0x5a6   :  { %v1165_v4 = vpop.permute.xlu1 %1164 }
 0x5aa   :  { %v1163_v6 = vpop.permute.xlu1 %1162 }
 0x5ac   :  { %v5231_v49 = vpop.eup %5230 }
 0x5ad   :  { %v923_v50 = vsel %vm581_vm3, %v5231_v49, 0.0 }
 0x5b3   :  { %931 = vrot.lane.b32.xlu0 %v5696_v61, %s5442_s2 }
 0x5d2   :  { %924 = vadd.xlane.f32.xlu0 %v923_v50 }
 0x5e8   :  { %1084 = vrot.lane.b32.xlu0 %v5683_v57, %s5443_s17 }
 0x626   :  { %v922_v51 = vpop.xlane.xlu0 %921 }
 0x627   :  { %5232 = vrcp.f32 %v922_v51 }
 0x62a   :  { %v932_v52 = vpop.permute.xlu0 %931 }
 0x62b   :  { %4954 = vmatpush3.msra.mxu0 %v932_v52 }
 0x62c   :  { %4963 = vmatprep.subr.mxu0 %v5440_v55 }
 0x634   :  { %v5233_v53 = vpop.eup %5232 }
 0x635   :  { %v928_v54 = vmul.f32 %v5233_v53, %v5229_v44 }
 0x637   :  { %4956 = vmatmul.mubr.msk.f32.vlgmr.msra.gmra.mxu0 %vm581_vm3, %v928_v54 }
 0x638   :  { %4964 = vmatpush3.xpose.msk.msra.mxu0 %vm426_vm2, %v1087_v62  ;;  %4965 = vmatprep.mubr.msk.f32.mxu0 %vm5441_vm1, %v5440_v55 }
 0x639   :  { %4973 = vmatprep.subr.mxu0 %v5440_v55 }
 0x65b   :  { %v925_v63 = vpop.xlane.xlu0 %924 }
 0x65c   :  { %5234 = vrcp.f32 %v925_v63 }
 0x65f   :  { %v1085_v0 = vpop.permute.xlu0 %1084 }
 0x660   :  { %4966 = vmatmul.mubr.msk.f32.vlgmr.msra.gmra.mxu0 %vm426_vm2, %v1085_v0 }
 0x661   :  { %4975 = vmatprep.mubr.msk.f32.mxu0 %vm5441_vm1, %v5440_v55 }
 0x669   :  { %v5235_v3 = vpop.eup %5234 }
 0x66a   :  { %v929_v5 = vmul.f32 %v5235_v3, %v5231_v49 }
 0x66c   :  { %4961 = vmatmul.mubr.msk.f32.vlgmr.msra.gmra.mxu1 %vm581_vm3, %v929_v5 }
 0x66d   :  { %4969 = vmatpush3.xpose.msk.msra.mxu1 %vm426_vm2, %v1165_v4  ;;  %4970 = vmatprep.mubr.msk.f32.mxu1 %vm5441_vm1, %v5440_v55 }
 0x66e   :  { %4978 = vmatprep.subr.mxu1 %v5440_v55 }
 0x670   :  { %4971 = vmatmul.mubr.msk.f32.vlgmr.msra.gmra.mxu1 %vm426_vm2, %v1163_v6 }
 0x671   :  { %4980 = vmatprep.mubr.msk.f32.mxu1 %vm5441_vm1, %v5440_v55 }
 0x6f7   :  { %v5777_v7 = vpop.f32.mrf.mxu0 }
 0x6f9   :  { %v4957_v8 = vpop.f32.mrf.mxu0 }
 0x720   :  { %v1158_v9 = vpop.f32.mrf.mxu0 }
 0x721   :  { %v1240_v10 = vmul.f32 0.25, %v1158_v9 }
 0x722   :  { %v4967_v11 = vpop.f32.mrf.mxu0 }
 0x723   :  { %v1242_v12 = vsel %vm581_vm3, %v1240_v10, -inf }
 0x724   :  { %1243 = vmax.xlane.f32.xlu0 %v1242_v12 }
 0x72c   :  { %v5780_v13 = vpop.f32.mrf.mxu1 }
 0x72e   :  { %v4962_v14 = vpop.f32.mrf.mxu1 }
 0x72f   :  { %v1785_v14 = vld [vmem:[%s6587_s6 + $0x28] sm:$0xff] }
 0x730   :  { %v1236_v15 = vpop.f32.mrf.mxu1 }
 0x731   :  { %v1241_v16 = vmul.f32 0.25, %v1236_v15  ;;  %v1784_v15 = vld [vmem:[%s6587_s6 + $0x20] sm:$0xff] }
 0x732   :  { %v4972_v17 = vpop.f32.mrf.mxu1 }
 0x733   :  { %v1245_v18 = vsel %vm581_vm3, %v1241_v16, -inf  ;;  %v1782_v17 = vld [vmem:[%s6587_s6 + $0x10] sm:$0xff] }
 0x734   :  { %1246 = vmax.xlane.f32.xlu1 %v1245_v18  ;;  %v1781_v18 = vld [vmem:[%s6587_s6 + $0x8] sm:$0xff] }
 0x745   :  { %1340 = vrot.lane.b32.xlu1 %v5685_v58, %s5443_s17 }
 0x749   :  { %1418 = vrot.lane.b32.xlu1 %v5691_v60, %s5444_s24 }
 0x74d   :  { %1496 = vrot.lane.b32.xlu1 %v5687_v59, %s5444_s24 }
 0x751   :  { %1494 = vrot.lane.b32.xlu1 %v5681_v56, %s5444_s24 }
 0x7ad   :  { %v1244_v19 = vpop.xlane.xlu0 %1243 }
 0x7ae   :  { %v1248_v20 = vsub.f32 %v1240_v10, %v1244_v19  ;;  %v1780_v19 = vld [vmem:[%s6587_s6] sm:$0xff] }
 0x7b0   :  { %v1250_v21 = vmul.f32 1.442695, %v1248_v20 }
 0x7b2   :  { %5236 = vpow2.f32 %v1250_v21 }
 0x7bd   :  { %v1247_v22 = vpop.xlane.xlu1 %1246 }
 0x7be   :  { %v1249_v59 = vsub.f32 %v1241_v16, %v1247_v22  ;;  %v1783_v16 = vld [vmem:[%s6587_s6 + $0x18] sm:$0xff] }
 0x7bf   :  { %v5237_v23 = vpop.eup %5236 }
 0x7c0   :  { %v1254_v24 = vsel %vm581_vm3, %v5237_v23, 0.0  ;;  %v1252_v60 = vmul.f32 1.442695, %v1249_v59 }
 0x7c1   :  { %v1341_v25 = vpop.permute.xlu1 %1340  ;;  %1255 = vadd.xlane.f32.xlu0 %v1254_v24 }
 0x7c2   :  { %4979 = vmatpush3.msra.mxu1 %v1341_v25  ;;  %5238 = vpow2.f32 %v1252_v60 }
 0x7c3   :  { %4988 = vmatprep.subr.mxu1 %v5440_v55 }
 0x7c5   :  { %v1419_v31 = vpop.permute.xlu1 %1418 }
 0x7c9   :  { %v1497_v36 = vpop.permute.xlu1 %1496 }
 0x7cd   :  { %v1495_v38 = vpop.permute.xlu1 %1494 }
 0x7cf   :  { %v5239_v56 = vpop.eup %5238 }
 0x7d0   :  { %v1257_v26 = vsel %vm581_vm3, %v5239_v56, 0.0 }
 0x7d7   :  { %1264 = vrot.lane.b32.xlu0 %v5696_v61, %s5443_s17 }
 0x7f6   :  { %1258 = vadd.xlane.f32.xlu0 %v1257_v26 }
 0x80c   :  { %1416 = vrot.lane.b32.xlu0 %v5683_v57, %s5444_s24 }
 0x84a   :  { %v1256_v27 = vpop.xlane.xlu0 %1255 }
 0x84b   :  { %5240 = vrcp.f32 %v1256_v27 }
 0x84e   :  { %v1265_v28 = vpop.permute.xlu0 %1264 }
 0x84f   :  { %4974 = vmatpush3.msra.mxu0 %v1265_v28 }
 0x850   :  { %4983 = vmatprep.subr.mxu0 %v5440_v55 }
 0x858   :  { %v5241_v29 = vpop.eup %5240 }
 0x859   :  { %v1262_v30 = vmul.f32 %v5241_v29, %v5237_v23 }
 0x85b   :  { %4976 = vmatmul.mubr.msk.f32.vlgmr.msra.gmra.mxu0 %vm581_vm3, %v1262_v30 }
 0x85c   :  { %4984 = vmatpush3.xpose.msk.msra.mxu0 %vm426_vm2, %v1419_v31  ;;  %4985 = vmatprep.mubr.msk.f32.mxu0 %vm5441_vm1, %v5440_v55 }
 0x85d   :  { %4993 = vmatprep.subr.mxu0 %v5440_v55 }
 0x87f   :  { %v1259_v33 = vpop.xlane.xlu0 %1258 }
 0x880   :  { %5242 = vrcp.f32 %v1259_v33 }
 0x883   :  { %v1417_v57 = vpop.permute.xlu0 %1416 }
 0x884   :  { %4986 = vmatmul.mubr.msk.f32.vlgmr.msra.gmra.mxu0 %vm426_vm2, %v1417_v57 }
 0x885   :  { %4995 = vmatprep.mubr.msk.f32.mxu0 %vm5441_vm1, %v5440_v55 }
 0x88d   :  { %v5243_v35 = vpop.eup %5242 }
 0x88e   :  { %v1263_v37 = vmul.f32 %v5243_v35, %v5239_v56 }
 0x890   :  { %4981 = vmatmul.mubr.msk.f32.vlgmr.msra.gmra.mxu1 %vm581_vm3, %v1263_v37 }
 0x891   :  { %4989 = vmatpush3.xpose.msk.msra.mxu1 %vm426_vm2, %v1497_v36  ;;  %4990 = vmatprep.mubr.msk.f32.mxu1 %vm5441_vm1, %v5440_v55 }
 0x892   :  { %4998 = vmatprep.subr.mxu1 %v5440_v55 }
 0x894   :  { %4991 = vmatmul.mubr.msk.f32.vlgmr.msra.gmra.mxu1 %vm426_vm2, %v1495_v38 }
 0x895   :  { %5000 = vmatprep.mubr.msk.f32.mxu1 %vm5441_vm1, %v5440_v55 }
 0x91b   :  { %v1336_v39 = vpop.f32.mrf.mxu0 }
 0x91d   :  { %v4977_v40 = vpop.f32.mrf.mxu0 }
 0x944   :  { %v1490_v41 = vpop.f32.mrf.mxu0 }
 0x945   :  { %v1572_v42 = vmul.f32 0.25, %v1490_v41 }
 0x946   :  { %v4987_v43 = vpop.f32.mrf.mxu0 }
 0x947   :  { %v1574_v44 = vsel %vm581_vm3, %v1572_v42, -inf }
 0x948   :  { %1575 = vmax.xlane.f32.xlu0 %v1574_v44 }
 0x950   :  { %v1412_v45 = vpop.f32.mrf.mxu1 }
 0x952   :  { %v4982_v46 = vpop.f32.mrf.mxu1 }
 0x954   :  { %v1568_v47 = vpop.f32.mrf.mxu1 }
 0x955   :  { %v1573_v48 = vmul.f32 0.25, %v1568_v47 }
 0x956   :  { %v4992_v49 = vpop.f32.mrf.mxu1 }
 0x957   :  { %v1577_v50 = vsel %vm581_vm3, %v1573_v48, -inf  ;;  %v1937_v49 = vld [vmem:[%s6591_s10 + $0x78] sm:$0xff] }
 0x958   :  { %1578 = vmax.xlane.f32.xlu1 %v1577_v50  ;;  %v1936_v50 = vld [vmem:[%s6591_s10 + $0x70] sm:$0xff] }
 0x969   :  { %1672 = vrot.lane.b32.xlu1 %v5685_v58, %s5444_s24 }
 0x96d   :  { %1750 = vrot.lane.b32.xlu1 %v5777_v7, %s5433_s25 }
 0x971   :  { %1752 = vrot.lane.b32.xlu1 %v5780_v13, %s5433_s25  ;;  %v1786_v13 = vld [vmem:[%s6587_s6 + $0x30] sm:$0xff] }
 0x975   :  { %1760 = vrot.lane.b32.xlu1 %v1412_v45, %s5445_s26 }
 0x9d1   :  { %v1576_v51 = vpop.xlane.xlu0 %1575 }
 0x9d2   :  { %v1580_v52 = vsub.f32 %v1572_v42, %v1576_v51  ;;  %v1935_v51 = vld [vmem:[%s6591_s10 + $0x68] sm:$0xff] }
 0x9d4   :  { %v1582_v53 = vmul.f32 1.442695, %v1580_v52  ;;  %v1934_v52 = vld [vmem:[%s6591_s10 + $0x60] sm:$0xff] }
 0x9d6   :  { %5244 = vpow2.f32 %v1582_v53  ;;  %v1933_v53 = vld [vmem:[%s6591_s10 + $0x58] sm:$0xff] }
 0x9e1   :  { %v1579_v54 = vpop.xlane.xlu1 %1578 }
 0x9e2   :  { %v1581_v62 = vsub.f32 %v1573_v48, %v1579_v54  ;;  %v1932_v54 = vld [vmem:[%s6591_s10 + $0x50] sm:$0xff] }
 0x9e3   :  { %v5245_v63 = vpop.eup %5244 }
 0x9e4   :  { %v1584_v0 = vmul.f32 1.442695, %v1581_v62  ;;  %v1586_v3 = vsel %vm581_vm3, %v5245_v63, 0.0  ;;  %v1931_v62 = vld [vmem:[%s6591_s10 + $0x48] sm:$0xff] }
 0x9e5   :  { %v1673_v58 = vpop.permute.xlu1 %1672  ;;  %1587 = vadd.xlane.f32.xlu0 %v1586_v3  ;;  %v1928_v3 = vld [vmem:[%s6591_s10 + $0x30] sm:$0xff] }
 0x9e6   :  { %5246 = vpow2.f32 %v1584_v0  ;;  %4999 = vmatpush3.msra.mxu1 %v1673_v58  ;;  %v1929_v0 = vld [vmem:[%s6591_s10 + $0x38] sm:$0xff]  ;;  %v1927_v58 = vld [vmem:[%s6591_s10 + $0x28] sm:$0xff] }
 0x9e7   :  { %1972 = vmatprep.subr.mxu1 %v1937_v49  ;;  %v2053_v49 = vld [vmem:[%s6593_s12] sm:$0xff] }
 0x9e9   :  { %v1751_v24 = vpop.permute.xlu1 %1750 }
 0x9ea   :  { %v1772_v59 = vsel %vm426_vm2, %v5740_v32, %v1751_v24  ;;  %v4498_v32 = vld [vmem:[%s6588_s7] ss:$0 sm:$0xff] }
 0x9ed   :  { %v1753_v26 = vpop.permute.xlu1 %1752 }
 0x9ee   :  { %v1773_v29 = vsel %vm426_vm2, %v5742_v34, %v1753_v26 }
 0x9f1   :  { %v1761_v28 = vpop.permute.xlu1 %1760 }
 0x9f2   :  { %v1776_v30 = vsel %vm1774_vm5, %v1773_v29, %v1761_v28  ;;  %v2065_v28 = vld [vmem:[%s6593_s12 + $0x60] sm:$0xff]  ;;  %v2080_v29 = vld [vmem:[%s6593_s12 + $0xd8] sm:$0xff] }
 0x9f3   :  { %v5247_v4 = vpop.eup %5246 }
 0x9f4   :  { %v1589_v5 = vsel %vm581_vm3, %v5247_v4, 0.0 }
 0x9f5   :  { %1590 = vadd.xlane.f32.xlu0 %v1589_v5  ;;  %v1925_v5 = vld [vmem:[%s6591_s10 + $0x18] sm:$0xff] }
 0xa0b   :  { %1596 = vrot.lane.b32.xlu0 %v5696_v61, %s5444_s24  ;;  %v1787_v61 = vld [vmem:[%s6587_s6 + $0x38] sm:$0xff] }
 0xa0f   :  { %1758 = vrot.lane.b32.xlu0 %v1336_v39, %s5445_s26 }
 0xa6e   :  { %v1588_v6 = vpop.xlane.xlu0 %1587 }
 0xa6f   :  { %5248 = vrcp.f32 %v1588_v6  ;;  %v1924_v6 = vld [vmem:[%s6591_s10 + $0x10] sm:$0xff] }
 0xa7c   :  { %v5249_v8 = vpop.eup %5248 }
 0xa7d   :  { %v1594_v10 = vmul.f32 %v5249_v8, %v5245_v63  ;;  %v1930_v63 = vld [vmem:[%s6591_s10 + $0x40] sm:$0xff] }
 0xa7e   :  { %v1591_v7 = vpop.xlane.xlu0 %1590  ;;  %v1922_v8 = vld [vmem:[%s6591_s10] sm:$0xff] }
 0xa7f   :  { %5250 = vrcp.f32 %v1591_v7  ;;  %v1923_v7 = vld [vmem:[%s6591_s10 + $0x8] sm:$0xff] }
 0xa82   :  { %v1597_v9 = vpop.permute.xlu0 %1596 }
 0xa83   :  { %4994 = vmatpush3.msra.mxu0 %v1597_v9  ;;  %v2084_v9 = vld [vmem:[%s6593_s12 + $0xf8] sm:$0xff] }
 0xa84   :  { %4996 = vmatmul.mubr.msk.f32.vlgmr.msra.gmra.mxu0 %vm581_vm3, %v1594_v10  ;;  %5003 = vmatprep.subr.mxu0 %v1787_v61  ;;  %v2068_v10 = vld [vmem:[%s6593_s12 + $0x78] sm:$0xff] }
 0xa85   :  { %5004 = vmatpush3.msra.mxu0 %v1787_v61  ;;  %v2082_v61 = vld [vmem:[%s6593_s12 + $0xe8] sm:$0xff] }
 0xa86   :  { %5005 = vmatprep.subr.mxu0 %v1786_v13  ;;  %v1759_v25 = vpop.permute.xlu0 %1758 }
 0xa87   :  { %5006 = vmatpush3.msra.mxu0 %v1786_v13  ;;  %v1775_v60 = vsel %vm1774_vm5, %v1772_v59, %v1759_v25  ;;  %v2066_v13 = vld [vmem:[%s6593_s12 + $0x68] sm:$0xff] }
 0xa88   :  { %5007 = vmatprep.subr.mxu0 %v1785_v14 }
 0xa89   :  { %5008 = vmatpush3.msra.mxu0 %v1785_v14 }
 0xa8a   :  { %5009 = vmatprep.subr.mxu0 %v1784_v15 }
 0xa8b   :  { %5010 = vmatpush3.msra.mxu0 %v1784_v15 }
 0xa8c   :  { %v5251_v11 = vpop.eup %5250  ;;  %5011 = vmatprep.subr.mxu0 %v1783_v16 }
 0xa8d   :  { %v1595_v12 = vmul.f32 %v5251_v11, %v5247_v4  ;;  %5012 = vmatpush3.msra.mxu0 %v1783_v16  ;;  %v1926_v4 = vld [vmem:[%s6591_s10 + $0x20] sm:$0xff]  ;;  %v2083_v11 = vld [vmem:[%s6593_s12 + $0xf0] sm:$0xff] }
 0xa8e   :  { %5013 = vmatprep.subr.mxu0 %v1782_v17 }
 0xa8f   :  { %5001 = vmatmul.mubr.msk.f32.vlgmr.msra.gmra.mxu1 %vm581_vm3, %v1595_v12  ;;  %5014 = vmatpush3.msra.mxu0 %v1782_v17  ;;  %v2067_v12 = vld [vmem:[%s6593_s12 + $0x70] sm:$0xff] }
 0xa90   :  { %2020 = vmatprep.mubr.f32.mxu1 %v5440_v55  ;;  %5015 = vmatprep.subr.mxu0 %v1781_v18 }
 0xa91   :  { %5016 = vmatpush3.msra.mxu0 %v1781_v18  ;;  %1973 = vmatpush1.msra.mxu1 %v1936_v50  ;;  %v1940_v50 = vlaneseq }
 0xa92   :  { %5017 = vmatprep.subr.mxu0 %v1780_v19  ;;  %1974 = vmatprep.subr.mxu1 %v1935_v51 }
 0xa93   :  { %5018 = vmatpush3.msra.mxu0 %v1780_v19  ;;  %1975 = vmatpush1.msra.mxu1 %v1934_v52  ;;  %v6041_v51 = vshrl.u32 %v1940_v50, 7  ;;  %v4533_v50 = vld [vmem:[%s6586_s5 + $0x68] sm:$0xff] }
 0xa94   :  { %1976 = vmatprep.subr.mxu1 %v1933_v53  ;;  %4709 = vmatprep.subr.mxu0 %v2084_v9  ;;  %v1938_v53 = vld [vmem:[%s6592_s11] sm:$0x3] }
 0xa95   :  { %1977 = vmatpush1.msra.mxu1 %v1932_v54  ;;  %v1942_v52 = vsub.s32 0, %v6041_v51  ;;  %v1946_v54 = vsub.s32 1, %v6041_v51 }
 0xa96   :  { %1978 = vmatprep.subr.mxu1 %v1931_v62 }
 0xa97   :  { %1979 = vmatpush1.msra.mxu1 %v1930_v63  ;;  %v1943_v62 = vrot.slane %v1938_v53, %v1942_v52  ;;  %v1947_v63 = vrot.slane %v1938_v53, %v1946_v54  ;;  %v4512_v53 = vld [vmem:[%s6614_s30 + $0x60] sm:$0xff] }
 0xa98   :  { %1980 = vmatprep.subr.mxu1 %v1929_v0 }
 0xa99   :  { %1981 = vmatpush1.msra.mxu1 %v1928_v3 }
 0xa9a   :  { %1982 = vmatprep.subr.mxu1 %v1927_v58 }
 0xa9b   :  { %1983 = vmatpush1.msra.mxu1 %v1926_v4 }
 0xa9c   :  { %1984 = vmatprep.subr.mxu1 %v1925_v5 }
 0xa9d   :  { %1985 = vmatpush1.msra.mxu1 %v1924_v6 }
 0xa9e   :  { %1986 = vmatprep.subr.mxu1 %v1923_v7 }
 0xa9f   :  { %1987 = vmatpush1.msra.mxu1 %v1922_v8 }
 0xb44   :  { %v1668_v20 = vpop.f32.mrf.mxu0 }
 0xb45   :  { %1766 = vrot.lane.b32.xlu0 %v1668_v20, %s6604_s18 }
 0xb46   :  { %v4997_v21 = vpop.f32.mrf.mxu0 }
 0xb47   :  { %v4501_v21 = vld [vmem:[%s6589_s8] ss:$0 sm:$0xff] }
 0xb4f   :  { %v1744_v22 = vpop.f32.mrf.mxu1 }
 0xb50   :  { %1768 = vrot.lane.b32.xlu1 %v1744_v22, %s6604_s18 }
 0xb51   :  { %v5002_v23 = vpop.f32.mrf.mxu1 }
 0xb52   :  { %v4502_v23 = vld [vmem:[%s6590_s9] ss:$0 sm:$0xff] }
 0xbb7   :  { %v1767_v56 = vpop.permute.xlu0 %1766 }
 0xbb8   :  { %v1778_v27 = vsel %vm1777_vm4, %v1775_v60, %v1767_v56 }
 0xbb9   :  { %5019 = vmatprep.mubr.msk.f32.mxu0 %vm127_vm0, %v1778_v27  ;;  %v2081_v27 = vld [vmem:[%s6593_s12 + $0xe0] sm:$0xff] }
 0xbc2   :  { %v1769_v31 = vpop.permute.xlu1 %1768 }
 0xbc3   :  { %v1779_v33 = vsel %vm1777_vm4, %v1776_v30, %v1769_v31  ;;  %v2064_v30 = vld [vmem:[%s6593_s12 + $0x58] sm:$0xff]  ;;  %v2079_v31 = vld [vmem:[%s6593_s12 + $0xd0] sm:$0xff] }
 0xbc4   :  { %5020 = vmatmul.mubr.msk.f32.vlgmr.msra.gmra.mxu0 %vm127_vm0, %v1779_v33  ;;  %v2063_v33 = vld [vmem:[%s6593_s12 + $0x50] sm:$0xff] }
 0xbc5   :  { %4710 = vmatpush3.msra.mxu0 %v2068_v10 }
 0xbc6   :  { %4711 = vmatprep.subr.mxu0 %v2083_v11 }
 0xbc7   :  { %4712 = vmatpush3.msra.mxu0 %v2067_v12 }
 0xbc8   :  { %4713 = vmatprep.subr.mxu0 %v2082_v61 }
 0xbc9   :  { %4714 = vmatpush3.msra.mxu0 %v2066_v13 }
 0xbca   :  { %4715 = vmatprep.subr.mxu0 %v2081_v27 }
 0xbcb   :  { %4716 = vmatpush3.msra.mxu0 %v2065_v28 }
 0xbcc   :  { %4717 = vmatprep.subr.mxu0 %v2080_v29 }
 0xbcd   :  { %4718 = vmatpush3.msra.mxu0 %v2064_v30  ;;  %v4505_v30 = vld [vmem:[%s6594_s13] ss:$0 sm:$0xff] }
 0xbce   :  { %4719 = vmatprep.subr.mxu0 %v2079_v31 }
 0xbcf   :  { %4720 = vmatpush3.msra.mxu0 %v2063_v33 }
 0xc84   :  { %v5021_v57 = vpop.f32.mrf.mxu0 }
 0xc85   :  { %v1873_v35 = vadd.f32 %v5021_v57, %v4498_v32  ;;  %v2062_v57 = vld [vmem:[%s6593_s12 + $0x48] sm:$0xff] }
 0xc86   :  { %v1867_v36 = vpop.f32.mrf.mxu0 }
 0xc87   :  { %v1868_v37 = vadd.f32 %v4498_v32, %v1867_v36  ;;  %v1877_v38 = vadd.f32 %v1873_v35, %v5577_v2  ;;  %v2078_v32 = vld [vmem:[%s6593_s12 + $0xc8] sm:$0xff]  ;;  %v2077_v35 = vld [vmem:[%s6593_s12 + $0xc0] sm:$0xff] }
 0xc88   :  { %4721 = vmatprep.subr.mxu0 %v2078_v32  ;;  %v2061_v36 = vld [vmem:[%s6593_s12 + $0x40] sm:$0xff] }
 0xc89   :  { %v1883_v39 = vsel %vm127_vm0, %v1877_v38, 0.0  ;;  %v1876_v34 = vadd.f32 %v1868_v37, %v5575_v1  ;;  %4722 = vmatpush3.msra.mxu0 %v2062_v57  ;;  %v2076_v37 = vld [vmem:[%s6593_s12 + $0xb8] sm:$0xff] }
 0xc8a   :  { %1884 = vadd.xlane.f32.xlu1 %v1883_v39  ;;  %4723 = vmatprep.subr.mxu0 %v2077_v35  ;;  %v2075_v39 = vld [vmem:[%s6593_s12 + $0xb0] sm:$0xff] }
 0xc8b   :  { %v1880_v40 = vsel %vm127_vm0, %v1876_v34, 0.0  ;;  %4724 = vmatpush3.msra.mxu0 %v2061_v36 }
 0xc8c   :  { %1881 = vadd.xlane.f32.xlu0 %v1880_v40  ;;  %4725 = vmatprep.subr.mxu0 %v2076_v37  ;;  %v2074_v40 = vld [vmem:[%s6593_s12 + $0xa8] sm:$0xff] }
 0xd13   :  { %v1885_v41 = vpop.xlane.xlu1 %1884 }
 0xd14   :  { %v1887_v42 = vmul.f32 0.015625, %v1885_v41  ;;  %v2058_v41 = vld [vmem:[%s6593_s12 + $0x28] sm:$0xff] }
 0xd15   :  { %v1882_v43 = vpop.xlane.xlu0 %1881 }
 0xd16   :  { %v1886_v44 = vmul.f32 0.015625, %v1882_v43  ;;  %v5875_v45 = vsub.f32 %v1877_v38, %v1887_v42  ;;  %v2060_v38 = vld [vmem:[%s6593_s12 + $0x38] sm:$0xff]  ;;  %v2073_v42 = vld [vmem:[%s6593_s12 + $0xa0] sm:$0xff] }
 0xd17   :  { %4726 = vmatpush3.msra.mxu0 %v2060_v38  ;;  %v2057_v43 = vld [vmem:[%s6593_s12 + $0x20] sm:$0xff] }
 0xd18   :  { %v1888_v46 = vsub.f32 %v1876_v34, %v1886_v44  ;;  %v1891_v2 = vmul.f32 %v5875_v45, %v5875_v45  ;;  %4727 = vmatprep.subr.mxu0 %v2075_v39  ;;  %v2059_v34 = vld [vmem:[%s6593_s12 + $0x30] sm:$0xff]  ;;  %v2072_v44 = vld [vmem:[%s6593_s12 + $0x98] sm:$0xff] }
 0xd19   :  { %4728 = vmatpush3.msra.mxu0 %v2059_v34 }
 0xd1a   :  { %v1890_v47 = vmul.f32 %v1888_v46, %v1888_v46  ;;  %v1895_v1 = vsel %vm127_vm0, %v1891_v2, 0.0  ;;  %4729 = vmatprep.subr.mxu0 %v2074_v40  ;;  %v2054_v2 = vld [vmem:[%s6593_s12 + $0x8] sm:$0xff] }
 0xd1b   :  { %4730 = vmatpush3.msra.mxu0 %v2058_v41 }
 0xd1c   :  { %v1892_v48 = vsel %vm127_vm0, %v1890_v47, 0.0  ;;  %4731 = vmatprep.subr.mxu0 %v2073_v42  ;;  %v2055_v47 = vld [vmem:[%s6593_s12 + $0x10] sm:$0xff] }
 0xd1d   :  { %1893 = vadd.xlane.f32.xlu0 %v1892_v48  ;;  %4732 = vmatpush3.msra.mxu0 %v2057_v43  ;;  %v2070_v48 = vld [vmem:[%s6593_s12 + $0x88] sm:$0xff] }
 0xd1e   :  { %4733 = vmatprep.subr.mxu0 %v2072_v44 }
 0xd21   :  { %1896 = vadd.xlane.f32.xlu0 %v1895_v1  ;;  %v2069_v1 = vld [vmem:[%s6593_s12 + $0x80] sm:$0xff] }
 0xda6   :  { %v1894_v14 = vpop.xlane.xlu0 %1893 }
 0xda7   :  { %v1898_v15 = vmul.f32 0.015625, %v1894_v14 }
 0xda9   :  { %v1900_v16 = vadd.f32 1e-05, %v1898_v15 }
 0xdaa   :  { %v1897_v17 = vpop.xlane.xlu0 %1896 }
 0xdab   :  { %5252 = vrsqrt.f32 %v1900_v16  ;;  %v1899_v18 = vmul.f32 0.015625, %v1897_v17 }
 0xdad   :  { %v1901_v19 = vadd.f32 1e-05, %v1899_v18 }
 0xdaf   :  { %5254 = vrsqrt.f32 %v1901_v19 }
 0xdb8   :  { %v5253_v20 = vpop.eup %5252 }
 0xdb9   :  { %v1904_v22 = vmul.f32 %v5253_v20, %v1888_v46  ;;  %v2071_v46 = vld [vmem:[%s6593_s12 + $0x90] sm:$0xff] }
 0xdbb   :  { %v1912_v24 = vmul.f32 %v4501_v21, %v1904_v22 }
 0xdbc   :  { %v5255_v25 = vpop.eup %5254 }
 0xdbd   :  { %v5953_v59 = vadd.f32 %v4502_v23, %v1912_v24  ;;  %v1905_v60 = vmul.f32 %v5255_v25, %v5875_v45  ;;  %v2056_v45 = vld [vmem:[%s6593_s12 + $0x18] sm:$0xff] }
 0xdbe   :  { %4734 = vmatpush3.msra.mxu0 %v2056_v45 }
 0xdbf   :  { %4503 = vmatmul.mubr.msk.f32.vlgmr.msra.gmra.mxu1 %vm127_vm0, %v5953_v59  ;;  %v1913_v56 = vmul.f32 %v4501_v21, %v1905_v60  ;;  %4735 = vmatprep.subr.mxu0 %v2071_v46 }
 0xdc0   :  { %2026 = vmatprep.mubr.f32.mxu1 %v5440_v55  ;;  %4736 = vmatpush3.msra.mxu0 %v2055_v47  ;;  %v4515_v47 = vld [vmem:[%s6614_s30 + $0x78] sm:$0xff] }
 0xdc1   :  { %v5959_v26 = vadd.f32 %v4502_v23, %v1913_v56  ;;  %4737 = vmatprep.subr.mxu0 %v2070_v48  ;;  %v4535_v48 = vld [vmem:[%s6586_s5 + $0x78] sm:$0xff]  ;;  %5022 = vmatprep.subr.mxu1 %v4515_v47 }
 0xdc2   :  { %4738 = vmatpush3.msra.mxu0 %v2054_v2  ;;  %v4514_v2 = vld [vmem:[%s6614_s30 + $0x70] sm:$0xff]  ;;  %5023 = vmatpush3.msra.mxu1 %v4515_v47 }
 0xdc3   :  { %4504 = vmatmul.mubr.msk.f32.gmra.mxu1 %vm127_vm0, %v5959_v26  ;;  %4739 = vmatprep.subr.mxu0 %v2069_v1  ;;  %v4534_v1 = vld [vmem:[%s6586_s5 + $0x70] sm:$0xff] }
 0xdc4   :  { %4740 = vmatpush3.msra.mxu0 %v2053_v49  ;;  %v4513_v49 = vld [vmem:[%s6614_s30 + $0x68] sm:$0xff]  ;;  %5024 = vmatprep.subr.mxu1 %v4514_v2 }
 0xdc5   :  { %5060 = vmatprep.subr.mxu0 %v4535_v48  ;;  %5025 = vmatpush3.msra.mxu1 %v4514_v2 }
 0xdc6   :  { %5026 = vmatprep.subr.mxu1 %v4513_v49 }
 0xdc7   :  { %5027 = vmatpush3.msra.mxu1 %v4513_v49 }
 0xdc8   :  { %5028 = vmatprep.subr.mxu1 %v4512_v53 }
 0xdc9   :  { %5029 = vmatpush3.msra.mxu1 %v4512_v53 }
 0xe7f   :  { %v2022_v0 = vpop.f32.mrf.mxu1 }
 0xe80   :  { %v2023_v3 = vadd.f32 %v2022_v0, %v1943_v62  ;;  %v4531_v0 = vld [vmem:[%s6586_s5 + $0x58] sm:$0xff] }
 0xe81   :  { %v2024_v58 = vpop.f32.mrf.mxu1 }
 0xe82   :  { %v2037_v4 = vmul.f32 0.70710677, %v2023_v3  ;;  %v2025_v5 = vadd.f32 %v2024_v58, %v1947_v63  ;;  %v2033_v18 = vmul.f32 0.5, %v2023_v3  ;;  %v4510_v3 = vld [vmem:[%s6614_s30 + $0x50] sm:$0xff] }
 0xe83   :  { %v2028_v6 = vpop.f32.mrf.mxu1  ;;  %v4530_v58 = vld [vmem:[%s6586_s5 + $0x50] sm:$0xff] }
 0xe84   :  { %5256 = verf.f32 %v2037_v4  ;;  %v2038_v7 = vmul.f32 0.70710677, %v2025_v5  ;;  %v2029_v8 = vadd.f32 %v2028_v6, %v1943_v62  ;;  %v2034_v15 = vmul.f32 0.5, %v2025_v5  ;;  %v4532_v62 = vld [vmem:[%s6586_s5 + $0x60] sm:$0xff]  ;;  %v4509_v4 = vld [vmem:[%s6614_s30 + $0x48] sm:$0xff] }
 0xe85   :  { %v2030_v9 = vpop.f32.mrf.mxu1  ;;  %v4529_v5 = vld [vmem:[%s6586_s5 + $0x48] sm:$0xff]  ;;  %v4508_v6 = vld [vmem:[%s6614_s30 + $0x40] sm:$0xff] }
 0xe86   :  { %5258 = verf.f32 %v2038_v7  ;;  %v2039_v10 = vmul.f32 0.70710677, %v2029_v8  ;;  %v2031_v11 = vadd.f32 %v2030_v9, %v1947_v63  ;;  %v2035_v25 = vmul.f32 0.5, %v2029_v8  ;;  %v4511_v63 = vld [vmem:[%s6614_s30 + $0x58] sm:$0xff]  ;;  %v4528_v7 = vld [vmem:[%s6586_s5 + $0x40] sm:$0xff]  ;;  %s6616_s5 = smov 48  }
 0xe87   :  { %5030 = vmatprep.subr.mxu1 %v4511_v63  ;;  %v4525_v8 = vld [vmem:[%s6615_s23 + $0x78] sm:$0xff] }
 0xe88   :  { %5260 = verf.f32 %v2039_v10  ;;  %v2040_v12 = vmul.f32 0.70710677, %v2031_v11  ;;  %v2036_v23 = vmul.f32 0.5, %v2031_v11  ;;  %5031 = vmatpush3.msra.mxu1 %v4511_v63 }
 0xe89   :  { %5032 = vmatprep.subr.mxu1 %v4510_v3 }
 0xe8a   :  { %5262 = verf.f32 %v2040_v12  ;;  %5033 = vmatpush3.msra.mxu1 %v4510_v3 }
 0xe8b   :  { %5034 = vmatprep.subr.mxu1 %v4509_v4 }
 0xe8c   :  { %5035 = vmatpush3.msra.mxu1 %v4509_v4 }
 0xe8d   :  { %5036 = vmatprep.subr.mxu1 %v4508_v6 }
 0xe8e   :  { %5037 = vmatpush3.msra.mxu1 %v4508_v6 }
 0xe8f   :  { %5041 = vmatprep.subr.mxu1 %v4525_v8 }
 0xe91   :  { %v5257_v61 = vpop.eup %5256 }
 0xe92   :  { %v2045_v14 = vadd.f32 1.0, %v5257_v61 }
 0xe93   :  { %v5259_v13 = vpop.eup %5258 }
 0xe94   :  { %v2046_v16 = vadd.f32 1.0, %v5259_v13  ;;  %v2049_v21 = vmul.f32 %v2045_v14, %v2033_v18 }
 0xe95   :  { %v5261_v17 = vpop.eup %5260 }
 0xe96   :  { %v2050_v19 = vmul.f32 %v2046_v16, %v2034_v15  ;;  %v2047_v22 = vadd.f32 1.0, %v5261_v17  ;;  %v4506_v15 = vld [vmem:[#allocation6 + $0x1] ss:$0 sm:$0xff]  ;;  %v4507_v17 = vld [vmem:[#allocation8 + $0x1] ss:$0 sm:$0xff] }
 0xe97   :  { %v5263_v20 = vpop.eup %5262 }
 0xe98   :  { %2149 = vmatprep.mubr.f32.mxu0 %v2050_v19  ;;  %v2048_v24 = vadd.f32 1.0, %v5263_v20  ;;  %v2051_v56 = vmul.f32 %v2047_v22, %v2035_v25  ;;  %v4523_v25 = vld [vmem:[%s6615_s23 + $0x68] sm:$0xff] }
 0xe99   :  { %2150 = vmatmul.mubr.f32.vlgmr.msra.gmra.mxu0 %v2049_v21 }
 0xe9a   :  { %v2052_v60 = vmul.f32 %v2048_v24, %v2036_v23  ;;  %5061 = vmatpush3.msra.mxu0 %v4535_v48  ;;  %v4524_v24 = vld [vmem:[%s6615_s23 + $0x70] sm:$0xff] }
 0xe9b   :  { %5062 = vmatprep.subr.mxu0 %v4534_v1 }
 0xe9c   :  { %2154 = vmatprep.mubr.f32.mxu0 %v2052_v60  ;;  %5063 = vmatpush3.msra.mxu0 %v4534_v1  ;;  %v4522_v60 = vld [vmem:[%s6615_s23 + $0x60] sm:$0xff] }
 0xe9d   :  { %2155 = vmatmul.mubr.f32.gmra.mxu0 %v2051_v56  ;;  %5064 = vmatprep.subr.mxu0 %v4533_v50  ;;  %v4521_v56 = vld [vmem:[%s6615_s23 + $0x58] sm:$0xff] }
 0xe9e   :  { %5065 = vmatpush3.msra.mxu0 %v4533_v50 }
 0xe9f   :  { %5066 = vmatprep.subr.mxu0 %v4532_v62 }
 0xea0   :  { %5067 = vmatpush3.msra.mxu0 %v4532_v62 }
 0xea1   :  { %5068 = vmatprep.subr.mxu0 %v4531_v0 }
 0xea2   :  { %5069 = vmatpush3.msra.mxu0 %v4531_v0 }
 0xea3   :  { %5070 = vmatprep.subr.mxu0 %v4530_v58 }
 0xea4   :  { %5071 = vmatpush3.msra.mxu0 %v4530_v58 }
 0xea5   :  { %5072 = vmatprep.subr.mxu0 %v4529_v5 }
 0xea6   :  { %5073 = vmatpush3.msra.mxu0 %v4529_v5 }
 0xea7   :  { %5074 = vmatprep.subr.mxu0 %v4528_v7 }
 0xea8   :  { %5075 = vmatpush3.msra.mxu0 %v4528_v7 }
 0xea9   :  { %5099 = vmatprep.subr.mxu0 %v5440_v55 }
 0xf59   :  { %v4741_v27 = vpop.f32.mrf.mxu0 }
 0xf5b   :  { %v4742_v28 = vpop.f32.mrf.mxu0 }
 0xf5c   :  { %v4743_v29 = vadd.f32 %v4742_v28, %v4741_v27  ;;  %v4520_v27 = vld [vmem:[%s6615_s23 + $0x50] sm:$0xff]  ;;  %v4519_v28 = vld [vmem:[%s6615_s23 + $0x48] sm:$0xff] }
 0xf5d   :  { %v4744_v31 = vpop.f32.mrf.mxu0 }
 0xf5e   :  { %v2160_v33 = vadd.f32 %v4743_v29, %v5953_v59  ;;  %v4518_v29 = vld [vmem:[%s6615_s23 + $0x40] sm:$0xff] }
 0xf5f   :  { %v4745_v32 = vpop.f32.mrf.mxu0 }
 0xf60   :  { %v6056_v57 = vadd.f32 %v4505_v30, %v2160_v33  ;;  %v4746_v35 = vadd.f32 %v4745_v32, %v4744_v31 }
 0xf62   :  { %v2161_v36 = vadd.f32 %v4746_v35, %v5959_v26  ;;  %v2175_v37 = vsel %vm127_vm0, %v6056_v57, 0.0 }
 0xf63   :  { %2176 = vadd.xlane.f32.xlu0 %v2175_v37 }
 0xf64   :  { %v6061_v38 = vadd.f32 %v4505_v30, %v2161_v36 }
 0xf66   :  { %v2178_v39 = vsel %vm127_vm0, %v6061_v38, 0.0 }
 0xf67   :  { %2179 = vadd.xlane.f32.xlu1 %v2178_v39 }
 0xfec   :  { %v2177_v34 = vpop.xlane.xlu0 %2176 }
 0xfed   :  { %v2181_v40 = vmul.f32 0.015625, %v2177_v34 }
 0xfef   :  { %v6066_v59 = vsub.f32 %v6056_v57, %v2181_v40 }
 0xff0   :  { %v2180_v41 = vpop.xlane.xlu1 %2179 }
 0xff1   :  { %v2182_v42 = vmul.f32 0.015625, %v2180_v41  ;;  %v2185_v26 = vmul.f32 %v6066_v59, %v6066_v59 }
 0xff3   :  { %v6071_v43 = vsub.f32 %v6061_v38, %v2182_v42  ;;  %v2187_v44 = vsel %vm127_vm0, %v2185_v26, 0.0 }
 0xff4   :  { %2188 = vadd.xlane.f32.xlu0 %v2187_v44 }
 0xff5   :  { %v2186_v45 = vmul.f32 %v6071_v43, %v6071_v43 }
 0xff7   :  { %v2190_v46 = vsel %vm127_vm0, %v2186_v45, 0.0 }
 0xff8   :  { %2191 = vadd.xlane.f32.xlu1 %v2190_v46 }
0x107d   :  { %v2189_v9 = vpop.xlane.xlu0 %2188 }
0x107e   :  { %v2193_v10 = vmul.f32 0.015625, %v2189_v9 }
0x1080   :  { %v2195_v11 = vadd.f32 1e-05, %v2193_v10 }
0x1081   :  { %v2192_v12 = vpop.xlane.xlu1 %2191 }
0x1082   :  { %5264 = vrsqrt.f32 %v2195_v11  ;;  %v2194_v61 = vmul.f32 0.015625, %v2192_v12 }
0x1084   :  { %v2196_v13 = vadd.f32 1e-05, %v2194_v61 }
0x1086   :  { %5266 = vrsqrt.f32 %v2196_v13 }
0x108f   :  { %v5265_v14 = vpop.eup %5264 }
0x1090   :  { %v2199_v16 = vmul.f32 %v5265_v14, %v6066_v59 }
0x1092   :  { %v2207_v18 = vmul.f32 %v4506_v15, %v2199_v16 }
0x1093   :  { %v5267_v19 = vpop.eup %5266 }
0x1094   :  { %v2200_v20 = vmul.f32 %v5267_v19, %v6071_v43  ;;  %v2215_v21 = vadd.f32 %v4507_v17, %v2207_v18 }
0x1096   :  { %v2208_v22 = vmul.f32 %v4506_v15, %v2200_v20  ;;  %5038 = vmatprep.mubr.msk.f32.mxu1 %vm127_vm0, %v2215_v21  ;;  %5076 = vmatprep.mubr.msk.f32.mxu0 %vm127_vm0, %v2215_v21 }
0x1098   :  { %v2216_v23 = vadd.f32 %v4507_v17, %v2208_v22 }
0x109a   :  { %5039 = vmatmul.mubr.msk.f32.vlgmr.msra.gmra.mxu1 %vm127_vm0, %v2216_v23  ;;  %5077 = vmatmul.mubr.msk.f32.vlgmr.msra.gmra.mxu0 %vm127_vm0, %v2216_v23 }
0x109b   :  { %5042 = vmatpush3.msra.mxu1 %v4525_v8  ;;  %5057 = vmatprep.mubr.msk.f32.mxu1 %vm127_vm0, %v2215_v21 }
0x109c   :  { %5043 = vmatprep.subr.mxu1 %v4524_v24  ;;  %5101 = vmatprep.mubr.msk.f32.mxu0 %vm5441_vm1, %v5440_v55 }
0x109d   :  { %5044 = vmatpush3.msra.mxu1 %v4524_v24 }
0x109e   :  { %5045 = vmatprep.subr.mxu1 %v4523_v25 }
0x109f   :  { %5046 = vmatpush3.msra.mxu1 %v4523_v25 }
0x10a0   :  { %5047 = vmatprep.subr.mxu1 %v4522_v60 }
0x10a1   :  { %5048 = vmatpush3.msra.mxu1 %v4522_v60 }
0x10a2   :  { %5049 = vmatprep.subr.mxu1 %v4521_v56 }
0x10a3   :  { %5050 = vmatpush3.msra.mxu1 %v4521_v56 }
0x10a4   :  { %5051 = vmatprep.subr.mxu1 %v4520_v27 }
0x10a5   :  { %5052 = vmatpush3.msra.mxu1 %v4520_v27 }
0x10a6   :  { %5053 = vmatprep.subr.mxu1 %v4519_v28 }
0x10a7   :  { %5054 = vmatpush3.msra.mxu1 %v4519_v28 }
0x10a8   :  { %5055 = vmatprep.subr.mxu1 %v4518_v29 }
0x10a9   :  { %5056 = vmatpush3.msra.mxu1 %v4518_v29 }
0x10aa   :  { %5058 = vmatmul.mubr.msk.f32.vlgmr.msra.gmra.mxu1 %vm127_vm0, %v2216_v23  ;;  %5079 = vmatprep.subr.mxu1 %v5440_v55 }
0x10ab   :  { %5081 = vmatprep.mubr.msk.f32.mxu1 %vm5441_vm1, %v5440_v55 }
0x115a   :  { %v6163_v30 = vpop.f32.mrf.mxu1  ;;  %v6174_v35 = vpop.f32.mrf.mxu0 }
0x115c   :  { %v6165_v31 = vpop.f32.mrf.mxu1  ;;  %v6183_v36 = vpop.f32.mrf.mxu0 }
0x116a   :  { %v6167_v33 = vpop.f32.mrf.mxu1 }
0x116c   :  { %v6169_v32 = vpop.f32.mrf.mxu1 }
0x116d   :  { %5080 = vmatpush3.xpose.msk.msra.mxu1 %vm426_vm2, %v6169_v32 }
0x116e   :  { %5084 = vmatprep.subr.mxu1 %v5440_v55 }
0x1170   :  { %5082 = vmatmul.mubr.msk.f32.vlgmr.msra.gmra.mxu1 %vm426_vm2, %v6165_v31 }
0x1171   :  { %5085 = vmatpush3.xpose.msk.msra.mxu1 %vm426_vm2, %v6167_v33  ;;  %5086 = vmatprep.mubr.msk.f32.mxu1 %vm5441_vm1, %v5440_v55 }
0x1172   :  { %5089 = vmatprep.subr.mxu1 %v5440_v55 }
0x1174   :  { %5087 = vmatmul.mubr.msk.f32.vlgmr.msra.gmra.mxu1 %vm426_vm2, %v6163_v30 }
0x1175   :  { %5090 = vmatpush3.msra.mxu1 %v6183_v36  ;;  %5091 = vmatprep.mubr.msk.f32.mxu1 %vm5441_vm1, %v5440_v55 }
0x1176   :  { %5094 = vmatprep.subr.mxu1 %v5440_v55 }
0x1230   :  { %v2547_v37 = vpop.f32.mrf.mxu1 }
0x1231   :  { %v2627_v39 = vmul.f32 0.25, %v2547_v37 }
0x1232   :  { %v5083_v34 = vpop.f32.mrf.mxu1 }
0x1233   :  { %v2629_v40 = vsel %vm581_vm3, %v2627_v39, -inf }
0x1234   :  { %2630 = vmax.xlane.f32.xlu0 %v2629_v40  ;;  %v2623_v59 = vpop.f32.mrf.mxu1 }
0x1235   :  { %v2628_v41 = vmul.f32 0.25, %v2623_v59 }
0x1236   :  { %v5088_v42 = vpop.f32.mrf.mxu1 }
0x1237   :  { %v2632_v26 = vsel %vm581_vm3, %v2628_v41, -inf }
0x1238   :  { %2633 = vmax.xlane.f32.xlu1 %v2632_v26 }
0x1249   :  { %2877 = vrot.lane.b32.xlu1 %v6167_v33, %s5442_s2 }
0x124d   :  { %2797 = vrot.lane.b32.xlu1 %v6165_v31, %s5442_s2 }
0x12bd   :  { %v2631_v43 = vpop.xlane.xlu0 %2630 }
0x12be   :  { %v2635_v44 = vsub.f32 %v2627_v39, %v2631_v43 }
0x12c0   :  { %v2637_v45 = vmul.f32 1.442695, %v2635_v44 }
0x12c1   :  { %v2634_v46 = vpop.xlane.xlu1 %2633 }
0x12c2   :  { %5268 = vpow2.f32 %v2637_v45  ;;  %v2636_v47 = vsub.f32 %v2628_v41, %v2634_v46 }
0x12c4   :  { %v2639_v48 = vmul.f32 1.442695, %v2636_v47 }
0x12c5   :  { %v2878_v53 = vpop.permute.xlu1 %2877 }
0x12c6   :  { %5270 = vpow2.f32 %v2639_v48 }
0x12c9   :  { %v2798_v62 = vpop.permute.xlu1 %2797 }
0x12cf   :  { %v5269_v2 = vpop.eup %5268 }
0x12d0   :  { %v2641_v1 = vsel %vm581_vm3, %v5269_v2, 0.0 }
0x12d1   :  { %2642 = vadd.xlane.f32.xlu0 %v2641_v1 }
0x12d3   :  { %v5271_v49 = vpop.eup %5270 }
0x12d4   :  { %v2644_v50 = vsel %vm581_vm3, %v5271_v49, 0.0 }
0x12d5   :  { %2645 = vadd.xlane.f32.xlu1 %v2644_v50 }
0x12e6   :  { %2875 = vrot.lane.b32.xlu1 %v6163_v30, %s5442_s2 }
0x12e7   :  { %2799 = vrot.lane.b32.xlu0 %v6169_v32, %s5442_s2 }
0x135a   :  { %v2643_v63 = vpop.xlane.xlu0 %2642 }
0x135b   :  { %5272 = vrcp.f32 %v2643_v63 }
0x135e   :  { %v2800_v0 = vpop.permute.xlu0 %2799  ;;  %v2646_v3 = vpop.xlane.xlu1 %2645 }
0x135f   :  { %5274 = vrcp.f32 %v2646_v3  ;;  %5100 = vmatpush3.xpose.msk.msra.mxu0 %vm426_vm2, %v2800_v0 }
0x1360   :  { %5109 = vmatprep.subr.mxu0 %v5440_v55 }
0x1362   :  { %5102 = vmatmul.mubr.msk.f32.vlgmr.msra.gmra.mxu0 %vm426_vm2, %v2798_v62  ;;  %v2876_v7 = vpop.permute.xlu1 %2875 }
0x1363   :  { %5111 = vmatprep.mubr.msk.f32.mxu0 %vm5441_vm1, %v5440_v55 }
0x1368   :  { %v5273_v58 = vpop.eup %5272 }
0x1369   :  { %v2649_v4 = vmul.f32 %v5273_v58, %v5269_v2 }
0x136b   :  { %5092 = vmatmul.mubr.msk.f32.vlgmr.msra.gmra.mxu1 %vm581_vm3, %v2649_v4 }
0x136c   :  { %v5275_v5 = vpop.eup %5274  ;;  %5095 = vmatpush3.msra.mxu1 %v6174_v35  ;;  %5096 = vmatprep.mubr.msk.f32.mxu1 %vm5441_vm1, %v5440_v55 }
0x136d   :  { %5104 = vmatprep.subr.mxu1 %v5440_v55  ;;  %v2650_v6 = vmul.f32 %v5275_v5, %v5271_v49 }
0x136f   :  { %5097 = vmatmul.mubr.msk.f32.vlgmr.msra.gmra.mxu1 %vm581_vm3, %v2650_v6 }
0x1370   :  { %5105 = vmatpush3.xpose.msk.msra.mxu1 %vm426_vm2, %v2878_v53  ;;  %5106 = vmatprep.mubr.msk.f32.mxu1 %vm5441_vm1, %v5440_v55 }
0x1371   :  { %5114 = vmatprep.subr.mxu1 %v5440_v55 }
0x1373   :  { %5107 = vmatmul.mubr.msk.f32.vlgmr.msra.gmra.mxu1 %vm426_vm2, %v2876_v7 }
0x1374   :  { %5116 = vmatprep.mubr.msk.f32.mxu1 %vm5441_vm1, %v5440_v55 }
0x1422   :  { %v2871_v8 = vpop.f32.mrf.mxu0 }
0x1423   :  { %v2953_v9 = vmul.f32 0.25, %v2871_v8 }
0x1424   :  { %v5103_v10 = vpop.f32.mrf.mxu0 }
0x1425   :  { %v2955_v11 = vsel %vm581_vm3, %v2953_v9, -inf }
0x1426   :  { %2956 = vmax.xlane.f32.xlu0 %v2955_v11 }
0x142b   :  { %v6222_v12 = vpop.f32.mrf.mxu1 }
0x142d   :  { %v5093_v61 = vpop.f32.mrf.mxu1 }
0x142f   :  { %v6224_v13 = vpop.f32.mrf.mxu1 }
0x1431   :  { %v5098_v14 = vpop.f32.mrf.mxu1 }
0x1433   :  { %v2949_v15 = vpop.f32.mrf.mxu1 }
0x1434   :  { %v2954_v16 = vmul.f32 0.25, %v2949_v15 }
0x1435   :  { %v5108_v17 = vpop.f32.mrf.mxu1 }
0x1436   :  { %v2958_v18 = vsel %vm581_vm3, %v2954_v16, -inf }
0x1437   :  { %2959 = vmax.xlane.f32.xlu1 %v2958_v18 }
0x1448   :  { %3055 = vrot.lane.b32.xlu1 %v6174_v35, %s5442_s2 }
0x144c   :  { %3133 = vrot.lane.b32.xlu1 %v6169_v32, %s5443_s17 }
0x1450   :  { %3211 = vrot.lane.b32.xlu1 %v6167_v33, %s5443_s17 }
0x1454   :  { %3209 = vrot.lane.b32.xlu1 %v6163_v30, %s5443_s17 }
0x14af   :  { %v2957_v19 = vpop.xlane.xlu0 %2956 }
0x14b0   :  { %v2961_v20 = vsub.f32 %v2953_v9, %v2957_v19 }
0x14b2   :  { %v2963_v21 = vmul.f32 1.442695, %v2961_v20 }
0x14b4   :  { %5276 = vpow2.f32 %v2963_v21 }
0x14c0   :  { %v2960_v22 = vpop.xlane.xlu1 %2959 }
0x14c1   :  { %v5277_v23 = vpop.eup %5276  ;;  %v2962_v60 = vsub.f32 %v2954_v16, %v2960_v22 }
0x14c2   :  { %v2967_v24 = vsel %vm581_vm3, %v5277_v23, 0.0 }
0x14c3   :  { %2968 = vadd.xlane.f32.xlu0 %v2967_v24  ;;  %v2965_v56 = vmul.f32 1.442695, %v2962_v60 }
0x14c4   :  { %v3056_v25 = vpop.permute.xlu1 %3055 }
0x14c5   :  { %5115 = vmatpush3.msra.mxu1 %v3056_v25  ;;  %5278 = vpow2.f32 %v2965_v56 }
0x14c6   :  { %5124 = vmatprep.subr.mxu1 %v5440_v55 }
0x14c8   :  { %v3134_v40 = vpop.permute.xlu1 %3133 }
0x14cc   :  { %v3212_v26 = vpop.permute.xlu1 %3211 }
0x14d0   :  { %v3210_v44 = vpop.permute.xlu1 %3209 }
0x14d2   :  { %v5279_v27 = vpop.eup %5278 }
0x14d3   :  { %v2970_v28 = vsel %vm581_vm3, %v5279_v27, 0.0 }
0x14d9   :  { %2978 = vrot.lane.b32.xlu0 %v6183_v36, %s5442_s2 }
0x14f8   :  { %2971 = vadd.xlane.f32.xlu0 %v2970_v28 }
0x150e   :  { %3131 = vrot.lane.b32.xlu0 %v6165_v31, %s5443_s17 }
0x154c   :  { %v2969_v29 = vpop.xlane.xlu0 %2968 }
0x154d   :  { %5280 = vrcp.f32 %v2969_v29 }
0x1550   :  { %v2979_v37 = vpop.permute.xlu0 %2978 }
0x1551   :  { %5110 = vmatpush3.msra.mxu0 %v2979_v37 }
0x1552   :  { %5119 = vmatprep.subr.mxu0 %v5440_v55 }
0x155a   :  { %v5281_v39 = vpop.eup %5280 }
0x155b   :  { %v2975_v34 = vmul.f32 %v5281_v39, %v5277_v23 }
0x155d   :  { %5112 = vmatmul.mubr.msk.f32.vlgmr.msra.gmra.mxu0 %vm581_vm3, %v2975_v34 }
0x155e   :  { %5120 = vmatpush3.xpose.msk.msra.mxu0 %vm426_vm2, %v3134_v40  ;;  %5121 = vmatprep.mubr.msk.f32.mxu0 %vm5441_vm1, %v5440_v55 }
0x155f   :  { %5129 = vmatprep.subr.mxu0 %v5440_v55 }
0x1581   :  { %v2972_v59 = vpop.xlane.xlu0 %2971 }
0x1582   :  { %5282 = vrcp.f32 %v2972_v59 }
0x1585   :  { %v3132_v41 = vpop.permute.xlu0 %3131 }
0x1586   :  { %5122 = vmatmul.mubr.msk.f32.vlgmr.msra.gmra.mxu0 %vm426_vm2, %v3132_v41 }
0x1587   :  { %5131 = vmatprep.mubr.msk.f32.mxu0 %vm5441_vm1, %v5440_v55 }
0x158f   :  { %v5283_v42 = vpop.eup %5282 }
0x1590   :  { %v2976_v43 = vmul.f32 %v5283_v42, %v5279_v27 }
0x1592   :  { %5117 = vmatmul.mubr.msk.f32.vlgmr.msra.gmra.mxu1 %vm581_vm3, %v2976_v43 }
0x1593   :  { %5125 = vmatpush3.xpose.msk.msra.mxu1 %vm426_vm2, %v3212_v26  ;;  %5126 = vmatprep.mubr.msk.f32.mxu1 %vm5441_vm1, %v5440_v55 }
0x1594   :  { %5134 = vmatprep.subr.mxu1 %v5440_v55 }
0x1596   :  { %5127 = vmatmul.mubr.msk.f32.vlgmr.msra.gmra.mxu1 %vm426_vm2, %v3210_v44 }
0x1597   :  { %5136 = vmatprep.mubr.msk.f32.mxu1 %vm5441_vm1, %v5440_v55 }
0x161d   :  { %v6259_v45 = vpop.f32.mrf.mxu0 }
0x161f   :  { %v5113_v46 = vpop.f32.mrf.mxu0 }
0x1646   :  { %v3205_v47 = vpop.f32.mrf.mxu0 }
0x1647   :  { %v3287_v48 = vmul.f32 0.25, %v3205_v47 }
0x1648   :  { %v5123_v2 = vpop.f32.mrf.mxu0 }
0x1649   :  { %v3289_v1 = vsel %vm581_vm3, %v3287_v48, -inf }
0x164a   :  { %3290 = vmax.xlane.f32.xlu0 %v3289_v1 }
0x1652   :  { %v6262_v49 = vpop.f32.mrf.mxu1 }
0x1654   :  { %v5118_v50 = vpop.f32.mrf.mxu1 }
0x1656   :  { %v3283_v53 = vpop.f32.mrf.mxu1 }
0x1657   :  { %v3288_v62 = vmul.f32 0.25, %v3283_v53 }
0x1658   :  { %v5128_v63 = vpop.f32.mrf.mxu1 }
0x1659   :  { %v3292_v0 = vsel %vm581_vm3, %v3288_v62, -inf  ;;  %v4567_v63 = vld [vmem:[%s6587_s6 + $0x68] sm:$0xff] }
0x165a   :  { %3293 = vmax.xlane.f32.xlu1 %v3292_v0  ;;  %v4566_v0 = vld [vmem:[%s6587_s6 + $0x60] sm:$0xff] }
0x166b   :  { %3387 = vrot.lane.b32.xlu1 %v6174_v35, %s5443_s17 }
0x166f   :  { %3465 = vrot.lane.b32.xlu1 %v6169_v32, %s5444_s24 }
0x1673   :  { %3543 = vrot.lane.b32.xlu1 %v6167_v33, %s5444_s24 }
0x1677   :  { %3541 = vrot.lane.b32.xlu1 %v6163_v30, %s5444_s24 }
0x16d3   :  { %v3291_v3 = vpop.xlane.xlu0 %3290 }
0x16d4   :  { %v3295_v58 = vsub.f32 %v3287_v48, %v3291_v3  ;;  %v4565_v3 = vld [vmem:[%s6587_s6 + $0x58] sm:$0xff] }
0x16d6   :  { %v3297_v4 = vmul.f32 1.442695, %v3295_v58  ;;  %v4564_v58 = vld [vmem:[%s6587_s6 + $0x50] sm:$0xff] }
0x16d8   :  { %5284 = vpow2.f32 %v3297_v4  ;;  %v4563_v4 = vld [vmem:[%s6587_s6 + $0x48] sm:$0xff] }
0x16e3   :  { %v3294_v5 = vpop.xlane.xlu1 %3293 }
0x16e4   :  { %v3296_v33 = vsub.f32 %v3288_v62, %v3294_v5  ;;  %v4568_v62 = vld [vmem:[%s6587_s6 + $0x70] sm:$0xff]  ;;  %v4562_v5 = vld [vmem:[%s6587_s6 + $0x40] sm:$0xff] }
0x16e5   :  { %v5285_v6 = vpop.eup %5284 }
0x16e6   :  { %v3301_v7 = vsel %vm581_vm3, %v5285_v6, 0.0  ;;  %v3299_v32 = vmul.f32 1.442695, %v3296_v33 }
0x16e7   :  { %3302 = vadd.xlane.f32.xlu0 %v3301_v7  ;;  %v3388_v8 = vpop.permute.xlu1 %3387 }
0x16e8   :  { %5135 = vmatpush3.msra.mxu1 %v3388_v8  ;;  %5286 = vpow2.f32 %v3299_v32 }
0x16e9   :  { %5144 = vmatprep.subr.mxu1 %v5440_v55 }
0x16eb   :  { %v3466_v15 = vpop.permute.xlu1 %3465 }
0x16ef   :  { %v3544_v18 = vpop.permute.xlu1 %3543 }
0x16f3   :  { %v3542_v20 = vpop.permute.xlu1 %3541 }
0x16f5   :  { %v5287_v30 = vpop.eup %5286 }
0x16f6   :  { %v3304_v9 = vsel %vm581_vm3, %v5287_v30, 0.0 }
0x16fd   :  { %3311 = vrot.lane.b32.xlu0 %v6183_v36, %s5443_s17 }
0x171c   :  { %3305 = vadd.xlane.f32.xlu0 %v3304_v9 }
0x1732   :  { %3463 = vrot.lane.b32.xlu0 %v6165_v31, %s5444_s24 }
0x1770   :  { %v3303_v10 = vpop.xlane.xlu0 %3302 }
0x1771   :  { %5288 = vrcp.f32 %v3303_v10 }
0x1774   :  { %v3312_v11 = vpop.permute.xlu0 %3311 }
0x1775   :  { %5130 = vmatpush3.msra.mxu0 %v3312_v11 }
0x1776   :  { %5139 = vmatprep.subr.mxu0 %v5440_v55 }
0x177e   :  { %v5289_v61 = vpop.eup %5288 }
0x177f   :  { %v3309_v14 = vmul.f32 %v5289_v61, %v5285_v6 }
0x1781   :  { %5132 = vmatmul.mubr.msk.f32.vlgmr.msra.gmra.mxu0 %vm581_vm3, %v3309_v14 }
0x1782   :  { %5140 = vmatpush3.xpose.msk.msra.mxu0 %vm426_vm2, %v3466_v15  ;;  %5141 = vmatprep.mubr.msk.f32.mxu0 %vm5441_vm1, %v5440_v55 }
0x1783   :  { %5149 = vmatprep.subr.mxu0 %v5440_v55 }
0x17a5   :  { %v3306_v16 = vpop.xlane.xlu0 %3305 }
0x17a6   :  { %5290 = vrcp.f32 %v3306_v16 }
0x17a9   :  { %v3464_v31 = vpop.permute.xlu0 %3463 }
0x17aa   :  { %5142 = vmatmul.mubr.msk.f32.vlgmr.msra.gmra.mxu0 %vm426_vm2, %v3464_v31 }
0x17ab   :  { %5151 = vmatprep.mubr.msk.f32.mxu0 %vm5441_vm1, %v5440_v55 }
0x17b3   :  { %v5291_v17 = vpop.eup %5290 }
0x17b4   :  { %v3310_v19 = vmul.f32 %v5291_v17, %v5287_v30 }
0x17b6   :  { %5137 = vmatmul.mubr.msk.f32.vlgmr.msra.gmra.mxu1 %vm581_vm3, %v3310_v19 }
0x17b7   :  { %5145 = vmatpush3.xpose.msk.msra.mxu1 %vm426_vm2, %v3544_v18  ;;  %5146 = vmatprep.mubr.msk.f32.mxu1 %vm5441_vm1, %v5440_v55 }
0x17b8   :  { %5154 = vmatprep.subr.mxu1 %v5440_v55 }
0x17ba   :  { %5147 = vmatmul.mubr.msk.f32.vlgmr.msra.gmra.mxu1 %vm426_vm2, %v3542_v20 }
0x17bb   :  { %5156 = vmatprep.mubr.msk.f32.mxu1 %vm5441_vm1, %v5440_v55 }
0x1841   :  { %v3383_v21 = vpop.f32.mrf.mxu0 }
0x1843   :  { %v5133_v22 = vpop.f32.mrf.mxu0 }
0x186a   :  { %v3537_v23 = vpop.f32.mrf.mxu0 }
0x186b   :  { %v3619_v24 = vmul.f32 0.25, %v3537_v23 }
0x186c   :  { %v5143_v25 = vpop.f32.mrf.mxu0 }
0x186d   :  { %v3621_v60 = vsel %vm581_vm3, %v3619_v24, -inf }
0x186e   :  { %3622 = vmax.xlane.f32.xlu0 %v3621_v60 }
0x1876   :  { %v3459_v56 = vpop.f32.mrf.mxu1 }
0x1878   :  { %v5138_v27 = vpop.f32.mrf.mxu1 }
0x187a   :  { %v3615_v28 = vpop.f32.mrf.mxu1 }
0x187b   :  { %v3620_v29 = vmul.f32 0.25, %v3615_v28 }
0x187c   :  { %v5148_v37 = vpop.f32.mrf.mxu1 }
0x187d   :  { %v3624_v39 = vsel %vm581_vm3, %v3620_v29, -inf }
0x187e   :  { %3625 = vmax.xlane.f32.xlu1 %v3624_v39 }
0x188f   :  { %3719 = vrot.lane.b32.xlu1 %v6174_v35, %s5444_s24 }
0x1893   :  { %3797 = vrot.lane.b32.xlu1 %v6259_v45, %s5433_s25 }
0x1897   :  { %3799 = vrot.lane.b32.xlu1 %v6262_v49, %s5433_s25 }
0x189b   :  { %3807 = vrot.lane.b32.xlu1 %v3459_v56, %s5445_s26 }
0x18f7   :  { %v3623_v34 = vpop.xlane.xlu0 %3622 }
0x18f8   :  { %v3627_v40 = vsub.f32 %v3619_v24, %v3623_v34 }
0x18fa   :  { %v3629_v59 = vmul.f32 1.442695, %v3627_v40  ;;  %v4593_v40 = vld [vmem:[%s6591_s10 + $0xf8] sm:$0xff] }
0x18fc   :  { %5292 = vpow2.f32 %v3629_v59  ;;  %v4592_v59 = vld [vmem:[%s6591_s10 + $0xf0] sm:$0xff] }
0x1907   :  { %v3626_v41 = vpop.xlane.xlu1 %3625 }
0x1908   :  { %v3628_v42 = vsub.f32 %v3620_v29, %v3626_v41  ;;  %v4591_v41 = vld [vmem:[%s6591_s10 + $0xe8] sm:$0xff] }
0x1909   :  { %v5293_v26 = vpop.eup %5292 }
0x190a   :  { %v3631_v43 = vmul.f32 1.442695, %v3628_v42  ;;  %v3633_v44 = vsel %vm581_vm3, %v5293_v26, 0.0  ;;  %v4590_v42 = vld [vmem:[%s6591_s10 + $0xe0] sm:$0xff] }
0x190b   :  { %3634 = vadd.xlane.f32.xlu0 %v3633_v44  ;;  %v3720_v35 = vpop.permute.xlu1 %3719  ;;  %v4587_v44 = vld [vmem:[%s6591_s10 + $0xc8] sm:$0xff] }
0x190c   :  { %5294 = vpow2.f32 %v3631_v43  ;;  %5155 = vmatpush3.msra.mxu1 %v3720_v35  ;;  %v4588_v43 = vld [vmem:[%s6591_s10 + $0xd0] sm:$0xff]  ;;  %v4586_v35 = vld [vmem:[%s6591_s10 + $0xc0] sm:$0xff] }
0x190d   :  { %4023 = vmatprep.subr.mxu1 %v4593_v40  ;;  %v4614_v40 = vld [vmem:[%s6593_s12 + $0x188] sm:$0xff] }
0x190f   :  { %v3798_v32 = vpop.permute.xlu1 %3797 }
0x1910   :  { %v3819_v9 = vsel %vm426_vm2, %v6222_v12, %v3798_v32  ;;  %v4571_v12 = vld [vmem:[%s6588_s7 + $0x1] ss:$0 sm:$0xff] }
0x1911   :  { %v4576_v32 = vld [vmem:[%s6589_s8 + $0x1] ss:$0 sm:$0xff] }
0x1913   :  { %v3800_v61 = vpop.permute.xlu1 %3799 }
0x1914   :  { %v3820_v16 = vsel %vm426_vm2, %v6224_v13, %v3800_v61 }
0x1917   :  { %v3808_v15 = vpop.permute.xlu1 %3807 }
0x1918   :  { %v3822_v31 = vsel %vm1774_vm5, %v3820_v16, %v3808_v15 }
0x1919   :  { %v5295_v45 = vpop.eup %5294 }
0x191a   :  { %v3636_v46 = vsel %vm581_vm3, %v5295_v45, 0.0 }
0x191b   :  { %3637 = vadd.xlane.f32.xlu0 %v3636_v46  ;;  %v4584_v46 = vld [vmem:[%s6591_s10 + $0xb0] sm:$0xff] }
0x1931   :  { %3643 = vrot.lane.b32.xlu0 %v6183_v36, %s5444_s24  ;;  %v4569_v36 = vld [vmem:[%s6587_s6 + $0x78] sm:$0xff] }
0x1935   :  { %3805 = vrot.lane.b32.xlu0 %v3383_v21, %s5445_s26 }
0x1994   :  { %v3635_v47 = vpop.xlane.xlu0 %3634 }
0x1995   :  { %5296 = vrcp.f32 %v3635_v47  ;;  %v4583_v47 = vld [vmem:[%s6591_s10 + $0xa8] sm:$0xff] }
0x19a2   :  { %v5297_v2 = vpop.eup %5296 }
0x19a3   :  { %v3641_v49 = vmul.f32 %v5297_v2, %v5293_v26  ;;  %v4589_v26 = vld [vmem:[%s6591_s10 + $0xd8] sm:$0xff] }
0x19a4   :  { %v3638_v48 = vpop.xlane.xlu0 %3637  ;;  %v4581_v2 = vld [vmem:[%s6591_s10 + $0x98] sm:$0xff] }
0x19a5   :  { %5298 = vrcp.f32 %v3638_v48  ;;  %v4582_v48 = vld [vmem:[%s6591_s10 + $0xa0] sm:$0xff] }
0x19a8   :  { %v3644_v1 = vpop.permute.xlu0 %3643 }
0x19a9   :  { %5150 = vmatpush3.msra.mxu0 %v3644_v1  ;;  %v4580_v1 = vld [vmem:[%s6591_s10 + $0x90] sm:$0xff] }
0x19aa   :  { %5152 = vmatmul.mubr.msk.f32.vlgmr.msra.gmra.mxu0 %vm581_vm3, %v3641_v49  ;;  %5159 = vmatprep.subr.mxu0 %v4569_v36  ;;  %v4579_v49 = vld [vmem:[%s6591_s10 + $0x88] sm:$0xff] }
0x19ab   :  { %5160 = vmatpush3.msra.mxu0 %v4569_v36  ;;  %v4612_v36 = vld [vmem:[%s6593_s12 + $0x178] sm:$0xff] }
0x19ac   :  { %5161 = vmatprep.subr.mxu0 %v4568_v62  ;;  %v3806_v30 = vpop.permute.xlu0 %3805 }
0x19ad   :  { %5162 = vmatpush3.msra.mxu0 %v4568_v62  ;;  %v3821_v10 = vsel %vm1774_vm5, %v3819_v9, %v3806_v30  ;;  %v4627_v62 = vld [vmem:[%s6593_s12 + $0x1f0] sm:$0xff]  ;;  %v4577_v9 = vld [vmem:[%s6590_s9 + $0x1] ss:$0 sm:$0xff] }
0x19ae   :  { %5163 = vmatprep.subr.mxu0 %v4567_v63 }
0x19af   :  { %5164 = vmatpush3.msra.mxu0 %v4567_v63  ;;  %v4611_v63 = vld [vmem:[%s6593_s12 + $0x170] sm:$0xff] }
0x19b0   :  { %5165 = vmatprep.subr.mxu0 %v4566_v0 }
0x19b1   :  { %5166 = vmatpush3.msra.mxu0 %v4566_v0  ;;  %v4626_v0 = vld [vmem:[%s6593_s12 + $0x1e8] sm:$0xff] }
0x19b2   :  { %v5299_v50 = vpop.eup %5298  ;;  %5167 = vmatprep.subr.mxu0 %v4565_v3 }
0x19b3   :  { %v3642_v53 = vmul.f32 %v5299_v50, %v5295_v45  ;;  %5168 = vmatpush3.msra.mxu0 %v4565_v3  ;;  %v4585_v45 = vld [vmem:[%s6591_s10 + $0xb8] sm:$0xff]  ;;  %v4578_v50 = vld [vmem:[%s6591_s10 + $0x80] sm:$0xff]  ;;  %v4610_v3 = vld [vmem:[%s6593_s12 + $0x168] sm:$0xff] }
0x19b4   :  { %5169 = vmatprep.subr.mxu0 %v4564_v58 }
0x19b5   :  { %5157 = vmatmul.mubr.msk.f32.vlgmr.msra.gmra.mxu1 %vm581_vm3, %v3642_v53  ;;  %5170 = vmatpush3.msra.mxu0 %v4564_v58  ;;  %v4628_v53 = vld [vmem:[%s6593_s12 + $0x1f8] sm:$0xff] }
0x19b6   :  { %4071 = vmatprep.mubr.f32.mxu1 %v5440_v55  ;;  %5171 = vmatprep.subr.mxu0 %v4563_v4 }
0x19b7   :  { %5172 = vmatpush3.msra.mxu0 %v4563_v4  ;;  %4024 = vmatpush1.msra.mxu1 %v4592_v59  ;;  %v4598_v59 = vld [vmem:[%s6593_s12 + $0x108] sm:$0xff] }
0x19b8   :  { %5173 = vmatprep.subr.mxu0 %v4562_v5  ;;  %4025 = vmatprep.subr.mxu1 %v4591_v41  ;;  %v4613_v41 = vld [vmem:[%s6593_s12 + $0x180] sm:$0xff] }
0x19b9   :  { %5174 = vmatpush3.msra.mxu0 %v4562_v5  ;;  %4026 = vmatpush1.msra.mxu1 %v4590_v42  ;;  %v4597_v42 = vld [vmem:[%s6593_s12 + $0x100] sm:$0xff] }
0x19ba   :  { %4027 = vmatprep.subr.mxu1 %v4589_v26  ;;  %4819 = vmatprep.subr.mxu0 %v4628_v53  ;;  %v4594_v26 = vld [vmem:[%s6592_s11 + $0x2] sm:$0x3] }
0x19bb   :  { %4028 = vmatpush1.msra.mxu1 %v4588_v43  ;;  %v3994_v43 = vrot.slane %v4594_v26, %v1942_v52 }
0x19bc   :  { %4029 = vmatprep.subr.mxu1 %v4587_v44  ;;  %v3998_v44 = vrot.slane %v4594_v26, %v1946_v54  ;;  %v4632_v26 = vld [vmem:[%s6596_s15] ss:$0 sm:$0xff] }
0x19bd   :  { %4030 = vmatpush1.msra.mxu1 %v4586_v35 }
0x19be   :  { %4031 = vmatprep.subr.mxu1 %v4585_v45 }
0x19bf   :  { %4032 = vmatpush1.msra.mxu1 %v4584_v46 }
0x19c0   :  { %4033 = vmatprep.subr.mxu1 %v4583_v47 }
0x19c1   :  { %4034 = vmatpush1.msra.mxu1 %v4582_v48 }
0x19c2   :  { %4035 = vmatprep.subr.mxu1 %v4581_v2 }
0x19c3   :  { %4036 = vmatpush1.msra.mxu1 %v4580_v1 }
0x19c4   :  { %4037 = vmatprep.subr.mxu1 %v4579_v49 }
0x19c5   :  { %4038 = vmatpush1.msra.mxu1 %v4578_v50 }
0x19c6   :  { %5178 = vmatprep.subr.mxu1 %v5440_v55 }
0x1a6a   :  { %v3715_v6 = vpop.f32.mrf.mxu0 }
0x1a6b   :  { %3813 = vrot.lane.b32.xlu0 %v3715_v6, %s6616_s5 }
0x1a6c   :  { %v5153_v7 = vpop.f32.mrf.mxu0 }
0x1a75   :  { %v3791_v8 = vpop.f32.mrf.mxu1 }
0x1a76   :  { %3815 = vrot.lane.b32.xlu1 %v3791_v8, %s6616_s5 }
0x1a77   :  { %v5158_v33 = vpop.f32.mrf.mxu1 }
0x1add   :  { %v3814_v11 = vpop.permute.xlu0 %3813 }
0x1ade   :  { %v3823_v14 = vsel %vm1777_vm4, %v3821_v10, %v3814_v11 }
0x1adf   :  { %5175 = vmatprep.mubr.msk.f32.mxu0 %vm127_vm0, %v3823_v14 }
0x1ae8   :  { %v3816_v17 = vpop.permute.xlu1 %3815 }
0x1ae9   :  { %v3824_v18 = vsel %vm1777_vm4, %v3822_v31, %v3816_v17  ;;  %v4625_v31 = vld [vmem:[%s6593_s12 + $0x1e0] sm:$0xff] }
0x1aea   :  { %5176 = vmatmul.mubr.msk.f32.vlgmr.msra.gmra.mxu0 %vm127_vm0, %v3824_v18  ;;  %v4609_v17 = vld [vmem:[%s6593_s12 + $0x160] sm:$0xff]  ;;  %v4624_v18 = vld [vmem:[%s6593_s12 + $0x1d8] sm:$0xff] }
0x1aeb   :  { %4820 = vmatpush3.msra.mxu0 %v4612_v36 }
0x1aec   :  { %4821 = vmatprep.subr.mxu0 %v4627_v62 }
0x1aed   :  { %4822 = vmatpush3.msra.mxu0 %v4611_v63 }
0x1aee   :  { %4823 = vmatprep.subr.mxu0 %v4626_v0 }
0x1aef   :  { %4824 = vmatpush3.msra.mxu0 %v4610_v3 }
0x1af0   :  { %4825 = vmatprep.subr.mxu0 %v4625_v31  ;;  %v4630_v31 = vld [vmem:[%s6594_s13 + $0x1] ss:$0 sm:$0xff] }
0x1af1   :  { %4826 = vmatpush3.msra.mxu0 %v4609_v17 }
0x1af2   :  { %4827 = vmatprep.subr.mxu0 %v4624_v18 }
0x1baa   :  { %v5177_v19 = vpop.f32.mrf.mxu0 }
0x1bab   :  { %v3920_v20 = vadd.f32 %v5177_v19, %v4571_v12  ;;  %v4623_v19 = vld [vmem:[%s6593_s12 + $0x1d0] sm:$0xff] }
0x1bac   :  { %v3914_v21 = vpop.f32.mrf.mxu0 }
0x1bad   :  { %v3915_v22 = vadd.f32 %v4571_v12, %v3914_v21  ;;  %v3924_v23 = vadd.f32 %v3920_v20, %v6061_v38  ;;  %v4608_v12 = vld [vmem:[%s6593_s12 + $0x158] sm:$0xff]  ;;  %v4607_v20 = vld [vmem:[%s6593_s12 + $0x150] sm:$0xff]  ;;  %v4622_v21 = vld [vmem:[%s6593_s12 + $0x1c8] sm:$0xff] }
0x1bae   :  { %4828 = vmatpush3.msra.mxu0 %v4608_v12 }
0x1baf   :  { %v3932_v24 = vsel %vm127_vm0, %v3924_v23, 0.0  ;;  %v3923_v13 = vadd.f32 %v3915_v22, %v6056_v57  ;;  %4829 = vmatprep.subr.mxu0 %v4623_v19  ;;  %v4606_v22 = vld [vmem:[%s6593_s12 + $0x148] sm:$0xff] }
0x1bb0   :  { %3933 = vadd.xlane.f32.xlu1 %v3932_v24  ;;  %4830 = vmatpush3.msra.mxu0 %v4607_v20  ;;  %v4605_v24 = vld [vmem:[%s6593_s12 + $0x140] sm:$0xff] }
0x1bb1   :  { %v3929_v25 = vsel %vm127_vm0, %v3923_v13, 0.0  ;;  %4831 = vmatprep.subr.mxu0 %v4622_v21 }
0x1bb2   :  { %3930 = vadd.xlane.f32.xlu0 %v3929_v25  ;;  %4832 = vmatpush3.msra.mxu0 %v4606_v22  ;;  %v4604_v25 = vld [vmem:[%s6593_s12 + $0x138] sm:$0xff] }
0x1c39   :  { %v3934_v60 = vpop.xlane.xlu1 %3933 }
0x1c3a   :  { %v3936_v56 = vmul.f32 0.015625, %v3934_v60  ;;  %v4619_v60 = vld [vmem:[%s6593_s12 + $0x1b0] sm:$0xff] }
0x1c3b   :  { %v3931_v27 = vpop.xlane.xlu0 %3930 }
0x1c3c   :  { %v3935_v28 = vmul.f32 0.015625, %v3931_v27  ;;  %v6357_v29 = vsub.f32 %v3924_v23, %v3936_v56  ;;  %v4621_v23 = vld [vmem:[%s6593_s12 + $0x1c0] sm:$0xff]  ;;  %v4603_v56 = vld [vmem:[%s6593_s12 + $0x130] sm:$0xff]  ;;  %v4618_v27 = vld [vmem:[%s6593_s12 + $0x1a8] sm:$0xff] }
0x1c3d   :  { %4833 = vmatprep.subr.mxu0 %v4621_v23 }
0x1c3e   :  { %v3937_v37 = vsub.f32 %v3923_v13, %v3935_v28  ;;  %v3940_v38 = vmul.f32 %v6357_v29, %v6357_v29  ;;  %4834 = vmatpush3.msra.mxu0 %v4605_v24  ;;  %v4620_v13 = vld [vmem:[%s6593_s12 + $0x1b8] sm:$0xff]  ;;  %v4602_v28 = vld [vmem:[%s6593_s12 + $0x128] sm:$0xff] }
0x1c3f   :  { %4835 = vmatprep.subr.mxu0 %v4620_v13 }
0x1c40   :  { %v3939_v39 = vmul.f32 %v3937_v37, %v3937_v37  ;;  %v3944_v57 = vsel %vm127_vm0, %v3940_v38, 0.0  ;;  %4836 = vmatpush3.msra.mxu0 %v4604_v25  ;;  %v4615_v38 = vld [vmem:[%s6593_s12 + $0x190] sm:$0xff] }
0x1c41   :  { %4837 = vmatprep.subr.mxu0 %v4619_v60 }
0x1c42   :  { %v3941_v34 = vsel %vm127_vm0, %v3939_v39, 0.0  ;;  %4838 = vmatpush3.msra.mxu0 %v4603_v56  ;;  %v4616_v39 = vld [vmem:[%s6593_s12 + $0x198] sm:$0xff] }
0x1c43   :  { %3942 = vadd.xlane.f32.xlu0 %v3941_v34  ;;  %4839 = vmatprep.subr.mxu0 %v4618_v27  ;;  %v4600_v34 = vld [vmem:[%s6593_s12 + $0x118] sm:$0xff] }
0x1c44   :  { %4840 = vmatpush3.msra.mxu0 %v4602_v28 }
0x1c47   :  { %3945 = vadd.xlane.f32.xlu0 %v3944_v57  ;;  %v4599_v57 = vld [vmem:[%s6593_s12 + $0x110] sm:$0xff] }
0x1ccc   :  { %v3943_v58 = vpop.xlane.xlu0 %3942 }
0x1ccd   :  { %v3947_v4 = vmul.f32 0.015625, %v3943_v58 }
0x1ccf   :  { %v3949_v5 = vadd.f32 1e-05, %v3947_v4 }
0x1cd0   :  { %v3946_v6 = vpop.xlane.xlu0 %3945 }
0x1cd1   :  { %5300 = vrsqrt.f32 %v3949_v5  ;;  %v3948_v7 = vmul.f32 0.015625, %v3946_v6 }
0x1cd3   :  { %v3950_v8 = vadd.f32 1e-05, %v3948_v7 }
0x1cd5   :  { %5302 = vrsqrt.f32 %v3950_v8 }
0x1cde   :  { %v5301_v33 = vpop.eup %5300 }
0x1cdf   :  { %v3953_v30 = vmul.f32 %v5301_v33, %v3937_v37  ;;  %v4601_v37 = vld [vmem:[%s6593_s12 + $0x120] sm:$0xff] }
0x1ce1   :  { %v3961_v10 = vmul.f32 %v4576_v32, %v3953_v30 }
0x1ce2   :  { %v5303_v11 = vpop.eup %5302 }
0x1ce3   :  { %v6436_v61 = vadd.f32 %v4577_v9, %v3961_v10  ;;  %v3954_v14 = vmul.f32 %v5303_v11, %v6357_v29  ;;  %v4617_v29 = vld [vmem:[%s6593_s12 + $0x1a0] sm:$0xff] }
0x1ce4   :  { %4841 = vmatprep.subr.mxu0 %v4617_v29 }
0x1ce5   :  { %4595 = vmatmul.mubr.msk.f32.vlgmr.msra.gmra.mxu1 %vm127_vm0, %v6436_v61  ;;  %v3962_v15 = vmul.f32 %v4576_v32, %v3954_v14  ;;  %4842 = vmatpush3.msra.mxu0 %v4601_v37 }
0x1ce6   :  { %4077 = vmatprep.mubr.f32.mxu1 %v5440_v55  ;;  %4843 = vmatprep.subr.mxu0 %v4616_v39 }
0x1ce7   :  { %v6442_v16 = vadd.f32 %v4577_v9, %v3962_v15  ;;  %4844 = vmatpush3.msra.mxu0 %v4600_v34 }
0x1ce8   :  { %4845 = vmatprep.subr.mxu0 %v4615_v38 }
0x1ce9   :  { %4596 = vmatmul.mubr.msk.f32.gmra.mxu1 %vm127_vm0, %v6442_v16  ;;  %4846 = vmatpush3.msra.mxu0 %v4599_v57 }
0x1cea   :  { %5194 = vmatprep.mubr.msk.f32.mxu1 %vm5441_vm1, %v5440_v55  ;;  %4847 = vmatprep.subr.mxu0 %v4614_v40 }
0x1ceb   :  { %4848 = vmatpush3.msra.mxu0 %v4598_v59 }
0x1cec   :  { %4849 = vmatprep.subr.mxu0 %v4613_v41  ;;  %v4631_v41 = vld [vmem:[%s6595_s14] ss:$0 sm:$0xff] }
0x1ced   :  { %4850 = vmatpush3.msra.mxu0 %v4597_v42 }
0x1da5   :  { %v4073_v35 = vpop.f32.mrf.mxu1 }
0x1da6   :  { %v4074_v45 = vadd.f32 %v4073_v35, %v3994_v43  ;;  %v4633_v35 = vld [vmem:[%s6597_s16] ss:$0 sm:$0xff]  ;;  %s5448_s16 = smov [#allocation11]  }
0x1da7   :  { %v4075_v46 = vpop.f32.mrf.mxu1  ;;  %s4455_s6 = sshll.u32 %s5448_s16, 4  ;;  %s4456_s6 = int_to_ptr.vmem [resolvable:$true] %s4455_s6 }
0x1da8   :  { %v4088_v47 = vmul.f32 0.70710677, %v4074_v45  ;;  %v4076_v48 = vadd.f32 %v4075_v46, %v3998_v44  ;;  %v4084_v58 = vmul.f32 0.5, %v4074_v45  ;;  %s5404_s10 = scalar_lea.vmem %s4456_s6, 32  ;;  %p5409_p7 = scmp.lt.s32.totalorder %s4456_s6, %s4456_s6 }
0x1da9   :  { %v4079_v2 = vpop.f32.mrf.mxu1  ;;  %p5405_p6 = scmp.ne.s32.totalorder %s4456_s6, %s5404_s10  ;;  %p5410_p8 = scmp.lt.s32.totalorder %s5404_s10, %s5404_s10 }
0x1daa   :  { %5304 = verf.f32 %v4088_v47  ;;  %v4089_v1 = vmul.f32 0.70710677, %v4076_v48  ;;  %v4080_v49 = vadd.f32 %v4079_v2, %v3994_v43  ;;  %v4085_v54 = vmul.f32 0.5, %v4076_v48 }
0x1dab   :  { %v4081_v50 = vpop.f32.mrf.mxu1  ;;  %p5411_p9 = por %p5410_p8, %p5409_p7 }
0x1dac   :  { %5306 = verf.f32 %v4089_v1  ;;  %v4090_v53 = vmul.f32 0.70710677, %v4080_v49  ;;  %v4082_v36 = vadd.f32 %v4081_v50, %v3998_v44  ;;  %v4086_v32 = vmul.f32 0.5, %v4080_v49 }
0x1dad   :  { %p5412_p10 = pnand %p5411_p9, %p5405_p6 }
0x1dae   :  { %5308 = verf.f32 %v4090_v53  ;;  %v4091_v62 = vmul.f32 0.70710677, %v4082_v36  ;;  %v4087_v8 = vmul.f32 0.5, %v4082_v36  ;;  %v5447_v53 = vmov 0   ;;  %v4634_v36 = vld [vmem:[#allocation2] ss:$0 sm:$0xff] }
0x1daf   :  { %5214 = vset.pattern.permute.xlu0 %v5447_v53  ;;  %5215 = vset.pattern.permute.xlu1 %v5447_v53 }
0x1db0   :  { %5310 = verf.f32 %v4091_v62 }
0x1db7   :  { %v5305_v52 = vpop.eup %5304 }
0x1db8   :  { %v4096_v51 = vadd.f32 1.0, %v5305_v52 }
0x1db9   :  { %v5307_v63 = vpop.eup %5306 }
0x1dba   :  { %v4097_v0 = vadd.f32 1.0, %v5307_v63  ;;  %v4100_v6 = vmul.f32 %v4096_v51, %v4084_v58 }
0x1dbb   :  { %v5309_v3 = vpop.eup %5308 }
0x1dbc   :  { %v4101_v4 = vmul.f32 %v4097_v0, %v4085_v54  ;;  %v4098_v7 = vadd.f32 1.0, %v5309_v3 }
0x1dbd   :  { %v5311_v5 = vpop.eup %5310 }
0x1dbe   :  { %4201 = vmatprep.mubr.f32.mxu0 %v4101_v4  ;;  %v4099_v33 = vadd.f32 1.0, %v5311_v5  ;;  %v4102_v9 = vmul.f32 %v4098_v7, %v4086_v32 }
0x1dbf   :  { %4202 = vmatmul.mubr.f32.vlgmr.msra.gmra.mxu0 %v4100_v6 }
0x1dc0   :  { %v4103_v30 = vmul.f32 %v4099_v33, %v4087_v8 }
0x1dc2   :  { %4206 = vmatprep.mubr.f32.mxu0 %v4103_v30 }
0x1dc3   :  { %4207 = vmatmul.mubr.f32.gmra.mxu0 %v4102_v9 }
0x1e7f   :  { %v4851_v10 = vpop.f32.mrf.mxu0 }
0x1e81   :  { %v4852_v11 = vpop.f32.mrf.mxu0 }
0x1e82   :  { %v4853_v14 = vadd.f32 %v4852_v11, %v4851_v10 }
0x1e83   :  { %v4854_v15 = vpop.f32.mrf.mxu0 }
0x1e84   :  { %v4212_v17 = vadd.f32 %v4853_v14, %v6436_v61 }
0x1e85   :  { %v4855_v18 = vpop.f32.mrf.mxu0 }
0x1e86   :  { %v4856_v12 = vadd.f32 %v4855_v18, %v4854_v15  ;;  %v4222_v19 = vadd.f32 %v4630_v31, %v4212_v17 }
0x1e88   :  { %v4213_v20 = vadd.f32 %v4856_v12, %v6442_v16  ;;  %v4226_v21 = vsel %vm127_vm0, %v4222_v19, 0.0 }
0x1e89   :  { %4227 = vadd.xlane.f32.xlu0 %v4226_v21 }
0x1e8a   :  { %v4223_v22 = vadd.f32 %v4630_v31, %v4213_v20 }
0x1e8c   :  { %v4229_v23 = vsel %vm127_vm0, %v4223_v22, 0.0 }
0x1e8d   :  { %4230 = vadd.xlane.f32.xlu1 %v4229_v23 }
0x1f12   :  { %v4228_v24 = vpop.xlane.xlu0 %4227 }
0x1f13   :  { %v4232_v13 = vmul.f32 0.015625, %v4228_v24 }
0x1f15   :  { %v4234_v25 = vsub.f32 %v4222_v19, %v4232_v13 }
0x1f16   :  { %v4231_v60 = vpop.xlane.xlu1 %4230 }
0x1f17   :  { %v4233_v56 = vmul.f32 0.015625, %v4231_v60  ;;  %v4236_v27 = vmul.f32 %v4234_v25, %v4234_v25 }
0x1f19   :  { %v4235_v28 = vsub.f32 %v4223_v22, %v4233_v56  ;;  %v4238_v61 = vsel %vm127_vm0, %v4236_v27, 0.0 }
0x1f1a   :  { %4239 = vadd.xlane.f32.xlu0 %v4238_v61 }
0x1f1b   :  { %v4237_v29 = vmul.f32 %v4235_v28, %v4235_v28 }
0x1f1d   :  { %v4241_v16 = vsel %vm127_vm0, %v4237_v29, 0.0 }
0x1f1e   :  { %4242 = vadd.xlane.f32.xlu1 %v4241_v16 }
0x1fa3   :  { %v4240_v37 = vpop.xlane.xlu0 %4239 }
0x1fa4   :  { %v4244_v39 = vmul.f32 0.015625, %v4240_v37 }
0x1fa6   :  { %v4246_v34 = vadd.f32 1e-05, %v4244_v39  ;;  %v4364_v39 = vld [vmem:[#allocation9 + $0x38] sm:$0xff] }
0x1fa7   :  { %v4243_v38 = vpop.xlane.xlu1 %4242  ;;  %5179 = vmatpush3.msra.mxu1 %v4364_v39 }
0x1fa8   :  { %5312 = vrsqrt.f32 %v4246_v34  ;;  %v4245_v57 = vmul.f32 0.015625, %v4243_v38  ;;  %5180 = vmatprep.subr.mxu1 %v5440_v55  ;;  %v4363_v38 = vld [vmem:[#allocation9 + $0x30] sm:$0xff] }
0x1fa9   :  { %5181 = vmatpush3.msra.mxu1 %v4363_v38 }
0x1faa   :  { %v4247_v40 = vadd.f32 1e-05, %v4245_v57  ;;  %5182 = vmatprep.subr.mxu1 %v5440_v55  ;;  %v4362_v57 = vld [vmem:[#allocation9 + $0x28] sm:$0xff] }
0x1fab   :  { %5183 = vmatpush3.msra.mxu1 %v4362_v57 }
0x1fac   :  { %5314 = vrsqrt.f32 %v4247_v40  ;;  %5184 = vmatprep.subr.mxu1 %v5440_v55  ;;  %v4361_v40 = vld [vmem:[#allocation9 + $0x20] sm:$0xff] }
0x1fad   :  { %5185 = vmatpush3.msra.mxu1 %v4361_v40 }
0x1fae   :  { %5186 = vmatprep.subr.mxu1 %v5440_v55 }
0x1fb5   :  { %v5313_v59 = vpop.eup %5312 }
0x1fb6   :  { %v4250_v42 = vmul.f32 %v5313_v59, %v4234_v25  ;;  %v4360_v59 = vld [vmem:[#allocation9 + $0x18] sm:$0xff] }
0x1fb7   :  { %5187 = vmatpush3.msra.mxu1 %v4360_v59 }
0x1fb8   :  { %v4258_v43 = vmul.f32 %v4631_v41, %v4250_v42  ;;  %5188 = vmatprep.subr.mxu1 %v5440_v55  ;;  %v4358_v42 = vld [vmem:[#allocation9 + $0x8] sm:$0xff] }
0x1fb9   :  { %v5315_v44 = vpop.eup %5314 }
0x1fba   :  { %v6551_v45 = vadd.f32 %v4632_v26, %v4258_v43  ;;  %v4251_v46 = vmul.f32 %v5315_v44, %v4235_v28 }
0x1fbc   :  { %v4275_v47 = vmul.f32 %v4633_v35, %v6551_v45  ;;  %v4259_v48 = vmul.f32 %v4631_v41, %v4251_v46  ;;  %v4359_v41 = vld [vmem:[#allocation9 + $0x10] sm:$0xff] }
0x1fbd   :  { %5189 = vmatpush3.msra.mxu1 %v4359_v41 }
0x1fbe   :  { %v4277_v2 = vsel %vm127_vm0, %v4275_v47, 0.0  ;;  %v6555_v1 = vadd.f32 %v4632_v26, %v4259_v48  ;;  %5190 = vmatprep.subr.mxu1 %v5440_v55  ;;  %v4357_v26 = vld [vmem:[#allocation9] sm:$0xff] }
0x1fbf   :  { %4278 = vadd.xlane.f32.xlu0 %v4277_v2  ;;  %5191 = vmatpush3.msra.mxu1 %v4358_v42 }
0x1fc0   :  { %v4276_v49 = vmul.f32 %v4633_v35, %v6555_v1  ;;  %5192 = vmatprep.subr.mxu1 %v5440_v55 }
0x1fc1   :  { %5193 = vmatpush3.msra.mxu1 %v4357_v26 }
0x1fc2   :  { %v4280_v50 = vsel %vm127_vm0, %v4276_v49, 0.0 }
0x1fc3   :  { %4281 = vadd.xlane.f32.xlu1 %v4280_v50 }
0x2048   :  { %v4279_v62 = vpop.xlane.xlu0 %4278 }
0x2049   :  { %v4290_v52 = vadd.f32 %v4634_v36, %v4279_v62 }
0x204b   :  { %v4293_v63 = vsel %vm4292_vm6, %v4290_v52, -inf }
0x204c   :  { %v4294_v51 = vrot.slane %v4293_v63, 4  ;;  %v4282_v54 = vpop.xlane.xlu1 %4281 }
0x204d   :  { %v4291_v0 = vadd.f32 %v4634_v36, %v4282_v54 }
0x204e   :  { %v4295_v3 = vmax.f32 %v4293_v63, %v4294_v51 }
0x204f   :  { %v4300_v58 = vsel %vm4292_vm6, %v4291_v0, -inf }
0x2050   :  { %v4296_v4 = vrot.slane %v4295_v3, 2  ;;  %v4301_v5 = vrot.slane %v4300_v58, 4 }
0x2052   :  { %v4297_v6 = vmax.f32 %v4295_v3, %v4296_v4  ;;  %v4302_v7 = vmax.f32 %v4300_v58, %v4301_v5 }
0x2054   :  { %v4298_v8 = vrot.slane %v4297_v6, 1  ;;  %v4303_v33 = vrot.slane %v4302_v7, 2 }
0x2056   :  { %v4299_v32 = vmax.f32 %v4297_v6, %v4298_v8  ;;  %v4304_v30 = vmax.f32 %v4302_v7, %v4303_v33 }
0x2058   :  { %v4307_v9 = vsub.f32 %v4290_v52, %v4299_v32  ;;  %v4305_v10 = vrot.slane %v4304_v30, 1 }
0x205a   :  { %v4309_v11 = vmul.f32 1.442695, %v4307_v9  ;;  %v4306_v14 = vmax.f32 %v4304_v30, %v4305_v10 }
0x205c   :  { %5316 = vpow2.f32 %v4309_v11  ;;  %v4308_v15 = vsub.f32 %v4291_v0, %v4306_v14 }
0x205e   :  { %v4311_v31 = vmul.f32 1.442695, %v4308_v15 }
0x2060   :  { %5318 = vpow2.f32 %v4311_v31 }
0x2069   :  { %v5317_v17 = vpop.eup %5316 }
0x206a   :  { %v4313_v18 = vsel %vm4292_vm6, %v5317_v17, 0.0 }
0x206b   :  { %v4314_v12 = vrot.slane %v4313_v18, 4 }
0x206d   :  { %v5319_v19 = vpop.eup %5318  ;;  %v4315_v20 = vadd.f32 %v4314_v12, %v4313_v18 }
0x206e   :  { %v4320_v21 = vsel %vm4292_vm6, %v5319_v19, 0.0 }
0x206f   :  { %v4316_v22 = vrot.slane %v4315_v20, 2  ;;  %v4321_v23 = vrot.slane %v4320_v21, 4 }
0x2071   :  { %v4317_v24 = vadd.f32 %v4316_v22, %v4315_v20  ;;  %v4322_v13 = vadd.f32 %v4321_v23, %v4320_v21 }
0x2073   :  { %v4318_v25 = vrot.slane %v4317_v24, 1  ;;  %v4323_v60 = vrot.slane %v4322_v13, 2 }
0x2075   :  { %v4319_v56 = vadd.f32 %v4318_v25, %v4317_v24  ;;  %v4324_v27 = vadd.f32 %v4323_v60, %v4322_v13 }
0x2077   :  { %5320 = vrcp.f32 %v4319_v56  ;;  %v4325_v28 = vrot.slane %v4324_v27, 1 }
0x2079   :  { %v4326_v61 = vadd.f32 %v4325_v28, %v4324_v27 }
0x207b   :  { %5322 = vrcp.f32 %v4326_v61 }
0x2084   :  { %v5321_v29 = vpop.eup %5320 }
0x2085   :  { %v4329_v16 = vmul.f32 %v5321_v29, %v5317_v17 }
0x2087   :  { %4333 = vperm.xlu0 %5214, %v4329_v16  }
0x2088   :  { %v5323_v37 = vpop.eup %5322 }
0x2089   :  { %v4330_v34 = vmul.f32 %v5323_v37, %v5319_v19 }
0x208b   :  { %4338 = vperm.xlu1 %5215, %v4330_v34  }
0x2102   :  { %v4334_v43 = vpop.permute.xlu0 %4333 }
0x2103   :  { %v4341_v44 = vmul.f32 %v4334_v43, %v6551_v45 }
0x2105   :  { %v4343_v35 = vsel %vm127_vm0, %v4341_v44, 0.0 }
0x2106   :  { %v4344_v46 = vrot.slane %v4343_v35, 4  ;;  %v4339_v47 = vpop.permute.xlu1 %4338 }
0x2107   :  { %v4342_v48 = vmul.f32 %v4339_v47, %v6555_v1  ;;  %v4635_v1 = vld [vmem:[%s6600_s19] ss:$0 sm:$0xff] }
0x2108   :  { %v4345_v2 = vadd.f32 %v4344_v46, %v4343_v35 }
0x2109   :  { %v4350_v49 = vsel %vm127_vm0, %v4342_v48, 0.0 }
0x210a   :  { %v4346_v50 = vrot.slane %v4345_v2, 2  ;;  %v4351_v53 = vrot.slane %v4350_v49, 4 }
0x210c   :  { %v4347_v36 = vadd.f32 %v4346_v50, %v4345_v2  ;;  %v4352_v62 = vadd.f32 %v4351_v53, %v4350_v49 }
0x210e   :  { %v4353_v52 = vrot.slane %v4352_v62, 2  ;;  %v4348_v63 = vrot.slane %v4347_v36, 1 }
0x2110   :  { %v4354_v55 = vadd.f32 %v4353_v52, %v4352_v62  ;;  %v4349_v54 = vadd.f32 %v4348_v63, %v4347_v36 }
0x2112   :  { %v4355_v51 = vrot.slane %v4354_v55, 1 }
0x2114   :  { %v4356_v45 = vadd.f32 %v4355_v51, %v4354_v55 }
0x2116   :  { %v4375_v0 = vsel %vm4374_vm7, %v4356_v45, %v4349_v54 }
0x2117   :  { %5195 = vmatmul.mubr.msk.f32.vlgmr.msra.gmra.mxu1 %vm127_vm0, %v4375_v0 }
0x21d7   :  { %v4444_v3 = vpop.f32.mrf.mxu1 }
0x21d8   :  { %v4445_v58 = vadd.f32 %v4635_v1, %v4444_v3 }
0x21d9   :  { %v5196_v4 = vpop.f32.mrf.mxu1 }
0x21da   :  { %4448 = vst [vmem:[#allocation11] sm:$0x3] %v4445_v58 }
0x21db   :  { %5415 = shalt.err (!%p5412_p10)
}
0x21dc   :  { %4458 = dma.vmem_to_hbm [thread:$0]  %s4456_s6, 32, %s6601_s20, [#allocation5]  }
0x21dd   :  { %5430 = dma.done.wait [#allocation5], 32  }
0x21de   :  { %5431 = vsyncadd [#allocation5], 4294967264 }
0x21df   :  { %4462 = vsyncpa [#allocation4], 1 }
0x21e0   :  { %4463 = vsyncpa [#allocation7], 1 }
0x21e1   :  { %4464 = vsyncpa [#allocation10], 1 }
0x21e2   :  { %4465 = vsyncpa [#allocation5], 1 }

</bundles_post_ra>
